<compile_context>
chip_gen: v7x
topology: tpu7x:2x2x1
jax: 0.10.0
libtpu: 0.0.40
codegen_flags: <defaults>
</compile_context>

<pallas_src>
import jax
import jax.numpy as jnp
from jax.experimental import pallas as pl
from jax.experimental.pallas import tpu as pltpu

N_INPUTS = 3
N_OUTPUTS = 2
N_FREQS = 20
MAX_FREQ = 20.0
H1 = 128
H2 = 64
N_HALF = N_INPUTS * N_FREQS          # 60
N_EMB = 2 * N_HALF                   # 120
N_PROJ_IN = 8                        # [x0, x1, x2, 1, 0, 0, 0, 0] (sublane-aligned K for the MXU)


def ffnet_kernel(xt_ref, a_ref, w1t_ref, w2t_ref, b2_ref, w3t_ref, b3_ref, ot_ref):
    # Fourier projection as one small MXU pass: A (120, 8) @ [x^T; 1; 0s] (8, T).
    # Column 3 of A carries the +pi/2 phase for the cos rows, so a single lane-full sin()
    # produces both the sin and cos halves of the embedding.
    proj = jnp.dot(a_ref[...], xt_ref[...], preferred_element_type=jnp.float32)   # (120, T)
    emb = jnp.sin(proj)                                                            # (120, T)

    # Linear(120, 128, bias=False) + ReLU  (single fused matmul over the full embedding)
    h1 = jnp.maximum(
        jnp.dot(w1t_ref[...], emb, preferred_element_type=jnp.float32), 0.0)       # (128, T)
    # Linear(128, 64) + ReLU
    h2 = jnp.maximum(
        jnp.dot(w2t_ref[...], h1, preferred_element_type=jnp.float32) + b2_ref[...], 0.0)  # (64, T)
    # Linear(64, 2) -> lane-dense (2, T) store
    ot_ref[...] = (jnp.dot(w3t_ref[...], h2, preferred_element_type=jnp.float32)
                   + b3_ref[...]).astype(ot_ref.dtype)                             # (2, T)


def ffnet_forward(x, params, tile=4096):
    a, w1t, w2t, b2, w3t, b3 = params
    n = x.shape[0]

    # Tile size: multiple of 128 lanes; don't over-pad tiny batches.
    tile = max(128, (min(tile, pl.cdiv(n, 128) * 128) // 128) * 128)
    n_pad = pl.cdiv(n, tile) * tile
    grid = (n_pad // tile,)

    # Transposed, padded, extended input: rows 0..2 = x^T, row 3 = 1 (phase column), rows 4..7 = 0.
    xt = jnp.zeros((N_PROJ_IN, n_pad), jnp.float32)
    xt = xt.at[:N_INPUTS, :n].set(x.astype(jnp.float32).T)
    xt = xt.at[N_INPUTS, :].set(1.0)

    const = lambda shape: pl.BlockSpec(shape, lambda i: (0, 0))   # VMEM-resident across steps

    out_t = pl.pallas_call(
        ffnet_kernel,
        out_shape=jax.ShapeDtypeStruct((N_OUTPUTS, n_pad), jnp.float32),
        grid=grid,
        in_specs=[
            pl.BlockSpec((N_PROJ_IN, tile), lambda i: (0, i)),    # x tile (batch on lanes)
            const((N_EMB, N_PROJ_IN)),                            # A (freqs + phase column)
            const((H1, N_EMB)),                                   # W1^T
            const((H2, H1)),                                      # W2^T
            const((H2, 1)),                                       # b2
            const((N_OUTPUTS, H2)),                               # W3^T
            const((N_OUTPUTS, 1)),                                # b3
        ],
        out_specs=pl.BlockSpec((N_OUTPUTS, tile), lambda i: (0, i)),
        compiler_params=pltpu.CompilerParams(
            dimension_semantics=("parallel",),
            vmem_limit_bytes=64 * 1024 * 1024,
        ),
    )(xt, a, w1t, w2t, b2, w3t, b3)

    return out_t[:, :n].T                                          # (n, 2)


def make_params(key):
    k1, k2, k3 = jax.random.split(key, 3)

    # FourierFeatures frequencies (geometric schedule, see TODO above).
    exps = jnp.linspace(0.0, 1.0, N_FREQS)
    freqs = 2.0 * jnp.pi * (MAX_FREQ ** exps)                      # (F,)

    # A[r, d] = frequency for embedding row r if it projects input dim d, else 0.
    # Rows [0, 60) are the sin rows (r = d*F + k); rows [60, 120) are the cos rows and get a
    # +pi/2 phase in column 3 (which multiplies the constant-1 row of the extended input).
    a = jnp.zeros((N_EMB, N_PROJ_IN), jnp.float32)
    for d in range(N_INPUTS):
        a = a.at[d * N_FREQS:(d + 1) * N_FREQS, d].set(freqs)
        a = a.at[N_HALF + d * N_FREQS:N_HALF + (d + 1) * N_FREQS, d].set(freqs)
    a = a.at[N_HALF:, N_INPUTS].set(jnp.pi / 2)

    def linear_init(key, fan_in, fan_out, bias):
        kw, kb = jax.random.split(key)
        bound = 1.0 / jnp.sqrt(fan_in)
        # Stored transposed (out_features, in_features): kernel computes y^T = W_stored @ x^T.
        w_t = jax.random.uniform(kw, (fan_out, fan_in), jnp.float32, -bound, bound)
        b = (jax.random.uniform(kb, (fan_out, 1), jnp.float32, -bound, bound)
             if bias else None)
        return w_t, b

    w1t, _ = linear_init(k1, N_EMB, H1, bias=False)                # (128, 120)
    w2t, b2 = linear_init(k2, H1, H2, bias=True)                   # (64, 128), (64, 1)
    w3t, b3 = linear_init(k3, H2, N_OUTPUTS, bias=True)            # (2, 64),   (2, 1)
    return (a, w1t, w2t, b2, w3t, b3)


def ffnet_reference(x, params):
    """Pure-JAX reference matching the module semantics (explicit sin/cos concat)."""
    a, w1t, w2t, b2, w3t, b3 = params
    proj = x @ a[:N_HALF, :N_INPUTS].T                             # (n, 60) block-diag projection
    emb = jnp.concatenate([jnp.sin(proj), jnp.cos(proj)], axis=-1)  # (n, 120)
    h1 = jnp.maximum(emb @ w1t.T, 0.0)
    h2 = jnp.maximum(h1 @ w2t.T + b2[:, 0], 0.0)
    return h2 @ w3t.T + b3[:, 0]


if __name__ == "__main__":
    key = jax.random.PRNGKey(0)
    kx, kp = jax.random.split(key)
    params = make_params(kp)

    # Small demo: n not a multiple of the tile, and a tile small enough to give grid > 1,
    # so both the batch tiling and the remainder padding paths are exercised.
    n = 200
    x = jax.random.uniform(kx, (n, N_INPUTS), jnp.float32, -1.0, 1.0)

    ref = ffnet_reference(x, params)

    out_tiled = jax.block_until_ready(ffnet_forward(x, params, tile=128))   # grid = (2,)
    out_default = jax.block_until_ready(ffnet_forward(x, params))            # clamped single tile

    assert out_tiled.shape == (n, N_OUTPUTS)
    assert jnp.allclose(out_tiled, ref, atol=1e-4, rtol=1e-4)
    assert jnp.allclose(out_default, ref, atol=1e-4, rtol=1e-4)

    print("KERNEL_OK")
</pallas_src>

<mosaic_0001>
module attributes {stable_mosaic.version = 11 : i64} {
  func.func @ffnet_kernel(%arg0: i32, %arg1: memref<8x128xf32, #tpu.memory_space<vmem>>, %arg2: memref<120x8xf32, #tpu.memory_space<vmem>>, %arg3: memref<128x120xf32, #tpu.memory_space<vmem>>, %arg4: memref<64x128xf32, #tpu.memory_space<vmem>>, %arg5: memref<64x1xf32, #tpu.memory_space<vmem>>, %arg6: memref<2x64xf32, #tpu.memory_space<vmem>>, %arg7: memref<2x1xf32, #tpu.memory_space<vmem>>, %arg8: memref<2x128xf32, #tpu.memory_space<vmem>>) attributes {dimension_semantics = [#tpu.dimension_semantics<parallel>], iteration_bounds = array<i64: 2>, scalar_prefetch = 0 : i64, scratch_operands = 0 : i64, tpu.core_type = #tpu.core_type<tc>, window_params = [{transform_indices = @transform_0, window_bounds = array<i64: 8, 128>}, {pipeline_mode = #tpu.pipeline_mode<synchronous>, transform_indices = @transform_1, window_bounds = array<i64: 120, 8>}, {pipeline_mode = #tpu.pipeline_mode<synchronous>, transform_indices = @transform_2, window_bounds = array<i64: 128, 120>}, {pipeline_mode = #tpu.pipeline_mode<synchronous>, transform_indices = @transform_3, window_bounds = array<i64: 64, 128>}, {pipeline_mode = #tpu.pipeline_mode<synchronous>, transform_indices = @transform_4, window_bounds = array<i64: 64, 1>}, {pipeline_mode = #tpu.pipeline_mode<synchronous>, transform_indices = @transform_5, window_bounds = array<i64: 2, 64>}, {pipeline_mode = #tpu.pipeline_mode<synchronous>, transform_indices = @transform_6, window_bounds = array<i64: 2, 1>}, {transform_indices = @transform_7, window_bounds = array<i64: 2, 128>}]} {
    %c0 = arith.constant 0 : index
    %c0_0 = arith.constant 0 : index
    %0 = vector.load %arg2[%c0, %c0_0] : memref<120x8xf32, #tpu.memory_space<vmem>>, vector<120x8xf32>
    %c0_1 = arith.constant 0 : index
    %c0_2 = arith.constant 0 : index
    %1 = vector.load %arg1[%c0_1, %c0_2] : memref<8x128xf32, #tpu.memory_space<vmem>>, vector<8x128xf32>
    %cst = arith.constant dense<0.000000e+00> : vector<120x128xf32>
    %2 = tpu.matmul %0, %1, %cst {dimension_numbers = #tpu.dot_dimension_numbers<[1], [0], [0], [1], [0, 0, 1, 1], [], []>} : vector<120x8xf32>, vector<8x128xf32>, vector<120x128xf32> -> vector<120x128xf32>
    %3 = math.sin %2 : vector<120x128xf32>
    %c0_3 = arith.constant 0 : index
    %c0_4 = arith.constant 0 : index
    %4 = vector.load %arg3[%c0_3, %c0_4] : memref<128x120xf32, #tpu.memory_space<vmem>>, vector<128x120xf32>
    %cst_5 = arith.constant dense<0.000000e+00> : vector<128x128xf32>
    %5 = tpu.matmul %4, %3, %cst_5 {dimension_numbers = #tpu.dot_dimension_numbers<[1], [0], [0], [1], [0, 0, 1, 1], [], []>} : vector<128x120xf32>, vector<120x128xf32>, vector<128x128xf32> -> vector<128x128xf32>
    %cst_6 = arith.constant 0.000000e+00 : f32
    %6 = vector.broadcast %cst_6 : f32 to vector<128x128xf32>
    %7 = arith.maximumf %5, %6 : vector<128x128xf32>
    %c0_7 = arith.constant 0 : index
    %c0_8 = arith.constant 0 : index
    %8 = vector.load %arg4[%c0_7, %c0_8] : memref<64x128xf32, #tpu.memory_space<vmem>>, vector<64x128xf32>
    %cst_9 = arith.constant dense<0.000000e+00> : vector<64x128xf32>
    %9 = tpu.matmul %8, %7, %cst_9 {dimension_numbers = #tpu.dot_dimension_numbers<[1], [0], [0], [1], [0, 0, 1, 1], [], []>} : vector<64x128xf32>, vector<128x128xf32>, vector<64x128xf32> -> vector<64x128xf32>
    %c0_10 = arith.constant 0 : index
    %c0_11 = arith.constant 0 : index
    %10 = vector.load %arg5[%c0_10, %c0_11] : memref<64x1xf32, #tpu.memory_space<vmem>>, vector<64x1xf32>
    %11 = vector.broadcast %10 : vector<64x1xf32> to vector<64x128xf32>
    %12 = arith.addf %9, %11 : vector<64x128xf32>
    %cst_12 = arith.constant 0.000000e+00 : f32
    %13 = vector.broadcast %cst_12 : f32 to vector<64x128xf32>
    %14 = arith.maximumf %12, %13 : vector<64x128xf32>
    %c0_13 = arith.constant 0 : index
    %c0_14 = arith.constant 0 : index
    %15 = vector.load %arg6[%c0_13, %c0_14] : memref<2x64xf32, #tpu.memory_space<vmem>>, vector<2x64xf32>
    %cst_15 = arith.constant dense<0.000000e+00> : vector<2x128xf32>
    %16 = tpu.matmul %15, %14, %cst_15 {dimension_numbers = #tpu.dot_dimension_numbers<[1], [0], [0], [1], [0, 0, 1, 1], [], []>} : vector<2x64xf32>, vector<64x128xf32>, vector<2x128xf32> -> vector<2x128xf32>
    %c0_16 = arith.constant 0 : index
    %c0_17 = arith.constant 0 : index
    %17 = vector.load %arg7[%c0_16, %c0_17] : memref<2x1xf32, #tpu.memory_space<vmem>>, vector<2x1xf32>
    %18 = vector.broadcast %17 : vector<2x1xf32> to vector<2x128xf32>
    %19 = arith.addf %16, %18 : vector<2x128xf32>
    %c0_18 = arith.constant 0 : index
    %c0_19 = arith.constant 0 : index
    %20 = vector.load %arg8[%c0_18, %c0_19] : memref<2x128xf32, #tpu.memory_space<vmem>>, vector<2x128xf32>
    tpu.vector_store %arg8[%c0_18, %c0_19], %19 {strides = array<i32>} : memref<2x128xf32, #tpu.memory_space<vmem>>, vector<2x128xf32>,
    return
  }
  func.func @transform_0(%arg0: i32) -> (i32, i32) {
    %c0_i32 = arith.constant 0 : i32
    %c0_i32_0 = arith.constant 0 : i32
    return %c0_i32, %arg0 : i32, i32
  }
  func.func @transform_1(%arg0: i32) -> (i32, i32) {
    %c0_i32 = arith.constant 0 : i32
    %c0_i32_0 = arith.constant 0 : i32
    %c0_i32_1 = arith.constant 0 : i32
    return %c0_i32, %c0_i32_0 : i32, i32
  }
  func.func @transform_2(%arg0: i32) -> (i32, i32) {
    %c0_i32 = arith.constant 0 : i32
    %c0_i32_0 = arith.constant 0 : i32
    %c0_i32_1 = arith.constant 0 : i32
    return %c0_i32, %c0_i32_0 : i32, i32
  }
  func.func @transform_3(%arg0: i32) -> (i32, i32) {
    %c0_i32 = arith.constant 0 : i32
    %c0_i32_0 = arith.constant 0 : i32
    %c0_i32_1 = arith.constant 0 : i32
    return %c0_i32, %c0_i32_0 : i32, i32
  }
  func.func @transform_4(%arg0: i32) -> (i32, i32) {
    %c0_i32 = arith.constant 0 : i32
    %c0_i32_0 = arith.constant 0 : i32
    %c0_i32_1 = arith.constant 0 : i32
    return %c0_i32, %c0_i32_0 : i32, i32
  }
  func.func @transform_5(%arg0: i32) -> (i32, i32) {
    %c0_i32 = arith.constant 0 : i32
    %c0_i32_0 = arith.constant 0 : i32
    %c0_i32_1 = arith.constant 0 : i32
    return %c0_i32, %c0_i32_0 : i32, i32
  }
  func.func @transform_6(%arg0: i32) -> (i32, i32) {
    %c0_i32 = arith.constant 0 : i32
    %c0_i32_0 = arith.constant 0 : i32
    %c0_i32_1 = arith.constant 0 : i32
    return %c0_i32, %c0_i32_0 : i32, i32
  }
  func.func @transform_7(%arg0: i32) -> (i32, i32) {
    %c0_i32 = arith.constant 0 : i32
    %c0_i32_0 = arith.constant 0 : i32
    return %c0_i32, %arg0 : i32, i32
  }
}

</mosaic_0001>

<bundles_post_ra>
// kernel: tpu_custom_call.1
= control target key start
LH: loop header
LB: loop body
LE: loop exit
PB: predicated region body
PF: predicated region fallthrough
CT: control target
= control target key end

     0   :  { %12 = vsyncpa [#allocation3], 0  ;;  %s5574_s0 = inlined_call_operand.hbm [shape: f32[8,256], index: 0, kind: input, shape index: {}]   ;;  %s5575_s1 = inlined_call_operand.hbm [shape: f32[120,8], index: 1, kind: input, shape index: {}]   ;;  %s5576_s2 = inlined_call_operand.hbm [shape: f32[128,120], index: 2, kind: input, shape index: {}]   ;;  %s5577_s3 = inlined_call_operand.hbm [shape: f32[64,128], index: 3, kind: input, shape index: {}]   ;;  %s5578_s4 = inlined_call_operand.hbm [shape: f32[64,1], index: 4, kind: input, shape index: {}]   ;;  %s5579_s5 = inlined_call_operand.hbm [shape: f32[2,64], index: 5, kind: input, shape index: {}]   ;;  %s5580_s6 = inlined_call_operand.hbm [shape: f32[2,1], index: 6, kind: input, shape index: {}]   ;;  %s5581_s7 = inlined_call_operand.hbm [shape: f32[2,256], index: 7, kind: output, shape index: {}]  }
   0x1   :  { %14 = vsyncpa [#allocation3 + $0x1], 0 }
   0x2   :  { %15 = vsyncpa [#allocation6], 0 }
   0x3   :  { %16 = vsyncpa [#allocation9], 0 }
   0x4   :  { %17 = vsyncpa [#allocation12], 0 }
   0x5   :  { %18 = vsyncpa [#allocation4], 0 }
   0x6   :  { %20 = vsyncpa [#allocation4 + $0x1], 0  ;;  %s3770_s24 = smov 0   ;;  %s3772_s25 = smov 0  }
   0x7   :  { %s3774_s26 = smov 0   ;;  %s3776_s27 = smov 0  }
   0x8 LB: > { %s3710_s28 = smov [#allocation5]   ;;  %s3791_s30 = sadd.s32 4294967295, %s3708_s27   ;;  %s3708_s27 = sphi %s3776_s27, %s5766_s27   ;;  %s3704_s26 = sphi %s3774_s26, %s5765_s26   ;;  %s3700_s25 = sphi %s3772_s25, %s5764_s25   ;;  %s3696_s24 = sphi %s3770_s24, %s5763_s24  }
   0x9   : > { %s221_s29 = sshll.u32 %s3710_s28, 4  ;;  %p2758_p0 = scmp.ge.s32.totalorder %s3708_s27, 1  ;;  %s3796_s29 = int_to_ptr.vmem [resolvable:$true] %s221_s29 }
   0xa   : > { %p5582_p1 = scmp.eq.s32.totalorder %s3791_s30, 0  ;;  %p209_p2 = scmp.lt.s32.totalorder %s3708_s27, 3 }
   0xb   : > { %s3711_s9 = smov [#allocation8]   ;;  %s3712_s12 = smov [#allocation11]  }
   0xc   : > { %p3798_p3 = pnand %p2758_p0, %p209_p2  ;;  %s247_s10 = sshll.u32 %s3711_s9, 4  ;;  %s3811_s10 = int_to_ptr.vmem [resolvable:$true] %s247_s10 }
   0xd   : > { %s274_s13 = sshll.u32 %s3712_s12, 4  ;;  %s3432_s16 = scalar_lea.hbm %s5575_s1, 1920  ;;  %s3813_s13 = int_to_ptr.vmem [resolvable:$true] %s274_s13 }
   0xe   : > { %s5635_s8 = scalar_select %p3798_p3, 1, 0 }
   0xf   : > { %p3279_p5 = pneg %p3798_p3  ;;  %p3433_p7 = scmp.ne.s32.totalorder %s5575_s1, %s3432_s16 }
  0x10   : > { %p3439_p11 = scmp.lt.u32.totalorder %s3432_s16, %s5575_s1 }
  0x11   : > { %p3807_p6 = pnand %p3279_p5, %p5582_p1 }
  0x13   : > { %p3823_p8 = pneg %p3807_p6 }
  0x15   : > { %p3435_p9 = pnand %p3823_p8, %p3433_p7 }
  0x17   : > { %p3436_p10 = pneg %p3435_p9 }
  0x19   : > { %p3441_p12 = pnand %p3439_p11, %p3436_p10 }
  0x1b   : > { %3444 = shalt.err (!%p3441_p12)
}
  0x1c   : > { %s3445_s22 = scalar_lea.vmem %s3796_s29, 1920  ;;  %p3453_p5 = scmp.lt.s32.totalorder %s3796_s29, %s3796_s29 }
  0x1d   : > { %p3446_p13 = scmp.ne.s32.totalorder %s3796_s29, %s3445_s22  ;;  %p3454_p4 = scmp.lt.s32.totalorder %s3445_s22, %s3445_s22 }
  0x1f   : > { %p3448_p0 = pnand %p3446_p13, %p3823_p8  ;;  %p3455_p7 = por %p3454_p4, %p3453_p5 }
  0x21   : > { %p3449_p2 = pneg %p3448_p0 }
  0x23   : > { %p3456_p9 = pnand %p3455_p7, %p3449_p2 }
  0x25   : > { %3459 = shalt.err (!%p3456_p9)
}
  0x26   : > { %s3713_s23 = smov 128   ;;  %s3714_s28 = smov 8  }
  0x27   : > { %3282 = dma.hbm_to_vmem [thread:$0]  (!%p3807_p6), %s5575_s1, 1920, %s3796_s29, [#allocation6], %s3713_s23, %s3713_s23, %s3714_s28  }
  0x28   : > { %s3460_s16 = scalar_lea.hbm %s5577_s3, 1024 }
  0x29   : > { %p3461_p4 = scmp.ne.s32.totalorder %s5577_s3, %s3460_s16  ;;  %p3467_p12 = scmp.lt.u32.totalorder %s3460_s16, %s5577_s3 }
  0x2b   : > { %p3463_p10 = pnand %p3461_p4, %p3823_p8 }
  0x2d   : > { %p3464_p11 = pneg %p3463_p10 }
  0x2f   : > { %p3469_p13 = pnand %p3467_p12, %p3464_p11 }
  0x31   : > { %3472 = shalt.err (!%p3469_p13)
}
  0x32   : > { %s3473_s29 = scalar_lea.vmem %s3811_s10, 1024  ;;  %p3481_p7 = scmp.lt.s32.totalorder %s3811_s10, %s3811_s10 }
  0x33   : > { %p3474_p0 = scmp.ne.s32.totalorder %s3811_s10, %s3473_s29  ;;  %p3482_p9 = scmp.lt.s32.totalorder %s3473_s29, %s3473_s29 }
  0x35   : > { %p3476_p2 = pnand %p3474_p0, %p3823_p8  ;;  %p3483_p4 = por %p3482_p9, %p3481_p7 }
  0x37   : > { %p3477_p5 = pneg %p3476_p2 }
  0x39   : > { %p3484_p10 = pnand %p3483_p4, %p3477_p5 }
  0x3b   : > { %3487 = shalt.err (!%p3484_p10)
}
  0x3c   : > { %3288 = dma.hbm_to_vmem [thread:$0]  (!%p3807_p6), %s5577_s3, 1024, %s3811_s10, [#allocation9], %s3713_s23, %s3713_s23, %s3714_s28  }
  0x3d   : > { %s3488_s15 = scalar_lea.hbm %s5579_s5, 32 }
  0x3e   : > { %p3489_p11 = scmp.ne.s32.totalorder %s5579_s5, %s3488_s15  ;;  %p3495_p0 = scmp.lt.u32.totalorder %s3488_s15, %s5579_s5 }
  0x40   : > { %p3491_p12 = pnand %p3489_p11, %p3823_p8 }
  0x42   : > { %p3492_p13 = pneg %p3491_p12 }
  0x44   : > { %p3497_p2 = pnand %p3495_p0, %p3492_p13 }
  0x46   : > { %3500 = shalt.err (!%p3497_p2)
}
  0x47   : > { %s3501_s10 = scalar_lea.vmem %s3813_s13, 32  ;;  %p3509_p4 = scmp.lt.s32.totalorder %s3813_s13, %s3813_s13 }
  0x48   : > { %p3502_p5 = scmp.ne.s32.totalorder %s3813_s13, %s3501_s10  ;;  %p3510_p10 = scmp.lt.s32.totalorder %s3501_s10, %s3501_s10 }
  0x4a   : > { %p3504_p7 = pnand %p3502_p5, %p3823_p8  ;;  %p3511_p11 = por %p3510_p10, %p3509_p4 }
  0x4c   : > { %p3505_p9 = pneg %p3504_p7 }
  0x4e   : > { %p3512_p12 = pnand %p3511_p11, %p3505_p9 }
  0x50   : > { %3515 = shalt.err (!%p3512_p12)
}
  0x51   : > { %3294 = dma.hbm_to_vmem [thread:$0]  (!%p3807_p6), %s5579_s5, 32, %s3813_s13, [#allocation12]  }
  0x52   : > { %s3715_s22 = smov [#allocation7]   ;;  %s3716_s12 = smov [#allocation10]  }
  0x53   : > { %s234_s9 = sshll.u32 %s3715_s22, 4  ;;  %s260_s14 = sshll.u32 %s3716_s12, 4  ;;  %s235_s9 = int_to_ptr.vmem [resolvable:$true] %s234_s9  ;;  %s261_s14 = int_to_ptr.vmem [resolvable:$true] %s260_s14 }
  0x54   : > { %s3516_s17 = scalar_lea.hbm %s5576_s2, 2048 }
  0x55   : > { %p3517_p13 = scmp.ne.s32.totalorder %s5576_s2, %s3516_s17  ;;  %p3523_p5 = scmp.lt.u32.totalorder %s3516_s17, %s5576_s2 }
  0x57   : > { %p3519_p0 = pnand %p3517_p13, %p3823_p8 }
  0x59   : > { %p3520_p2 = pneg %p3519_p0 }
  0x5b   : > { %p3525_p7 = pnand %p3523_p5, %p3520_p2 }
  0x5d   : > { %3528 = shalt.err (!%p3525_p7)
}
  0x5e   : > { %s3529_s13 = scalar_lea.vmem %s235_s9, 2048  ;;  %p3537_p11 = scmp.lt.s32.totalorder %s235_s9, %s235_s9 }
  0x5f   : > { %p3530_p9 = scmp.ne.s32.totalorder %s235_s9, %s3529_s13  ;;  %p3538_p12 = scmp.lt.s32.totalorder %s3529_s13, %s3529_s13 }
  0x61   : > { %p3532_p4 = pnand %p3530_p9, %p3823_p8  ;;  %p3539_p1 = por %p3538_p12, %p3537_p11 }
  0x63   : > { %p3533_p10 = pneg %p3532_p4 }
  0x65   : > { %p3540_p3 = pnand %p3539_p1, %p3533_p10 }
  0x67   : > { %3543 = shalt.err (!%p3540_p3)
}
  0x68   : > { %3285 = dma.hbm_to_vmem [thread:$0]  (!%p3807_p6), %s5576_s2, 2048, %s235_s9, [#allocation6], %s3713_s23, %s3713_s23, %s3714_s28  }
  0x69   : > { %s3544_s16 = scalar_lea.hbm %s5578_s4, 1024 }
  0x6a   : > { %p3545_p1 = scmp.ne.s32.totalorder %s5578_s4, %s3544_s16  ;;  %p3551_p0 = scmp.lt.u32.totalorder %s3544_s16, %s5578_s4 }
  0x6c   : > { %p3547_p3 = pnand %p3545_p1, %p3823_p8 }
  0x6e   : > { %p3548_p13 = pneg %p3547_p3 }
  0x70   : > { %p3553_p2 = pnand %p3551_p0, %p3548_p13 }
  0x72   : > { %3556 = shalt.err (!%p3553_p2)
}
  0x73   : > { %s3557_s21 = scalar_lea.vmem %s261_s14, 1024  ;;  %p3565_p4 = scmp.lt.s32.totalorder %s261_s14, %s261_s14 }
  0x74   : > { %p3558_p5 = scmp.ne.s32.totalorder %s261_s14, %s3557_s21  ;;  %p3566_p10 = scmp.lt.s32.totalorder %s3557_s21, %s3557_s21 }
  0x76   : > { %p3560_p7 = pnand %p3558_p5, %p3823_p8  ;;  %p3567_p11 = por %p3566_p10, %p3565_p4 }
  0x78   : > { %p3561_p9 = pneg %p3560_p7 }
  0x7a   : > { %p3568_p12 = pnand %p3567_p11, %p3561_p9 }
  0x7c   : > { %3571 = shalt.err (!%p3568_p12)
}
  0x7d   : > { %3291 = dma.hbm_to_vmem [thread:$0]  (!%p3807_p6), %s5578_s4, 1024, %s261_s14, [#allocation9], %s3713_s23, %s3713_s23, %s3714_s28  }
  0x7e   : > { %s3717_s29 = smov [#allocation13]   ;;  %s3572_s16 = scalar_lea.hbm %s5580_s6, 32 }
  0x7f   : > { %s285_s22 = sshll.u32 %s3717_s29, 4  ;;  %p3573_p1 = scmp.ne.s32.totalorder %s5580_s6, %s3572_s16  ;;  %s286_s22 = int_to_ptr.vmem [resolvable:$true] %s285_s22 }
  0x80   : > { %p3579_p0 = scmp.lt.u32.totalorder %s3572_s16, %s5580_s6 }
  0x81   : > { %p3575_p3 = pnand %p3573_p1, %p3823_p8 }
  0x83   : > { %p3576_p13 = pneg %p3575_p3 }
  0x85   : > { %p3581_p2 = pnand %p3579_p0, %p3576_p13 }
  0x87   : > { %3584 = shalt.err (!%p3581_p2)
}
  0x88   : > { %s3585_s23 = scalar_lea.vmem %s286_s22, 32  ;;  %p3593_p4 = scmp.lt.s32.totalorder %s286_s22, %s286_s22 }
  0x89   : > { %p3586_p5 = scmp.ne.s32.totalorder %s286_s22, %s3585_s23  ;;  %p3594_p10 = scmp.lt.s32.totalorder %s3585_s23, %s3585_s23 }
  0x8b   : > { %p3588_p7 = pnand %p3586_p5, %p3823_p8  ;;  %p3595_p11 = por %p3594_p10, %p3593_p4 }
  0x8d   : > { %p3589_p9 = pneg %p3588_p7 }
  0x8f   : > { %p3596_p12 = pnand %p3595_p11, %p3589_p9 }
  0x91   : > { %3599 = shalt.err (!%p3596_p12)
}
  0x92   : > { %3297 = dma.hbm_to_vmem [thread:$0]  (!%p3807_p6), %s5580_s6, 32, %s286_s22, [#allocation12]  }
  0x93   : > { %s2757_s19 = sadd.s32 4294967294, %s3708_s27   ;;  %s3958_s11 = sadd.s32 1, %s3708_s27  }
  0x94   : > { %s30_s21 = ssub.s32 %s3708_s27, %s3958_s11  ;;  %s33_s9 = sadd.s32 1, %s3704_s26 }
  0x95   : > { %p31_p8 = scmp.eq.s32.totalorder %s30_s21, 0  ;;  %p40_p1 = scmp.ne.s32.totalorder %s3704_s26, %s3700_s25 }
  0x96   : > { %p41_p3 = scmp.eq.s32.totalorder %s3708_s27, 0  ;;  %p46_p13 = scmp.ne.s32.totalorder %s3700_s25, %s3696_s24 }
  0x97   : > { %s3969_s13 = scalar_select %p31_p8, %s3704_s26, %s33_s9  }
  0x98   : > { %p3971_p0 = por %p41_p3, %p40_p1  ;;  %p5639_p2 = scmp.eq.s32.totalorder %s3791_s30, 0 }
  0x99   : > { %p196_p5 = scmp.eq.s32.totalorder %s3791_s30, 1  ;;  %p202_p7 = scmp.eq.s32.totalorder %s2757_s19, 1 }
  0x9a   : > { %p3977_p6 = por %p5639_p2, %p46_p13  ;;  %p3312_p9 = scmp.lt.s32.totalorder %s3708_s27, 2 }
  0x9b   : > { %s296_s12 = sand.u32 1, %s3704_s26   ;;  %p3984_p4 = por %p196_p5, %p40_p1 }
  0x9c   : > { %p3988_p10 = por %p202_p7, %p46_p13  ;;  %s2766_s17 = sshll.u32 %s296_s12, 3 }
  0x9d   : > { %s5641_s15 = scalar_select %p3984_p4, 1, 0 }
  0x9e   : > { %s5642_s16 = scalar_select %p3988_p10, 1, 0 }
  0x9f   : > { %s2767_s18 = sshll.u32 %s3708_s27, 7  ;;  %s300_s28 = scalar_lea.vmem [#allocation2], %s2766_s17 }
  0xa0   : > { %s3996_s23 = scalar_lea.hbm %s5574_s0, %s2767_s18  ;;  %s307_s14 = sshll.u32 %s300_s28, 4  ;;  %s3998_s14 = int_to_ptr.vmem [resolvable:$true] %s307_s14 }
  0xa1   : > { %p4002_p11 = pnand %p3312_p9, %p3971_p0  ;;  %s297_s21 = scalar_lea.sflag [#allocation3], %s296_s12 }
  0xa2   : > { %s3600_s9 = scalar_lea.hbm %s3996_s23, 128  ;;  %s3605_s20 = scalar_lea.hbm %s5574_s0, 256 }
  0xa3   : > { %p3601_p12 = scmp.ne.s32.totalorder %s3996_s23, %s3600_s9  ;;  %p3602_p8 = pneg %p4002_p11 }
  0xa4   : > { %p3606_p13 = scmp.lt.u32.totalorder %s3996_s23, %s5574_s0  ;;  %p3607_p0 = scmp.lt.u32.totalorder %s3605_s20, %s3600_s9 }
  0xa5   : > { %p3603_p1 = pnand %p3602_p8, %p3601_p12  ;;  %p3609_p5 = scmp.lt.u32.totalorder %s3600_s9, %s3996_s23 }
  0xa6   : > { %p3608_p2 = por %p3607_p0, %p3606_p13 }
  0xa7   : > { %p3604_p3 = pneg %p3603_p1 }
  0xa8   : > { %p3610_p7 = por %p3609_p5, %p3608_p2 }
  0xaa   : > { %p3611_p9 = pnand %p3610_p7, %p3604_p3 }
  0xac   : > { %3614 = shalt.err (!%p3611_p9)
}
  0xad   : > { %s3615_s12 = scalar_lea.vmem %s3998_s14, 128  ;;  %s3718_s28 = smov [#allocation2]  }
  0xae   : > { %p3616_p12 = scmp.ne.s32.totalorder %s3998_s14, %s3615_s12  ;;  %s3620_s17 = sshll.u32 %s3718_s28, 4  ;;  %s3621_s17 = int_to_ptr.vmem [resolvable:$false] %s3620_s17 }
  0xaf   : > { %s3622_s18 = scalar_lea.vmem %s3621_s17, 256  ;;  %p3623_p4 = scmp.lt.s32.totalorder %s3998_s14, %s3621_s17 }
  0xb0   : > { %p3618_p1 = pnand %p3616_p12, %p3602_p8  ;;  %p3624_p13 = scmp.lt.s32.totalorder %s3622_s18, %s3615_s12 }
  0xb2   : > { %p3619_p10 = pneg %p3618_p1  ;;  %p3625_p0 = por %p3624_p13, %p3623_p4 }
  0xb4   : > { %p3626_p2 = pnand %p3625_p0, %p3619_p10 }
  0xb6   : > { %3629 = shalt.err (!%p3626_p2)
}
  0xb7   : > { %3301 = dma.hbm_to_vmem [thread:$0]  (!%p4002_p11), %s3996_s23, 128, %s3998_s14, %s297_s21  }
  0xb8   : > { %p5644_p3 = scmp.ne.s32.totalorder %s5635_s8, 0 }
  0xba   : > { %316 = sbr.rel (%p5644_p3) target bundleno = 1531 (0x5fb), region = 48 }
  0xc1   : > { %s4034_s9 = sand.u32 1, %s3700_s25  }
  0xc2   : > { %s2769_s20 = sshll.u32 %s4034_s9, 3  ;;  %s319_s29 = scalar_lea.sflag [#allocation3], %s4034_s9 }
  0xc3   : > { %s322_s10 = scalar_lea.vmem [#allocation2], %s2769_s20 }
  0xc4   : > { %3675 = dma.done.wait (%p3977_p6), %s319_s29, 128  }
  0xc5   : > { %3677 = vsyncadd (%p3977_p6), %s319_s29, 4294967168  ;;  %p5645_p4 = scmp.eq.s32.totalorder %s3791_s30, 0 }
  0xc7   : > { %3679 = dma.done.wait (%p5645_p4), [#allocation6], 3968   ;;  %p5646_p10 = pmov %p5645_p4 }
  0xc8   : > { %p5647_p11 = pmov %p5645_p4 }
  0xc9   : > { %3681 = vsyncadd (%p5646_p10), [#allocation6], 4294963328 }
  0xca   : > { %3683 = dma.done.wait (%p5647_p11), [#allocation9], 2048   ;;  %p5648_p8 = pmov %p5645_p4 }
  0xcb   : > { %p5649_p5 = pmov %p5645_p4 }
  0xcc   : > { %3685 = vsyncadd (%p5648_p8), [#allocation9], 4294965248 }
  0xcd   : > { %3687 = dma.done.wait (%p5649_p5), [#allocation12], 64   ;;  %p5650_p7 = pmov %p5645_p4 }
  0xce   : > { %v5585_v0 = vmov 0.0   ;;  %vm3720_vm0 = vmmov 0   ;;  %vm393_vm1 = vcmask 64512   ;;  %v392_v1 = vld [vmem:[%s322_s10] sm:$0xff]  ;;  %v377_v2 = vld [vmem:[#allocation5] sm:$0xff]  ;;  %v378_v4 = vld [vmem:[#allocation5 + $0x8] sm:$0xff] }
  0xcf   : > { %3689 = vsyncadd (%p5650_p7), [#allocation12], 4294967232  ;;  %2953 = vmatprep.subr.mxu0 %v5585_v0  ;;  %3189 = vmatprep.subr.mxu1 %v5585_v0  ;;  %v385_v3 = vld [vmem:[#allocation5 + $0x40] sm:$0xff]  ;;  %v386_v5 = vld [vmem:[#allocation5 + $0x48] sm:$0xff]  ;;  %v5602_v57 = vmov 683565275  }
  0xd0   : > { %2955 = vmatprep.mubr.msk.f32.mxu0 %vm3720_vm0, %v5585_v0  ;;  %2979 = vmatprep.mubr.msk.f32.mxu1 %vm3720_vm0, %v5585_v0  ;;  %v379_v6 = vld [vmem:[#allocation5 + $0x10] sm:$0xff]  ;;  %v380_v8 = vld [vmem:[#allocation5 + $0x18] sm:$0xff]  ;;  %v381_v10 = vld [vmem:[#allocation5 + $0x20] sm:$0xff]  ;;  %v5598_v59 = vmov 2475754826   ;;  %s2776_s8 = sshll.u32 %s4034_s9, 1 }
  0xd1   : > { %2954 = vmatpush3.msra.mxu0 %v392_v1  ;;  %3190 = vmatpush3.msra.mxu1 %v392_v1  ;;  %v387_v7 = vld [vmem:[#allocation5 + $0x50] sm:$0xff]  ;;  %v388_v9 = vld [vmem:[#allocation5 + $0x58] sm:$0xff]  ;;  %v389_v11 = vld [vmem:[#allocation5 + $0x60] sm:$0xff]  ;;  %v5604_v1 = vmov 2131351028   ;;  %s2870_s22 = sshll.u32 %s3791_s30, 5 }
  0xd2   : > { %2956 = vmatmul.mubr.msk.f32.vlgmr.msra.gmra.mrb[0].mxu0 %vm393_vm1, %v377_v2  ;;  %2980 = vmatmul.mubr.msk.f32.vlgmr.msra.gmra.mrb[0].mxu1 %vm393_vm1, %v385_v3  ;;  %v382_v12 = vld [vmem:[#allocation5 + $0x28] sm:$0xff]  ;;  %v383_v14 = vld [vmem:[#allocation5 + $0x30] sm:$0xff]  ;;  %v384_v16 = vld [vmem:[#allocation5 + $0x38] sm:$0xff]  ;;  %v5594_v3 = vmov 2102212464   ;;  %s376_s23 = scalar_lea.vmem [#allocation14], %s2776_s8  ;;  %s5530_s12 = scalar_lea.hbm %s5581_s7, %s2870_s22 }
  0xd3   : > { %2958 = vmatprep.mubr.msk.f32.mxu0 %vm3720_vm0, %v5585_v0  ;;  %2982 = vmatprep.mubr.msk.f32.mxu1 %vm3720_vm0, %v5585_v0  ;;  %v390_v13 = vld [vmem:[#allocation5 + $0x68] sm:$0xff]  ;;  %v391_v15 = vld [vmem:[#allocation5 + $0x70] sm:$0xff]  ;;  %s2630_s14 = sshll.u32 %s376_s23, 4  ;;  %s2617_s28 = scalar_lea.sflag [#allocation4], %s4034_s9  ;;  %s5532_s14 = int_to_ptr.vmem [resolvable:$true] %s2630_s14 }
  0xd4   : > { %s3630_s17 = scalar_lea.vmem %s5532_s14, 32  ;;  %p5760_p9 = scmp.ne.s32.totalorder %s5641_s15, 0 }
  0xd5   : > { %p3631_p6 = scmp.ne.s32.totalorder %s5532_s14, %s3630_s17  ;;  %s3729_s30 = smov [#allocation14]  }
  0xd6   : > { %2959 = vmatmul.mubr.msk.f32.gmra.mrb[2].mxu0 %vm393_vm1, %v378_v4  ;;  %2983 = vmatmul.mubr.msk.f32.gmra.mrb[2].mxu1 %vm393_vm1, %v386_v5  ;;  %v5596_v5 = vmov 920167782   ;;  %s3634_s18 = sshll.u32 %s3729_s30, 4  ;;  %s3635_s18 = int_to_ptr.vmem [resolvable:$false] %s3634_s18 }
  0xd7   : > { %2961 = vmatprep.mubr.msk.f32.mxu0 %vm3720_vm0, %v5585_v0  ;;  %2985 = vmatprep.mubr.msk.f32.mxu1 %vm3720_vm0, %v5585_v0  ;;  %p3632_p12 = pnand %p3631_p6, %p5760_p9  ;;  %s3636_s20 = scalar_lea.vmem %s3635_s18, 64 }
  0xd8   : > { %p3637_p13 = scmp.lt.s32.totalorder %s5532_s14, %s3635_s18  ;;  %p3638_p0 = scmp.lt.s32.totalorder %s3636_s20, %s3630_s17 }
  0xd9   : > { %p3633_p1 = pneg %p3632_p12 }
  0xda   : > { %2962 = vmatmul.mubr.msk.f32.gmra.mrb[4].mxu0 %vm393_vm1, %v379_v6  ;;  %2986 = vmatmul.mubr.msk.f32.gmra.mrb[4].mxu1 %vm393_vm1, %v387_v7  ;;  %p3639_p2 = por %p3638_p0, %p3637_p13 }
  0xdb   : > { %2964 = vmatprep.mubr.msk.f32.mxu0 %vm3720_vm0, %v5585_v0  ;;  %2988 = vmatprep.mubr.msk.f32.mxu1 %vm3720_vm0, %v5585_v0 }
  0xdc   : > { %p3640_p3 = pnand %p3639_p2, %p3633_p1 }
  0xde   : > { %2965 = vmatmul.mubr.msk.f32.gmra.mrb[6].mxu0 %vm393_vm1, %v380_v8  ;;  %2989 = vmatmul.mubr.msk.f32.gmra.mrb[6].mxu1 %vm393_vm1, %v388_v9 }
  0xdf   : > { %2967 = vmatprep.mubr.msk.f32.mxu0 %vm3720_vm0, %v5585_v0  ;;  %2991 = vmatprep.mubr.msk.f32.mxu1 %vm3720_vm0, %v5585_v0 }
  0xe2   : > { %2968 = vmatmul.mubr.msk.f32.gmra.mrb[8].mxu0 %vm393_vm1, %v381_v10  ;;  %2992 = vmatmul.mubr.msk.f32.gmra.mrb[8].mxu1 %vm393_vm1, %v389_v11 }
  0xe3   : > { %2970 = vmatprep.mubr.msk.f32.mxu0 %vm3720_vm0, %v5585_v0  ;;  %2994 = vmatprep.mubr.msk.f32.mxu1 %vm3720_vm0, %v5585_v0 }
  0xe6   : > { %2971 = vmatmul.mubr.msk.f32.gmra.mrb[10].mxu0 %vm393_vm1, %v382_v12  ;;  %2995 = vmatmul.mubr.msk.f32.gmra.mrb[10].mxu1 %vm393_vm1, %v390_v13  ;;  %v5589_v12 = vmov 1326507024  }
  0xe7   : > { %2973 = vmatprep.mubr.msk.f32.mxu0 %vm3720_vm0, %v5585_v0  ;;  %2997 = vmatprep.mubr.msk.f32.mxu1 %vm3720_vm0, %v5585_v0 }
  0xea   : > { %2974 = vmatmul.mubr.msk.f32.gmra.mrb[12].mxu0 %vm393_vm1, %v383_v14  ;;  %2998 = vmatmul.mubr.msk.f32.gmra.mrb[12].mxu1 %vm393_vm1, %v391_v15 }
  0xeb   : > { %2976 = vmatprep.mubr.msk.f32.mxu0 %vm3720_vm0, %v5585_v0 }
  0xee   : > { %2977 = vmatmul.mubr.msk.f32.gmra.mrb[14].mxu0 %vm393_vm1, %v384_v16 }
 0x1a5   : > { %v4101_v17 = vpop.f32.mrb[0].mxu0  ;;  %v4103_v18 = vpop.f32.mrb[0].mxu1 }
 0x1a6   : > { %5651 = vst [vmem:[#allocation20_spill] sm:$0xff] %v4103_v18  ;;  %v579_v19 = vand.u32 2147483647, %v4101_v17  ;;  %v582_v20 = vand.u32 2139095040, %v4101_v17  ;;  %v1411_v21 = vand.u32 2147483647, %v4103_v18 }
 0x1a7   : > { %v1414_v22 = vand.u32 2139095040, %v4103_v18  ;;  %v2957_v23 = vpop.f32.mrb[1].mxu0  ;;  %v2981_v24 = vpop.f32.mrb[1].mxu1 }
 0x1a8   : > { %v583_v25 = vshrl.u32 %v582_v20, 23  ;;  %v586_v26 = vand.u32 8388607, %v579_v19  ;;  %v1418_v28 = vand.u32 8388607, %v1411_v21 }
 0x1a9   : > { %v1415_v27 = vshrl.u32 %v1414_v22, 23  ;;  %v4113_v29 = vpop.f32.mrb[2].mxu0  ;;  %v4115_v31 = vpop.f32.mrb[2].mxu1 }
 0x1aa   : > { %5652 = vst [vmem:[#allocation21_spill] sm:$0xff] %v4113_v29  ;;  %v2792_v30 = vadd.s32 4294967169, %v583_v25  ;;  %5653 = vst [vmem:[#allocation22_spill] sm:$0xff] %v4115_v31  ;;  %v686_v33 = vand.u32 2139095040, %v4113_v29  ;;  %v2960_v34 = vpop.f32.mrb[3].mxu0  ;;  %v587_v36 = vor.u32 8388608, %v586_v26 }
 0x1ab   : > { %v2824_v32 = vadd.s32 4294967169, %v1415_v27  ;;  %v1419_v37 = vor.u32 8388608, %v1418_v28  ;;  %v2984_v40 = vpop.f32.mrb[3].mxu1 }
 0x1ac   : > { %v589_v35 = vadd.s32 1, %v2792_v30  ;;  %v687_v39 = vshrl.u32 %v686_v33, 23  ;;  %v4122_v50 = vshll.u32 %v587_v36, 8 }
 0x1ad   : > { %v1421_v38 = vadd.s32 1, %v2824_v32  ;;  %v4118_v41 = vpop.f32.mrb[4].mxu0  ;;  %v4120_v42 = vpop.f32.mrb[4].mxu1  ;;  %v4128_v53 = vshll.u32 %v1419_v37, 8 }
 0x1ae   : > { %vm590_vm2 = vcmp.gt.s32.totalorder %v589_v35, 0  ;;  %5654 = vst [vmem:[#allocation23_spill] sm:$0xff] %v4118_v41  ;;  %5655 = vst [vmem:[#allocation24_spill] sm:$0xff] %v4120_v42  ;;  %v2796_v44 = vadd.s32 4294967169, %v687_v39  ;;  %v2963_v45 = vpop.f32.mrb[5].mxu0  ;;  %v2987_v49 = vpop.f32.mrb[5].mxu1 }
 0x1af   : > { %v591_v43 = vsel %vm590_vm2, %v589_v35, 0  ;;  %vm1422_vm3 = vcmp.gt.s32.totalorder %v1421_v38, 0 }
 0x1b0   : > { %v592_v46 = vshrl.u32 %v591_v43, 5  ;;  %v593_v47 = vand.u32 31, %v591_v43  ;;  %v1423_v48 = vsel %vm1422_vm3, %v1421_v38, 0  ;;  %v4136_v61 = vadd.s32 1, %v2796_v44 }
 0x1b1   : > { %v4124_v51 = vshrl.u32 %v1423_v48, 5  ;;  %v4126_v52 = vand.u32 31, %v1423_v48  ;;  %v4130_v54 = vpop.f32.mrb[6].mxu0  ;;  %v4132_v55 = vpop.f32.mrb[6].mxu1 }
 0x1b2   : > { %v594_v56 = vsub.s32 32, %v593_v47  ;;  %v596_v58 = vshll.u32 %v5602_v57, %v593_v47  ;;  %v599_v60 = vshll.u32 %v5598_v59, %v593_v47  ;;  %v2966_v62 = vpop.f32.mrb[7].mxu0  ;;  %v2990_v63 = vpop.f32.mrb[7].mxu1  ;;  %v602_v2 = vshll.u32 %v5604_v1, %v593_v47 }
 0x1b3   : > { %v605_v4 = vshll.u32 %v5594_v3, %v593_v47  ;;  %v608_v6 = vshll.u32 %v5596_v5, %v593_v47  ;;  %vm611_vm4 = vcmp.lt.s32.totalorder %v592_v46, 1  ;;  %vm612_vm5 = vcmp.lt.s32.totalorder %v592_v46, 2 }
 0x1b4   : > { %v597_v7 = vshrl.u32 %v5598_v59, %v594_v56  ;;  %v600_v8 = vshrl.u32 %v5604_v1, %v594_v56  ;;  %v603_v9 = vshrl.u32 %v5594_v3, %v594_v56  ;;  %v595_v10 = vshrl.u32 %v5602_v57, %v594_v56 }
 0x1b5   : > { %v606_v11 = vshrl.u32 %v5596_v5, %v594_v56  ;;  %v609_v13 = vshrl.u32 %v5589_v12, %v594_v56  ;;  %vm613_vm6 = vcmp.lt.s32.totalorder %v592_v46, 3  ;;  %v1426_v20 = vsub.s32 32, %v4126_v52  ;;  %v4148_v22 = vpop.f32.mrb[8].mxu0 }
 0x1b6   : > { %v598_v14 = vor.u32 %v597_v7, %v596_v58  ;;  %v601_v15 = vor.u32 %v600_v8, %v599_v60  ;;  %v604_v16 = vor.u32 %v603_v9, %v602_v2  ;;  %vm614_vm7 = vcmp.lt.s32.totalorder %v592_v46, 4  ;;  %v2969_v26 = vpop.f32.mrb[9].mxu0 }
 0x1b7   : > { %v607_v23 = vor.u32 %v606_v11, %v605_v4  ;;  %v610_v24 = vor.u32 %v609_v13, %v608_v6  ;;  %v1428_v25 = vshll.u32 %v5602_v57, %v4126_v52  ;;  %v1431_v36 = vshll.u32 %v5598_v59, %v4126_v52 }
 0x1b8   : > { %v615_v27 = vsel %vm611_vm4, %v595_v10, %v598_v14  ;;  %v616_v28 = vsel %vm614_vm7, %v604_v16, 2102212464  ;;  %v619_v30 = vsel %vm611_vm4, %v598_v14, %v601_v15  ;;  %v623_v32 = vsel %vm611_vm4, %v601_v15, %v604_v16 }
 0x1b9   : > { %v617_v33 = vsel %vm613_vm6, %v601_v15, %v616_v28  ;;  %v620_v34 = vsel %vm614_vm7, %v607_v23, 920167782  ;;  %v624_v35 = vsel %vm614_vm7, %v610_v24, 1326507024  ;;  %v1427_v39 = vshrl.u32 %v5602_v57, %v1426_v20 }
 0x1ba   : > { %v621_v37 = vsel %vm613_vm6, %v604_v16, %v620_v34  ;;  %v625_v38 = vsel %vm613_vm6, %v607_v23, %v624_v35  ;;  %v1429_v40 = vshrl.u32 %v5598_v59, %v1426_v20  ;;  %v618_v43 = vsel %vm612_vm5, %v615_v27, %v617_v33 }
 0x1bb   : > { %v622_v44 = vsel %vm612_vm5, %v619_v30, %v621_v37  ;;  %v626_v45 = vsel %vm612_vm5, %v623_v32, %v625_v38  ;;  %v1432_v47 = vshrl.u32 %v5604_v1, %v1426_v20  ;;  %v1434_v63 = vshll.u32 %v5604_v1, %v4126_v52 }
 0x1bc   : > { %v4167_v48 = vmul.u32.u64.low %v4122_v50, %v626_v45  ;;  %v4168_v49 = vmul.u32.u64.high %v4122_v50, %v626_v45, %v4167_v48  ;;  %v4171_v56 = vmul.u32.u64.low %v4122_v50, %v622_v44  ;;  %v4172_v58 = vmul.u32.u64.high %v4122_v50, %v622_v44, %v4171_v56 }
 0x1bd   : > { %v1430_v60 = vor.u32 %v1429_v40, %v1428_v25  ;;  %v1433_v62 = vor.u32 %v1432_v47, %v1431_v36  ;;  %v1435_v2 = vshrl.u32 %v5594_v3, %v1426_v20  ;;  %v1437_v46 = vshll.u32 %v5594_v3, %v4126_v52 }
 0x1be   : > { %v1438_v4 = vshrl.u32 %v5596_v5, %v1426_v20  ;;  %v1440_v6 = vshll.u32 %v5596_v5, %v4126_v52  ;;  %v1441_v7 = vshrl.u32 %v5589_v12, %v1426_v20  ;;  %v634_v8 = vmul.u32 %v4122_v50, %v618_v43 }
 0x1bf   : > { %v1436_v9 = vor.u32 %v1435_v2, %v1434_v63  ;;  %vm1443_vm8 = vcmp.lt.s32.totalorder %v4124_v51, 1  ;;  %vm1444_vm9 = vcmp.lt.s32.totalorder %v4124_v51, 2  ;;  %vm636_vm10 = vc.u32 %v4168_v49, %v4171_v56 }
 0x1c0   : > { %v637_v10 = vadd.s32 1, %v4172_v58  ;;  %v1439_v11 = vor.u32 %v1438_v4, %v1437_v46  ;;  %vm1445_vm11 = vcmp.lt.s32.totalorder %v4124_v51, 3  ;;  %v1442_v13 = vor.u32 %v1441_v7, %v1440_v6 }
 0x1c1   : > { %vm1446_vm12 = vcmp.lt.s32.totalorder %v4124_v51, 4  ;;  %v1447_v52 = vsel %vm1443_vm8, %v1427_v39, %v1430_v60  ;;  %v1451_v14 = vsel %vm1443_vm8, %v1430_v60, %v1433_v62  ;;  %v1455_v20 = vsel %vm1443_vm8, %v1433_v62, %v1436_v9 }
 0x1c2   : > { %v638_v50 = vsel %vm636_vm10, %v637_v10, %v4172_v58  ;;  %v1448_v15 = vsel %vm1446_vm12, %v1436_v9, 2102212464  ;;  %v1452_v16 = vsel %vm1446_vm12, %v1439_v11, 920167782  ;;  %v1456_v26 = vsel %vm1446_vm12, %v1442_v13, 1326507024 }
 0x1c3   : > { %v639_v23 = vadd.s32 %v638_v50, %v634_v8  ;;  %v1449_v24 = vsel %vm1445_vm11, %v1433_v62, %v1448_v15  ;;  %v1453_v25 = vsel %vm1445_vm11, %v1436_v9, %v1452_v16  ;;  %v1457_v30 = vsel %vm1445_vm11, %v1439_v11, %v1456_v26 }
 0x1c4   : > { %v1450_v27 = vsel %vm1444_vm9, %v1447_v52, %v1449_v24  ;;  %v1454_v28 = vsel %vm1444_vm9, %v1451_v14, %v1453_v25  ;;  %vm694_vm13 = vcmp.gt.s32.totalorder %v4136_v61, 0  ;;  %v1458_v33 = vsel %vm1444_vm9, %v1455_v20, %v1457_v30  ;;  %v4234_v52 = vpop.f32.mrb[8].mxu1 }
 0x1c5   : > { %v640_v32 = vadd.s32 536870912, %v639_v23  ;;  %v4201_v34 = vmul.u32.u64.low %v4128_v53, %v1454_v28  ;;  %v4202_v35 = vmul.u32.u64.high %v4128_v53, %v1454_v28, %v4201_v34  ;;  %v695_v38 = vsel %vm694_vm13, %v4136_v61, 0  ;;  %5656 = vst [vmem:[#allocation25_spill] sm:$0xff] %v4234_v52  ;;  %v2993_v20 = vpop.f32.mrb[9].mxu1 }
 0x1c6   : > { %v4206_v36 = vmul.u32.u64.low %v4128_v53, %v1458_v33  ;;  %v4207_v37 = vmul.u32.u64.high %v4128_v53, %v1458_v33, %v4206_v36  ;;  %v697_v40 = vand.u32 31, %v695_v38  ;;  %v1466_v43 = vmul.u32 %v4128_v53, %v1450_v27 }
 0x1c7   : > { %v4210_v39 = vshrl.u32 %v640_v32, 30  ;;  %v1469_v51 = vadd.s32 1, %v4202_v35  ;;  %v5588_v45 = vand.u32 2147483647, %v4113_v29  ;;  %v1518_v53 = vand.u32 2139095040, %v4115_v31 }
 0x1c8   : > { %v698_v47 = vsub.s32 32, %v697_v40  ;;  %vm1468_vm14 = vc.u32 %v4207_v37, %v4201_v34  ;;  %v696_v6 = vshrl.u32 %v695_v38, 5  ;;  %v700_v7 = vshll.u32 %v5602_v57, %v697_v40 }
 0x1c9   : > { %v642_v44 = vshll.u32 %v4210_v39, 30  ;;  %v1470_v58 = vsel %vm1468_vm14, %v1469_v51, %v4202_v35  ;;  %v690_v2 = vand.u32 8388607, %v5588_v45  ;;  %v703_v8 = vshll.u32 %v5598_v59, %v697_v40 }
 0x1ca   : > { %v1471_v61 = vadd.s32 %v1470_v58, %v1466_v43  ;;  %v701_v60 = vshrl.u32 %v5598_v59, %v698_v47  ;;  %v704_v62 = vshrl.u32 %v5604_v1, %v698_v47  ;;  %v707_v46 = vshrl.u32 %v5594_v3, %v698_v47 }
 0x1cb   : > { %v4218_v48 = vsub.s32 %v639_v23, %v642_v44  ;;  %v706_v10 = vshll.u32 %v5604_v1, %v697_v40  ;;  %v709_v11 = vshll.u32 %v5594_v3, %v697_v40  ;;  %v710_v13 = vshrl.u32 %v5596_v5, %v698_v47 }
 0x1cc   : > { %v1472_v4 = vadd.s32 536870912, %v1471_v61  ;;  %v702_v14 = vor.u32 %v701_v60, %v700_v7  ;;  %v705_v50 = vor.u32 %v704_v62, %v703_v8  ;;  %v713_v15 = vshrl.u32 %v5589_v12, %v698_v47 }
 0x1cd   : > { %v645_v63 = vsub.s32 0, %v4218_v48  ;;  %v1519_v16 = vshrl.u32 %v1518_v53, 23  ;;  %v708_v25 = vor.u32 %v707_v46, %v706_v10  ;;  %v711_v26 = vor.u32 %v710_v13, %v709_v11 }
 0x1ce   : > { %v4237_v24 = vshrl.u32 %v1472_v4, 30  ;;  %v712_v27 = vshll.u32 %v5596_v5, %v697_v40  ;;  %v691_v28 = vor.u32 8388608, %v690_v2  ;;  %vm715_vm15 = vcmp.lt.s32.totalorder %v696_v6, 1 }
 0x1cf   : > { %v2793_v9 = vmin.u32 %v645_v63, %v4218_v48  ;;  %vm717_vm1 = vcmp.lt.s32.totalorder %v696_v6, 3  ;;  %vm718_vm2 = vcmp.lt.s32.totalorder %v696_v6, 4  ;;  %v723_v33 = vsel %vm715_vm15, %v702_v14, %v705_v50 }
 0x1d0   : > { %v714_v32 = vor.u32 %v713_v15, %v712_v27  ;;  %v724_v35 = vsel %vm718_vm2, %v711_v26, 920167782  ;;  %v1474_v36 = vshll.u32 %v4237_v24, 30  ;;  %v2828_v43 = vadd.s32 4294967169, %v1519_v16 }
 0x1d1   : > { %v647_v23 = vclz %v2793_v9  ;;  %v725_v38 = vsel %vm717_vm1, %v708_v25, %v724_v35  ;;  %v699_v44 = vshrl.u32 %v5602_v57, %v698_v47  ;;  %vm716_vm3 = vcmp.lt.s32.totalorder %v696_v6, 2 }
 0x1d2   : > { %v720_v51 = vsel %vm718_vm2, %v708_v25, 2102212464  ;;  %v726_v40 = vsel %vm716_vm3, %v723_v33, %v725_v38  ;;  %v727_v58 = vsel %vm715_vm15, %v705_v50, %v708_v25  ;;  %v728_v62 = vsel %vm718_vm2, %v714_v32, 1326507024 }
 0x1d3   : > { %v2794_v30 = vadd.s32 4294967294, %v647_v23  ;;  %v719_v60 = vsel %vm715_vm15, %v699_v44, %v702_v14  ;;  %v731_v53 = vshll.u32 %v691_v28, 8  ;;  %v4247_v63 = vsub.s32 %v1471_v61, %v1474_v36 }
 0x1d4   : > { %v721_v2 = vsel %vm717_vm1, %v705_v50, %v720_v51  ;;  %v729_v46 = vsel %vm717_vm1, %v711_v26, %v728_v62  ;;  %v1525_v4 = vadd.s32 1, %v2828_v43  ;;  %v5587_v9 = vand.u32 2147483647, %v4115_v31 }
 0x1d5   : > { %vm2795_vm4 = vcmp.lt.s32.totalorder %v2794_v30, 0  ;;  %v730_v47 = vsel %vm716_vm3, %v727_v58, %v729_v46  ;;  %v4252_v7 = vmul.u32.u64.low %v731_v53, %v726_v40  ;;  %v4253_v8 = vmul.u32.u64.high %v731_v53, %v726_v40, %v4252_v7 }
 0x1d6   : > { %v650_v10 = vsel %vm2795_vm4, 0, %v2794_v30  ;;  %v4257_v11 = vmul.u32.u64.low %v731_v53, %v730_v47  ;;  %v4258_v13 = vmul.u32.u64.high %v731_v53, %v730_v47, %v4257_v11  ;;  %v722_v61 = vsel %vm716_vm3, %v719_v60, %v721_v2  ;;  %v4287_v2 = vpop.f32.mrb[10].mxu0 }
 0x1d7   : > { %vm1526_vm5 = vcmp.gt.s32.totalorder %v1525_v4, 0  ;;  %v1477_v14 = vsub.s32 0, %v4247_v63  ;;  %v655_v15 = vsub.s32 4294967266, %v650_v10  ;;  %v741_v16 = vadd.s32 1, %v4253_v8  ;;  %v2972_v11 = vpop.f32.mrb[11].mxu0 }
 0x1d8   : > { %v1527_v50 = vsel %vm1526_vm5, %v1525_v4, 0  ;;  %v1522_v20 = vand.u32 8388607, %v5587_v9  ;;  %v738_v25 = vmul.u32 %v731_v53, %v722_v61  ;;  %vm740_vm6 = vc.u32 %v4258_v13, %v4252_v7 }
 0x1d9   : > { %v1529_v23 = vand.u32 31, %v1527_v50  ;;  %vm581_vm7 = vcmp.lt.s32.totalorder %v4101_v17, 0  ;;  %v742_v6 = vsel %vm740_vm6, %v741_v16, %v4253_v8  ;;  %v665_v26 = vsub.s32 4, %v4210_v39 }
 0x1da   : > { %v2825_v27 = vmin.u32 %v1477_v14, %v4247_v63  ;;  %v743_v28 = vadd.s32 %v742_v6, %v738_v25  ;;  %v635_v32 = vadd.s32 %v4171_v56, %v4168_v49  ;;  %v656_v33 = vadd.s32 127, %v655_v15 }
 0x1db   : > { %v1530_v30 = vsub.s32 32, %v1529_v23  ;;  %vm1413_vm8 = vcmp.lt.s32.totalorder %v4103_v18, 0  ;;  %v1523_v35 = vor.u32 8388608, %v1522_v20  ;;  %v651_v36 = vsub.s32 32, %v650_v10 }
 0x1dc   : > { %v1497_v38 = vsub.s32 4, %v4237_v24  ;;  %v744_v43 = vadd.s32 536870912, %v743_v28  ;;  %v790_v44 = vand.u32 2139095040, %v4118_v41  ;;  %v1532_v51 = vshll.u32 %v5602_v57, %v1529_v23 }
 0x1dd   : > { %v1533_v40 = vshrl.u32 %v5598_v59, %v1530_v30  ;;  %v1535_v58 = vshll.u32 %v5598_v59, %v1529_v23  ;;  %v1536_v60 = vshrl.u32 %v5604_v1, %v1530_v30  ;;  %v4283_v49 = vsel %vm581_vm7, %v665_v26, %v4210_v39 }
 0x1de   : > { %v1479_v56 = vclz %v2825_v27  ;;  %v4285_v62 = vshrl.u32 %v744_v43, 30  ;;  %v1528_v53 = vshrl.u32 %v1527_v50, 5  ;;  %v657_v46 = vshll.u32 %v656_v33, 23 }
 0x1df   : > { %v1538_v4 = vshll.u32 %v5604_v1, %v1529_v23  ;;  %v1539_v47 = vshrl.u32 %v5594_v3, %v1530_v30  ;;  %v1541_v8 = vshll.u32 %v5594_v3, %v1529_v23  ;;  %v652_v61 = vshll.u32 %v4218_v48, %v650_v10 }
 0x1e0   : > { %v653_v14 = vshrl.u32 %v635_v32, %v651_v36  ;;  %v1498_v39 = vsel %vm1413_vm8, %v1497_v38, %v4237_v24  ;;  %v746_v15 = vshll.u32 %v4285_v62, 30  ;;  %vm4299_vm9 = vcmp.le.f32.partialorder %v579_v19, 0.7853982 }
 0x1e1   : > { %vm4305_vm10 = vcmp.le.f32.partialorder %v1411_v21, 0.7853982  ;;  %v1534_v48 = vor.u32 %v1533_v40, %v1532_v51  ;;  %v1537_v10 = vor.u32 %v1536_v60, %v1535_v58  ;;  %v1542_v20 = vshrl.u32 %v5596_v5, %v1530_v30 }
 0x1e2   : > { %v1544_v24 = vshll.u32 %v5596_v5, %v1529_v23  ;;  %v2826_v25 = vadd.s32 4294967294, %v1479_v56  ;;  %v4311_v6 = vsub.s32 %v743_v28, %v746_v15  ;;  %v1545_v19 = vshrl.u32 %v5589_v12, %v1530_v30 }
 0x1e3   : > { %vm1547_vm11 = vcmp.lt.s32.totalorder %v1528_v53, 1  ;;  %v658_v26 = vor.u32 4788187, %v657_v46  ;;  %v1531_v27 = vshrl.u32 %v5602_v57, %v1530_v30  ;;  %v1540_v32 = vor.u32 %v1539_v47, %v1538_v4 }
 0x1e4   : > { %v1543_v21 = vor.u32 %v1542_v20, %v1541_v8  ;;  %v654_v33 = vor.u32 %v653_v14, %v652_v61  ;;  %v749_v36 = vsub.s32 0, %v4311_v6  ;;  %vm1549_vm12 = vcmp.lt.s32.totalorder %v1528_v53, 3 }
 0x1e5   : > { %v1563_v38 = vshll.u32 %v1523_v35, 8  ;;  %v1546_v43 = vor.u32 %v1545_v19, %v1544_v24  ;;  %vm1548_vm13 = vcmp.lt.s32.totalorder %v1528_v53, 2  ;;  %vm1550_vm14 = vcmp.lt.s32.totalorder %v1528_v53, 4 }
 0x1e6   : > { %v1555_v23 = vsel %vm1547_vm11, %v1534_v48, %v1537_v10  ;;  %vm2827_vm15 = vcmp.lt.s32.totalorder %v2826_v25, 0  ;;  %v2797_v28 = vmin.u32 %v749_v36, %v4311_v6  ;;  %v1552_v51 = vsel %vm1550_vm14, %v1540_v32, 2102212464 }
 0x1e7   : > { %v1556_v40 = vsel %vm1550_vm14, %v1543_v21, 920167782  ;;  %v659_v58 = vand.u32 2147483647, %v658_v26  ;;  %v1551_v30 = vsel %vm1547_vm11, %v1531_v27, %v1534_v48  ;;  %v791_v56 = vshrl.u32 %v790_v44, 23 }
 0x1e8   : > { %v1557_v60 = vsel %vm1549_vm12, %v1540_v32, %v1556_v40  ;;  %v751_v46 = vclz %v2797_v28  ;;  %v1553_v4 = vsel %vm1549_vm12, %v1537_v10, %v1552_v51  ;;  %v1559_v47 = vsel %vm1547_vm11, %v1537_v10, %v1540_v32  ;;  %v4344_v40 = vpop.f32.mrb[10].mxu1 }
 0x1e9   : > { %v1558_v35 = vsel %vm1548_vm13, %v1555_v23, %v1557_v60  ;;  %v1482_v8 = vsel %vm2827_vm15, 0, %v2826_v25  ;;  %v1560_v11 = vsel %vm1550_vm14, %v1546_v43, 1326507024  ;;  %v668_v15 = vsel %vm4299_vm9, 0, %v4283_v49 }
 0x1ea   : > { %v4323_v61 = vmul.u32.u64.low %v1563_v38, %v1558_v35  ;;  %v4324_v14 = vmul.u32.u64.high %v1563_v38, %v1558_v35, %v4323_v61  ;;  %v1500_v44 = vsel %vm4305_vm10, 0, %v1498_v39  ;;  %v1561_v48 = vsel %vm1549_vm12, %v1543_v21, %v1560_v11 }
 0x1eb   : > { %v661_v20 = vcvt.s32.f32 %v654_v33  ;;  %v1554_v24 = vsel %vm1548_vm13, %v1551_v30, %v1553_v4  ;;  %v1562_v10 = vsel %vm1548_vm13, %v1559_v47, %v1561_v48  ;;  %v2800_v25 = vadd.s32 4294967169, %v791_v56 }
 0x1ec   : > { %v1483_v19 = vsub.s32 32, %v1482_v8  ;;  %v2798_v26 = vadd.s32 4294967294, %v751_v46  ;;  %v4335_v27 = vmul.u32.u64.low %v1563_v38, %v1562_v10  ;;  %v4336_v32 = vmul.u32.u64.high %v1563_v38, %v1562_v10, %v4335_v27  ;;  %v2996_v46 = vpop.f32.mrb[11].mxu1 }
 0x1ed   : > { %v662_v36 = vmul.f32 %v661_v20, %v659_v58  ;;  %v1487_v43 = vsub.s32 4294967266, %v1482_v8  ;;  %v1573_v49 = vadd.s32 1, %v4324_v14  ;;  %v797_v23 = vadd.s32 1, %v2800_v25 }
 0x1ee   : > { %v1467_v39 = vadd.s32 %v4201_v34, %v4207_v37  ;;  %v1570_v21 = vmul.u32 %v1563_v38, %v1554_v24  ;;  %v5586_v33 = vand.u32 2147483647, %v4118_v41  ;;  %v672_v28 = vadd.s32 3, %v668_v15 }
 0x1ef   : > { %vm798_vm1 = vcmp.gt.s32.totalorder %v797_v23, 0  ;;  %v1504_v51 = vadd.s32 3, %v1500_v44  ;;  %vm2799_vm2 = vcmp.lt.s32.totalorder %v2798_v26, 0  ;;  %vm1572_vm3 = vc.u32 %v4336_v32, %v4323_v61 }
 0x1f0   : > { %v1485_v53 = vshrl.u32 %v1467_v39, %v1483_v19  ;;  %v663_v58 = vxor.u32 2147483648, %v662_v36  ;;  %v1488_v30 = vadd.s32 127, %v1487_v43  ;;  %v1574_v60 = vsel %vm1572_vm3, %v1573_v49, %v4324_v14 }
 0x1f1   : > { %v799_v56 = vsel %vm798_vm1, %v797_v23, 0  ;;  %v1575_v34 = vadd.s32 %v1574_v60, %v1570_v21  ;;  %v794_v37 = vand.u32 8388607, %v5586_v33  ;;  %v1622_v38 = vand.u32 2139095040, %v4120_v42 }
 0x1f2   : > { %v1484_v4 = vshll.u32 %v4247_v63, %v1482_v8  ;;  %v4351_v35 = vsel %vm2799_vm2, 0, %v2798_v26  ;;  %v801_v47 = vand.u32 31, %v799_v56  ;;  %v4353_v11 = vand.u32 3, %v672_v28 }
 0x1f3   : > { %v4355_v15 = vand.u32 3, %v1504_v51  ;;  %v4359_v14 = vadd.s32 %v4252_v7, %v4258_v13  ;;  %v1576_v44 = vadd.s32 536870912, %v1575_v34  ;;  %v664_v48 = vsel %vm581_vm7, %v663_v58, %v662_v36 }
 0x1f4   : > { %v4363_v20 = vor.u32 %v1485_v53, %v1484_v4  ;;  %v1489_v24 = vshll.u32 %v1488_v30, 23  ;;  %v802_v10 = vsub.s32 32, %v801_v47  ;;  %v759_v63 = vsub.s32 4294967266, %v4351_v35 }
 0x1f5   : > { %5661 = vst [vmem:[#allocation26_spill] sm:$0xff] %v4355_v15  ;;  %v4366_v8 = vshrl.u32 %v1576_v44, 30  ;;  %v795_v25 = vor.u32 8388608, %v794_v37  ;;  %v1623_v19 = vshrl.u32 %v1622_v38, 23  ;;  %v804_v26 = vshll.u32 %v5602_v57, %v801_v47 }
 0x1f6   : > { %v805_v27 = vshrl.u32 %v5598_v59, %v802_v10  ;;  %v808_v7 = vshrl.u32 %v5604_v1, %v802_v10  ;;  %v811_v13 = vshrl.u32 %v5594_v3, %v802_v10  ;;  %v807_v43 = vshll.u32 %v5598_v59, %v801_v47 }
 0x1f7   : > { %v1578_v36 = vshll.u32 %v4366_v8, 30  ;;  %v810_v49 = vshll.u32 %v5604_v1, %v801_v47  ;;  %v814_v23 = vshrl.u32 %v5596_v5, %v802_v10  ;;  %v800_v39 = vshrl.u32 %v799_v56, 5 }
 0x1f8   : > { %v813_v21 = vshll.u32 %v5594_v3, %v801_v47  ;;  %v816_v28 = vshll.u32 %v5596_v5, %v801_v47  ;;  %v817_v53 = vshrl.u32 %v5589_v12, %v802_v10  ;;  %v806_v58 = vor.u32 %v805_v27, %v804_v26 }
 0x1f9   : > { %v4379_v51 = vsub.s32 %v1575_v34, %v1578_v36  ;;  %v809_v30 = vor.u32 %v808_v7, %v807_v43  ;;  %v812_v60 = vor.u32 %v811_v13, %v810_v49  ;;  %v1490_v46 = vor.u32 4788187, %v1489_v24 }
 0x1fa   : > { %v769_v37 = vsub.s32 4, %v4285_v62  ;;  %v815_v38 = vor.u32 %v814_v23, %v813_v21  ;;  %v5593_v4 = vand.u32 2147483647, %v4120_v42  ;;  %vm685_vm4 = vcmp.lt.s32.totalorder %v4113_v29, 0 }
 0x1fb   : > { %v755_v56 = vsub.s32 32, %v4351_v35  ;;  %v1581_v44 = vsub.s32 0, %v4379_v51  ;;  %v818_v47 = vor.u32 %v817_v53, %v816_v28  ;;  %v835_v0 = vshll.u32 %v795_v25, 8 }
 0x1fc   : > { %v760_v33 = vadd.s32 127, %v759_v63  ;;  %vm819_vm5 = vcmp.lt.s32.totalorder %v800_v39, 1  ;;  %vm822_vm6 = vcmp.lt.s32.totalorder %v800_v39, 4  ;;  %v2832_v34 = vadd.s32 4294967169, %v1623_v19 }
 0x1fd   : > { %v2829_v26 = vmin.u32 %v1581_v44, %v4379_v51  ;;  %v803_v24 = vshrl.u32 %v5602_v57, %v802_v10  ;;  %v824_v27 = vsel %vm822_vm6, %v812_v60, 2102212464  ;;  %v827_v7 = vsel %vm819_vm5, %v806_v58, %v809_v30 }
 0x1fe   : > { %vm820_vm7 = vcmp.lt.s32.totalorder %v800_v39, 2  ;;  %vm821_vm11 = vcmp.lt.s32.totalorder %v800_v39, 3  ;;  %v828_v13 = vsel %vm822_vm6, %v815_v38, 920167782  ;;  %v831_v36 = vsel %vm819_vm5, %v809_v30, %v812_v60 }
 0x1ff   : > { %v1583_v43 = vclz %v2829_v26  ;;  %v823_v49 = vsel %vm819_vm5, %v803_v24, %v806_v58  ;;  %v829_v23 = vsel %vm821_vm11, %v812_v60, %v828_v13  ;;  %v832_v21 = vsel %vm822_vm6, %v818_v47, 1326507024 }
 0x200   : > { %v825_v28 = vsel %vm821_vm11, %v809_v30, %v824_v27  ;;  %v830_v63 = vsel %vm820_vm7, %v827_v7, %v829_v23  ;;  %v833_v25 = vsel %vm821_vm11, %v815_v38, %v832_v21  ;;  %v1629_v53 = vadd.s32 1, %v2832_v34 }
 0x201   : > { %v834_v19 = vsel %vm820_vm7, %v831_v36, %v833_v25  ;;  %v4390_v44 = vmul.u32.u64.low %v835_v0, %v830_v63  ;;  %v4391_v9 = vmul.u32.u64.high %v835_v0, %v830_v63, %v4390_v44  ;;  %v1626_v10 = vand.u32 8388607, %v5593_v4 }
 0x202   : > { %v761_v45 = vshll.u32 %v760_v33, 23  ;;  %v4396_v12 = vmul.u32.u64.low %v835_v0, %v834_v19  ;;  %v4397_v26 = vmul.u32.u64.high %v835_v0, %v834_v19, %v4396_v12  ;;  %vm1630_vm12 = vcmp.gt.s32.totalorder %v1629_v53, 0 }
 0x203   : > { %v4402_v58 = vsel %vm4299_vm9, %v4101_v17, %v664_v48  ;;  %v2830_v30 = vadd.s32 4294967294, %v1583_v43  ;;  %v826_v60 = vsel %vm820_vm7, %v823_v49, %v825_v28  ;;  %v1631_v38 = vsel %vm1630_vm12, %v1629_v53, 0  ;;  %v4424_v43 = vpop.f32.mrb[12].mxu0 }
 0x204   : > { %v1491_v47 = vand.u32 2147483647, %v1490_v46  ;;  %v1493_v34 = vcvt.s32.f32 %v4363_v20  ;;  %v4409_v33 = vsel %vm685_vm4, %v769_v37, %v4285_v62  ;;  %v1633_v24 = vand.u32 31, %v1631_v38  ;;  %v2975_v28 = vpop.f32.mrb[13].mxu0 }
 0x205   : > { %v756_v12 = vshll.u32 %v4311_v6, %v4351_v35  ;;  %v757_v50 = vshrl.u32 %v4359_v14, %v755_v56  ;;  %v845_v48 = vadd.s32 1, %v4391_v9  ;;  %v1627_v27 = vor.u32 8388608, %v1626_v10 }
 0x206   : > { %v762_v39 = vor.u32 4788187, %v761_v45  ;;  %v842_v7 = vmul.u32 %v835_v0, %v826_v60  ;;  %vm844_vm9 = vc.u32 %v4397_v26, %v4390_v44  ;;  %v1634_v20 = vsub.s32 32, %v1633_v24 }
 0x207   : > { %vm2831_vm13 = vcmp.lt.s32.totalorder %v2830_v30, 0  ;;  %v846_v46 = vsel %vm844_vm9, %v845_v48, %v4391_v9  ;;  %v1636_v62 = vshll.u32 %v5602_v57, %v1633_v24  ;;  %v1639_v37 = vshll.u32 %v5598_v59, %v1633_v24 }
 0x208   : > { %v847_v13 = vadd.s32 %v846_v46, %v842_v7  ;;  %v1632_v6 = vshrl.u32 %v1631_v38, 5  ;;  %v1637_v35 = vshrl.u32 %v5598_v59, %v1634_v20  ;;  %v1640_v14 = vshrl.u32 %v5604_v1, %v1634_v20 }
 0x209   : > { %v1494_v56 = vmul.f32 %v1493_v34, %v1491_v47  ;;  %v758_v45 = vor.u32 %v757_v50, %v756_v12  ;;  %v1642_v0 = vshll.u32 %v5604_v1, %v1633_v24  ;;  %v1643_v36 = vshrl.u32 %v5594_v3, %v1634_v20 }
 0x20a   : > { %v4426_v49 = vsel %vm2831_vm13, 0, %v2830_v30  ;;  %v848_v9 = vadd.s32 536870912, %v847_v13  ;;  %v1645_v23 = vshll.u32 %v5594_v3, %v1633_v24  ;;  %v4429_v21 = vshll.u32 %v1627_v27, 8 }
 0x20b   : > { %v763_v63 = vand.u32 2147483647, %v762_v39  ;;  %v1638_v25 = vor.u32 %v1637_v35, %v1636_v62  ;;  %v1641_v53 = vor.u32 %v1640_v14, %v1639_v37  ;;  %v1646_v19 = vshrl.u32 %v5596_v5, %v1634_v20 }
 0x20c   : > { %v4432_v10 = vshrl.u32 %v848_v9, 30  ;;  %v1648_v60 = vshll.u32 %v5596_v5, %v1633_v24  ;;  %v5662_v38 = vmov 1326507024   ;;  %vm1651_vm14 = vcmp.lt.s32.totalorder %v1632_v6, 1 }
 0x20d   : > { %v1649_v47 = vshrl.u32 %v5662_v38, %v1634_v20  ;;  %v1591_v30 = vsub.s32 4294967266, %v4426_v49  ;;  %v1635_v34 = vshrl.u32 %v5602_v57, %v1634_v20  ;;  %v1644_v12 = vor.u32 %v1643_v36, %v1642_v0 }
 0x20e   : > { %v1647_v50 = vor.u32 %v1646_v19, %v1645_v23  ;;  %v765_v48 = vcvt.s32.f32 %v758_v45  ;;  %v850_v27 = vshll.u32 %v4432_v10, 30  ;;  %vm1653_vm15 = vcmp.lt.s32.totalorder %v1632_v6, 3 }
 0x20f   : > { %vm1654_vm1 = vcmp.lt.s32.totalorder %v1632_v6, 4  ;;  %v1650_v39 = vor.u32 %v1649_v47, %v1648_v60  ;;  %vm1652_vm2 = vcmp.lt.s32.totalorder %v1632_v6, 2  ;;  %v1659_v24 = vsel %vm1651_vm14, %v1638_v25, %v1641_v53 }
 0x210   : > { %v1656_v7 = vsel %vm1654_vm1, %v1644_v12, 2102212464  ;;  %v1495_v46 = vxor.u32 2147483648, %v1494_v56  ;;  %v766_v62 = vmul.f32 %v765_v48, %v763_v63  ;;  %v4441_v37 = vsub.s32 %v847_v13, %v850_v27 }
 0x211   : > { %v1660_v35 = vsel %vm1654_vm1, %v1647_v50, 920167782  ;;  %v5663_v20 = vand.u32 2147483647, %v4113_v29  ;;  %vm1517_vm5 = vcmp.lt.s32.totalorder %v4115_v31, 0  ;;  %v1592_v45 = vadd.s32 127, %v1591_v30 }
 0x212   : > { %v1655_v0 = vsel %vm1651_vm14, %v1635_v34, %v1638_v25  ;;  %v1661_v36 = vsel %vm1653_vm15, %v1644_v12, %v1660_v35  ;;  %v894_v9 = vand.u32 2139095040, %v4130_v54  ;;  %v853_v13 = vsub.s32 0, %v4441_v37 }
 0x213   : > { %vm4446_vm3 = vcmp.le.f32.partialorder %v5663_v20, 0.7853982  ;;  %v1657_v23 = vsel %vm1653_vm15, %v1641_v53, %v1656_v7  ;;  %v1662_v28 = vsel %vm1652_vm2, %v1659_v24, %v1661_v36  ;;  %v1663_v63 = vsel %vm1651_vm14, %v1641_v53, %v1644_v12 }
 0x214   : > { %v1587_v19 = vsub.s32 32, %v4426_v49  ;;  %v1664_v60 = vsel %vm1654_vm1, %v1650_v39, 1326507024  ;;  %v4461_v47 = vmul.u32.u64.low %v4429_v21, %v1662_v28  ;;  %v4462_v30 = vmul.u32.u64.high %v4429_v21, %v1662_v28, %v4461_v47 }
 0x215   : > { %v1496_v25 = vsel %vm1413_vm8, %v1495_v46, %v1494_v56  ;;  %v1571_v34 = vadd.s32 %v4323_v61, %v4336_v32  ;;  %v2801_v48 = vmin.u32 %v853_v13, %v4441_v37  ;;  %v1665_v27 = vsel %vm1653_vm15, %v1647_v50, %v1664_v60 }
 0x216   : > { %v5666_v53 = vand.u32 2147483647, %v4115_v31  ;;  %v1593_v39 = vshll.u32 %v1592_v45, 23  ;;  %v1658_v7 = vsel %vm1652_vm2, %v1655_v0, %v1657_v23  ;;  %v1666_v24 = vsel %vm1652_vm2, %v1663_v63, %v1665_v27  ;;  %v4516_v27 = vpop.f32.mrb[12].mxu1 }
 0x217   : > { %v895_v35 = vshrl.u32 %v894_v9, 23  ;;  %v1601_v56 = vsub.s32 4, %v4366_v8  ;;  %v855_v46 = vclz %v2801_v48  ;;  %v767_v50 = vxor.u32 2147483648, %v766_v62 }
 0x218   : > { %vm4473_vm6 = vcmp.le.f32.partialorder %v5666_v53, 0.7853982  ;;  %v4481_v61 = vmul.u32.u64.low %v4429_v21, %v1666_v24  ;;  %v4482_v32 = vmul.u32.u64.high %v4429_v21, %v1666_v24, %v4481_v61  ;;  %v1589_v20 = vshrl.u32 %v1571_v34, %v1587_v19 }
 0x219   : > { %v1677_v36 = vadd.s32 1, %v4462_v30  ;;  %v2804_v13 = vadd.s32 4294967169, %v895_v35  ;;  %3372 = vcosq.f32 %v4402_v58  ;;  %v2802_v45 = vadd.s32 4294967294, %v855_v46  ;;  %v2999_v35 = vpop.f32.mrb[13].mxu1 }
 0x21a   : > { %v1674_v0 = vmul.u32 %v4429_v21, %v1658_v7  ;;  %v5592_v6 = vand.u32 2147483647, %v4130_v54  ;;  %3374 = vsinq.f32 %v4402_v58  ;;  %v1588_v9 = vshll.u32 %v4379_v51, %v4426_v49 }
 0x21b   : > { %v1594_v23 = vor.u32 4788187, %v1593_v39  ;;  %v901_v28 = vadd.s32 1, %v2804_v13  ;;  %v1499_v63 = vsel %vm4305_vm10, %v4103_v18, %v1496_v25  ;;  %v772_v19 = vsel %vm4446_vm3, 0, %v4409_v33 }
 0x21c   : > { %v4500_v21 = vsel %vm1517_vm5, %v1601_v56, %v4366_v8  ;;  %vm1676_vm8 = vc.u32 %v4482_v32, %v4461_v47  ;;  %v768_v51 = vsel %vm685_vm4, %v767_v50, %v766_v62  ;;  %v1590_v58 = vor.u32 %v1589_v20, %v1588_v9 }
 0x21d   : > { %v1678_v49 = vsel %vm1676_vm8, %v1677_v36, %v4462_v30  ;;  %vm902_vm7 = vcmp.gt.s32.totalorder %v901_v28, 0  ;;  %vm2803_vm10 = vcmp.lt.s32.totalorder %v2802_v45, 0  ;;  %v898_v33 = vand.u32 8388607, %v5592_v6 }
 0x21e   : > { %v1679_v16 = vadd.s32 %v1678_v49, %v1674_v0  ;;  %v1726_v60 = vand.u32 2139095040, %v4132_v55  ;;  %3376 = vcosq.f32 %v1499_v63  ;;  %v1595_v8 = vand.u32 2147483647, %v1594_v23 }
 0x21f   : > { %v903_v25 = vsel %vm902_vm7, %v901_v28, 0  ;;  %v5591_v34 = vand.u32 2147483647, %v4132_v55  ;;  %3378 = vsinq.f32 %v1499_v63  ;;  %v4511_v48 = vadd.s32 3, %v772_v19 }
 0x220   : > { %v1680_v30 = vadd.s32 536870912, %v1679_v16  ;;  %v4521_v53 = vsel %vm4446_vm3, %v4113_v29, %v768_v51  ;;  %v1597_v39 = vcvt.s32.f32 %v1590_v58  ;;  %v4523_v7 = vsel %vm2803_vm10, 0, %v2802_v45 }
 0x221   : > { %v905_v24 = vand.u32 31, %v903_v25  ;;  %v843_v56 = vadd.s32 %v4390_v44, %v4397_v26  ;;  %v873_v46 = vsub.s32 4, %v4432_v10  ;;  %v1727_v50 = vshrl.u32 %v1726_v60, 23 }
 0x222   : > { %v4528_v61 = vshrl.u32 %v1680_v30, 30  ;;  %v4530_v20 = vmul.f32 %v1597_v39, %v1595_v8  ;;  %v899_v36 = vor.u32 8388608, %v898_v33  ;;  %v4534_v14 = vand.u32 8388607, %v5591_v34 }
 0x223   : > { %v906_v13 = vsub.s32 32, %v905_v24  ;;  %v4536_v45 = vpop.eup %3372  ;;  %v859_v0 = vsub.s32 32, %v4523_v7  ;;  %v863_v9 = vsub.s32 4294967266, %v4523_v7  ;;  %v908_v26 = vshll.u32 %v5602_v57, %v905_v24 }
 0x224   : > { %v1682_v44 = vshll.u32 %v4528_v61, 30  ;;  %v4542_v23 = vpop.eup %3374  ;;  %v911_v63 = vshll.u32 %v5598_v59, %v905_v24  ;;  %v904_v49 = vshrl.u32 %v903_v25, 5  ;;  %v914_v33 = vshll.u32 %v5604_v1, %v905_v24 }
 0x225   : > { %v909_v28 = vshrl.u32 %v5598_v59, %v906_v13  ;;  %v912_v19 = vshrl.u32 %v5604_v1, %v906_v13  ;;  %v915_v51 = vshrl.u32 %v5594_v3, %v906_v13  ;;  %v2836_v60 = vadd.s32 4294967169, %v1727_v50 }
 0x226   : > { %v4548_v58 = vsub.s32 %v1679_v16, %v1682_v44  ;;  %v4551_v39 = vshll.u32 %v899_v36, 8  ;;  %v1731_v35 = vor.u32 8388608, %v4534_v14  ;;  %vm789_vm4 = vcmp.lt.s32.totalorder %v4118_v41, 0 }
 0x227   : > { %v910_v8 = vor.u32 %v909_v28, %v908_v26  ;;  %v913_v30 = vor.u32 %v912_v19, %v911_v63  ;;  %v916_v6 = vor.u32 %v915_v51, %v914_v33  ;;  %v917_v62 = vshll.u32 %v5594_v3, %v905_v24 }
 0x228   : > { %v1685_v34 = vsub.s32 0, %v4548_v58  ;;  %v918_v16 = vshrl.u32 %v5596_v5, %v906_v13  ;;  %v4558_v44 = vpop.eup %3376  ;;  %v861_v25 = vshrl.u32 %v843_v56, %v859_v0  ;;  %v864_v4 = vadd.s32 127, %v863_v9 }
 0x229   : > { %5669 = vst [vmem:[#allocation27_spill] sm:$0xff] %v4558_v44  ;;  %v920_v50 = vshll.u32 %v5596_v5, %v905_v24  ;;  %v921_v36 = vshrl.u32 %v5662_v38, %v906_v13  ;;  %v4562_v26 = vpop.eup %3378  ;;  %vm923_vm11 = vcmp.lt.s32.totalorder %v904_v49, 1  ;;  %v1733_v63 = vadd.s32 1, %v2836_v60 }
 0x22a   : > { %5670 = vst [vmem:[#allocation28_spill] sm:$0xff] %v4562_v26  ;;  %v2833_v14 = vmin.u32 %v1685_v34, %v4548_v58  ;;  %v919_v28 = vor.u32 %v918_v16, %v917_v62  ;;  %v907_v19 = vshrl.u32 %v5602_v57, %v906_v13  ;;  %vm926_vm12 = vcmp.lt.s32.totalorder %v904_v49, 4 }
 0x22b   : > { %v922_v51 = vor.u32 %v921_v36, %v920_v50  ;;  %v931_v33 = vsel %vm923_vm11, %v910_v8, %v913_v30  ;;  %vm925_vm9 = vcmp.lt.s32.totalorder %v904_v49, 3  ;;  %v928_v56 = vsel %vm926_vm12, %v916_v6, 2102212464 }
 0x22c   : > { %v1687_v3 = vclz %v2833_v14  ;;  %v932_v0 = vsel %vm926_vm12, %v919_v28, 920167782  ;;  %v860_v24 = vshll.u32 %v4441_v37, %v4523_v7  ;;  %v865_v9 = vshll.u32 %v864_v4, 23 }
 0x22d   : > { %vm924_vm13 = vcmp.lt.s32.totalorder %v904_v49, 2  ;;  %v933_v34 = vsel %vm925_vm9, %v916_v6, %v932_v0  ;;  %v927_v60 = vsel %vm923_vm11, %v907_v19, %v910_v8  ;;  %v935_v16 = vsel %vm923_vm11, %v913_v30, %v916_v6 }
 0x22e   : > { %v2834_v62 = vadd.s32 4294967294, %v1687_v3  ;;  %v934_v13 = vsel %vm924_vm13, %v931_v33, %v933_v34  ;;  %v929_v50 = vsel %vm925_vm9, %v913_v30, %v928_v56  ;;  %v936_v36 = vsel %vm926_vm12, %v922_v51, 1326507024 }
 0x22f   : > { %v4575_v14 = vmul.u32.u64.low %v4551_v39, %v934_v13  ;;  %v4576_v5 = vmul.u32.u64.high %v4551_v39, %v934_v13, %v4575_v14  ;;  %v4579_v37 = vor.u32 %v861_v25, %v860_v24  ;;  %v937_v4 = vsel %vm925_vm9, %v919_v28, %v936_v36  ;;  %v4618_v13 = vpop.f32.mrb[14].mxu0 }
 0x230   : > { %vm2835_vm14 = vcmp.lt.s32.totalorder %v2834_v62, 0  ;;  %vm1734_vm15 = vcmp.gt.s32.totalorder %v1733_v63, 0  ;;  %v4582_v3 = vor.u32 4788187, %v865_v9  ;;  %v4589_v6 = vsel %vm789_vm4, %v873_v46, %v4432_v10 }
 0x231   : > { %v938_v7 = vsel %vm924_vm13, %v935_v16, %v937_v4  ;;  %v1735_v8 = vsel %vm1734_vm15, %v1733_v63, 0  ;;  %v4595_v25 = vadd.s32 %v4461_v47, %v4482_v32  ;;  %v930_v28 = vsel %vm924_vm13, %v927_v60, %v929_v50 }
 0x232   : > { %v4598_v19 = vshrl.u32 %v1735_v8, 5  ;;  %v4600_v51 = vsel %vm2835_vm14, 0, %v2834_v62  ;;  %v4603_v33 = vmul.u32.u64.low %v4551_v39, %v938_v7  ;;  %v4604_v56 = vmul.u32.u64.high %v4551_v39, %v938_v7, %v4603_v33 }
 0x233   : > { %v1737_v10 = vand.u32 31, %v1735_v8  ;;  %v869_v46 = vcvt.s32.f32 %v4579_v37  ;;  %v949_v63 = vadd.s32 1, %v4576_v5  ;;  %v4608_v0 = vshll.u32 %v1731_v35, 8  ;;  %v2978_v37 = vpop.f32.mrb[15].mxu0 }
 0x234   : > { %v998_v47 = vand.u32 2139095040, %v4148_v22  ;;  %v867_v32 = vand.u32 2147483647, %v4582_v3  ;;  %v1705_v49 = vsub.s32 4, %v4528_v61  ;;  %v1695_v34 = vsub.s32 4294967266, %v4600_v51 }
 0x235   : > { %v1738_v24 = vsub.s32 32, %v1737_v10  ;;  %v1740_v9 = vshll.u32 %v5602_v57, %v1737_v10  ;;  %v946_v62 = vmul.u32 %v4551_v39, %v930_v28  ;;  %v1743_v60 = vshll.u32 %v5598_v59, %v1737_v10 }
 0x236   : > { %vm1755_vm1 = vcmp.lt.s32.totalorder %v4598_v19, 1  ;;  %vm948_vm2 = vc.u32 %v4604_v56, %v4575_v14  ;;  %v1746_v16 = vshll.u32 %v5604_v1, %v1737_v10  ;;  %v5671_v50 = vmov 2102212464  }
 0x237   : > { %v1741_v35 = vshrl.u32 %v5598_v59, %v1738_v24  ;;  %v1749_v36 = vshll.u32 %v5671_v50, %v1737_v10  ;;  %v950_v4 = vsel %vm948_vm2, %v949_v63, %v4576_v5  ;;  %v1739_v39 = vshrl.u32 %v5602_v57, %v1738_v24 }
 0x238   : > { %v1744_v3 = vshrl.u32 %v5604_v1, %v1738_v24  ;;  %v5672_v7 = vmov 920167782   ;;  %vm1621_vm3 = vcmp.lt.s32.totalorder %v4120_v42, 0  ;;  %v951_v28 = vadd.s32 %v950_v4, %v946_v62 }
 0x239   : > { %v1752_v8 = vshll.u32 %v5672_v7, %v1737_v10  ;;  %v1742_v33 = vor.u32 %v1741_v35, %v1740_v9  ;;  %v1747_v30 = vshrl.u32 %v5671_v50, %v1738_v24  ;;  %v1750_v59 = vshrl.u32 %v5672_v7, %v1738_v24 }
 0x23a   : > { %v1696_v15 = vadd.s32 127, %v1695_v34  ;;  %v1745_v44 = vor.u32 %v1744_v3, %v1743_v60  ;;  %v1753_v37 = vshrl.u32 %v5662_v38, %v1738_v24  ;;  %vm1757_vm8 = vcmp.lt.s32.totalorder %v4598_v19, 3 }
 0x23b   : > { %v952_v5 = vadd.s32 536870912, %v951_v28  ;;  %v1748_v63 = vor.u32 %v1747_v30, %v1746_v16  ;;  %v1751_v57 = vor.u32 %v1750_v59, %v1749_v36  ;;  %vm1758_vm7 = vcmp.lt.s32.totalorder %v4598_v19, 4 }
 0x23c   : > { %v5673_v10 = vand.u32 2147483647, %v4118_v41  ;;  %v1691_v9 = vsub.s32 32, %v4600_v51  ;;  %v1754_v35 = vor.u32 %v1753_v37, %v1752_v8  ;;  %vm1756_vm11 = vcmp.lt.s32.totalorder %v4598_v19, 2 }
 0x23d   : > { %v1763_v24 = vsel %vm1755_vm1, %v1742_v33, %v1745_v44  ;;  %v5676_v34 = vand.u32 2147483647, %v4120_v42  ;;  %v4651_v30 = vshrl.u32 %v952_v5, 30  ;;  %v1759_v60 = vsel %vm1755_vm1, %v1739_v39, %v1742_v33 }
 0x23e   : > { %vm4637_vm10 = vcmp.le.f32.partialorder %v5673_v10, 0.7853982  ;;  %v1760_v16 = vsel %vm1758_vm7, %v1748_v63, 2102212464  ;;  %v1764_v36 = vsel %vm1758_vm7, %v1751_v57, 920167782  ;;  %v1767_v8 = vsel %vm1755_vm1, %v1745_v44, %v1748_v63 }
 0x23f   : > { %vm4647_vm12 = vcmp.le.f32.partialorder %v5676_v34, 0.7853982  ;;  %v1761_v4 = vsel %vm1757_vm8, %v1745_v44, %v1760_v16  ;;  %v1765_v3 = vsel %vm1757_vm8, %v1748_v63, %v1764_v36  ;;  %v1768_v37 = vsel %vm1758_vm7, %v1754_v35, 1326507024 }
 0x240   : > { %v870_v10 = vmul.f32 %v869_v46, %v867_v32  ;;  %v1697_v34 = vshll.u32 %v1696_v15, 23  ;;  %v954_v5 = vshll.u32 %v4651_v30, 30  ;;  %v1766_v1 = vsel %vm1756_vm11, %v1763_v24, %v1765_v3 }
 0x241   : > { %v1769_v39 = vsel %vm1757_vm8, %v1751_v57, %v1768_v37  ;;  %v4667_v33 = vmul.u32.u64.low %v4608_v0, %v1766_v1  ;;  %v4668_v16 = vmul.u32.u64.high %v4608_v0, %v1766_v1, %v4667_v33  ;;  %v999_v36 = vshrl.u32 %v998_v47, 23 }
 0x242   : > { %v1693_v26 = vshrl.u32 %v4595_v25, %v1691_v9  ;;  %v4672_v44 = vsub.s32 %v951_v28, %v954_v5  ;;  %v1762_v15 = vsel %vm1756_vm11, %v1759_v60, %v1761_v4  ;;  %v1770_v46 = vsel %vm1756_vm11, %v1767_v8, %v1769_v39 }
 0x243   : > { %v5679_v32 = vxor.u32 2147483648, %v4530_v20  ;;  %v1706_v1 = vsel %vm1621_vm3, %v1705_v49, %v4528_v61  ;;  %v4687_v25 = vmul.u32.u64.low %v4608_v0, %v1770_v46  ;;  %v4688_v47 = vmul.u32.u64.high %v4608_v0, %v1770_v46, %v4687_v25 }
 0x244   : > { %v871_v28 = vxor.u32 2147483648, %v870_v10  ;;  %v1692_v63 = vshll.u32 %v4548_v58, %v4600_v51  ;;  %v1698_v19 = vor.u32 4788187, %v1697_v34  ;;  %v957_v9 = vsub.s32 0, %v4672_v44 }
 0x245   : > { %v1600_v57 = vsel %vm1517_vm5, %v5679_v32, %v4530_v20  ;;  %v5680_v35 = vsel %vm4473_vm6, 0, %v4500_v21  ;;  %v1778_v24 = vmul.u32 %v4608_v0, %v1762_v15  ;;  %v1781_v61 = vadd.s32 1, %v4668_v16 }
 0x246   : > { %v1608_v20 = vadd.s32 3, %v5680_v35  ;;  %v2808_v49 = vadd.s32 4294967169, %v999_v36  ;;  %3380 = vcosq.f32 %v4521_v53  ;;  %v876_v60 = vsel %vm4637_vm10, 0, %v4589_v6 }
 0x247   : > { %v1694_v58 = vor.u32 %v1693_v26, %v1692_v63  ;;  %v2805_v51 = vmin.u32 %v957_v9, %v4672_v44  ;;  %v1603_v4 = vsel %vm4473_vm6, %v4115_v31, %v1600_v57  ;;  %v1708_v21 = vsel %vm4647_vm12, 0, %v1706_v1 }
 0x248   : > { %vm1780_vm5 = vc.u32 %v4688_v47, %v4667_v33  ;;  %v1005_v0 = vadd.s32 1, %v2808_v49  ;;  %v872_v3 = vsel %vm789_vm4, %v871_v28, %v870_v10  ;;  %v1699_v8 = vand.u32 2147483647, %v1698_v19 }
 0x249   : > { %v959_v37 = vclz %v2805_v51  ;;  %v1782_v26 = vsel %vm1780_vm5, %v1781_v61, %v4668_v16  ;;  %3382 = vsinq.f32 %v4521_v53  ;;  %v5607_v12 = vand.u32 2147483647, %v4148_v22 }
 0x24a   : > { %v1783_v6 = vadd.s32 %v1782_v26, %v1778_v24  ;;  %vm1006_vm6 = vcmp.gt.s32.totalorder %v1005_v0, 0  ;;  %3384 = vcosq.f32 %v1603_v4  ;;  %v880_v34 = vadd.s32 3, %v876_v60 }
 0x24b   : > { %v1701_v5 = vcvt.s32.f32 %v1694_v58  ;;  %v1007_v39 = vsel %vm1006_vm6, %v1005_v0, 0  ;;  %v875_v36 = vsel %vm4637_vm10, %v4118_v41, %v872_v3  ;;  %v1712_v15 = vadd.s32 3, %v1708_v21 }
 0x24c   : > { %v1784_v10 = vadd.s32 536870912, %v1783_v6  ;;  %v1009_v46 = vand.u32 31, %v1007_v39  ;;  %v4720_v32 = vand.u32 3, %v4511_v48  ;;  %3386 = vsinq.f32 %v1603_v4 }
 0x24d   : > { %v4722_v53 = vmul.f32 %v1701_v5, %v1699_v8  ;;  %v2806_v16 = vadd.s32 4294967294, %v959_v37  ;;  %v977_v57 = vsub.s32 4, %v4651_v30  ;;  %v1002_v25 = vand.u32 8388607, %v5607_v12 }
 0x24e   : > { %5681 = vst [vmem:[#allocation29_spill] sm:$0xff] %v4720_v32  ;;  %v4725_v1 = vshrl.u32 %v1784_v10, 30  ;;  %v1010_v28 = vsub.s32 32, %v1009_v46  ;;  %v4729_v62 = vand.u32 3, %v1608_v20  ;;  %3388 = vcosq.f32 %v875_v36 }
 0x24f   : > { %vm893_vm4 = vcmp.lt.s32.totalorder %v4130_v54, 0  ;;  %v1830_v48 = vand.u32 2139095040, %v4234_v52  ;;  %3390 = vsinq.f32 %v875_v36  ;;  %v4733_v63 = vand.u32 3, %v880_v34 }
 0x250   : > { %5682 = vst [vmem:[#allocation30_spill] sm:$0xff] %v4729_v62  ;;  %v4735_v19 = vand.u32 3, %v1712_v15  ;;  %v1786_v9 = vshll.u32 %v4725_v1, 30  ;;  %v4738_v35 = vpop.eup %3380  ;;  %v1703_v24 = vxor.u32 2147483648, %v4722_v53  ;;  %vm2807_vm9 = vcmp.lt.s32.totalorder %v2806_v16, 0 }
 0x251   : > { %5683 = vst [vmem:[#allocation31_spill] sm:$0xff] %v4733_v63  ;;  %5685 = vst [vmem:[#allocation33_spill] sm:$0xff] %v4738_v35  ;;  %v5686_v61 = vmov 2475754826   ;;  %v5687_v49 = vmov 2131351028   ;;  %v4746_v58 = vsel %vm893_vm4, %v977_v57, %v4651_v30  ;;  %v1019_v21 = vshrl.u32 %v5671_v50, %v1010_v28 }
 0x252   : > { %5684 = vst [vmem:[#allocation32_spill] sm:$0xff] %v4735_v19  ;;  %v1013_v20 = vshrl.u32 %v5686_v61, %v1010_v28  ;;  %v1016_v60 = vshrl.u32 %v5687_v49, %v1010_v28  ;;  %v4748_v51 = vsub.s32 %v1783_v6, %v1786_v9  ;;  %v1003_v4 = vor.u32 8388608, %v1002_v25 }
 0x253   : > { %v5688_v0 = vmov 683565275   ;;  %v1015_v8 = vshll.u32 %v5686_v61, %v1009_v46  ;;  %v1831_v26 = vshrl.u32 %v1830_v48, 23  ;;  %v4754_v34 = vpop.eup %3382  ;;  %v4756_v5 = vsel %vm2807_vm9, 0, %v2806_v16 }
 0x254   : > { %v1012_v3 = vshll.u32 %v5688_v0, %v1009_v46  ;;  %5689 = vst [vmem:[#allocation34_spill] sm:$0xff] %v4754_v34  ;;  %v1789_v36 = vsub.s32 0, %v4748_v51  ;;  %v1008_v30 = vshrl.u32 %v1007_v39, 5  ;;  %v1018_v6 = vshll.u32 %v5687_v49, %v1009_v46  ;;  %v4760_v15 = vpop.eup %3384 }
 0x255   : > { %5690 = vst [vmem:[#allocation35_spill] sm:$0xff] %v4760_v15  ;;  %v1017_v57 = vor.u32 %v1016_v60, %v1015_v8  ;;  %v1021_v25 = vshll.u32 %v5671_v50, %v1009_v46  ;;  %v1022_v9 = vshrl.u32 %v5672_v7, %v1010_v28  ;;  %v1024_v37 = vshll.u32 %v5672_v7, %v1009_v46 }
 0x256   : > { %v1014_v10 = vor.u32 %v1013_v20, %v1012_v3  ;;  %v2837_v12 = vmin.u32 %v1789_v36, %v4748_v51  ;;  %v1020_v48 = vor.u32 %v1019_v21, %v1018_v6  ;;  %v1025_v16 = vshrl.u32 %v5662_v38, %v1010_v28  ;;  %v4767_v19 = vpop.eup %3386 }
 0x257   : > { %5691 = vst [vmem:[#allocation36_spill] sm:$0xff] %v4767_v19  ;;  %v5692_v39 = vand.u32 2147483647, %v4130_v54  ;;  %v967_v20 = vsub.s32 4294967266, %v4756_v5  ;;  %v1023_v60 = vor.u32 %v1022_v9, %v1021_v25  ;;  %v1043_v3 = vshll.u32 %v1003_v4, 8 }
 0x258   : > { %v2840_v8 = vadd.s32 4294967169, %v1831_v26  ;;  %v1791_v15 = vclz %v2837_v12  ;;  %v1026_v36 = vor.u32 %v1025_v16, %v1024_v37  ;;  %vm1027_vm14 = vcmp.lt.s32.totalorder %v1008_v30, 1  ;;  %v4776_v46 = vpop.eup %3388 }
 0x259   : > { %vm4771_vm13 = vcmp.le.f32.partialorder %v5692_v39, 0.7853982  ;;  %vm1030_vm15 = vcmp.lt.s32.totalorder %v1008_v30, 4  ;;  %5695 = vst [vmem:[#allocation37_spill] sm:$0xff] %v4776_v46  ;;  %vm1028_vm1 = vcmp.lt.s32.totalorder %v1008_v30, 2  ;;  %vm1029_vm2 = vcmp.lt.s32.totalorder %v1008_v30, 3  ;;  %v4779_v39 = vpop.eup %3390 }
 0x25a   : > { %v1035_v21 = vsel %vm1027_vm14, %v1014_v10, %v1017_v57  ;;  %v1036_v6 = vsel %vm1030_vm15, %v1023_v60, 920167782  ;;  %5696 = vst [vmem:[#allocation38_spill] sm:$0xff] %v4779_v39  ;;  %vm1725_vm8 = vcmp.lt.s32.totalorder %v4132_v55, 0  ;;  %v2838_v62 = vadd.s32 4294967294, %v1791_v15 }
 0x25b   : > { %v1032_v19 = vsel %vm1030_vm15, %v1020_v48, 2102212464  ;;  %v1037_v4 = vsel %vm1029_vm2, %v1020_v48, %v1036_v6  ;;  %v1039_v12 = vsel %vm1027_vm14, %v1017_v57, %v1020_v48  ;;  %v1011_v37 = vshrl.u32 %v5688_v0, %v1010_v28 }
 0x25c   : > { %v1038_v26 = vsel %vm1028_vm1, %v1035_v21, %v1037_v4  ;;  %v1040_v25 = vsel %vm1030_vm15, %v1026_v36, 1326507024  ;;  %v1837_v9 = vadd.s32 1, %v2840_v8  ;;  %v963_v16 = vsub.s32 32, %v4756_v5 }
 0x25d   : > { %v1041_v18 = vsel %vm1029_vm2, %v1023_v60, %v1040_v25  ;;  %v4788_v41 = vmul.u32.u64.low %v1043_v3, %v1038_v26  ;;  %v4789_v46 = vmul.u32.u64.high %v1043_v3, %v1038_v26, %v4788_v41  ;;  %v968_v15 = vadd.s32 127, %v967_v20 }
 0x25e   : > { %v1031_v63 = vsel %vm1027_vm14, %v1011_v37, %v1014_v10  ;;  %v1033_v6 = vsel %vm1029_vm2, %v1017_v57, %v1032_v19  ;;  %v1042_v48 = vsel %vm1028_vm1, %v1039_v12, %v1041_v18  ;;  %v4798_v28 = vsel %vm1621_vm3, %v1703_v24, %v4722_v53 }
 0x25f   : > { %v947_v8 = vadd.s32 %v4575_v14, %v4604_v56  ;;  %vm2839_vm7 = vcmp.lt.s32.totalorder %v2838_v62, 0  ;;  %v5697_v60 = vand.u32 2147483647, %v4234_v52  ;;  %v1809_v20 = vsub.s32 4, %v4725_v1 }
 0x260   : > { %v4807_v10 = vmul.u32.u64.low %v1043_v3, %v1042_v48  ;;  %v4808_v21 = vmul.u32.u64.high %v1043_v3, %v1042_v48, %v4807_v10  ;;  %vm1838_vm10 = vcmp.gt.s32.totalorder %v1837_v9, 0  ;;  %v1034_v19 = vsel %vm1028_vm1, %v1031_v63, %v1033_v6 }
 0x261   : > { %v4804_v36 = vand.u32 8388607, %v5697_v60  ;;  %v965_v18 = vshrl.u32 %v947_v8, %v963_v16  ;;  %v1053_v14 = vadd.s32 1, %v4789_v46  ;;  %v969_v56 = vshll.u32 %v968_v15, 23 }
 0x262   : > { %v1779_v24 = vadd.s32 %v4667_v33, %v4688_v47  ;;  %v4817_v57 = vsel %vm2839_vm7, 0, %v2838_v62  ;;  %v1839_v4 = vsel %vm1838_vm10, %v1837_v9, 0  ;;  %v964_v12 = vshll.u32 %v4672_v44, %v4756_v5 }
 0x263   : > { %v1835_v37 = vor.u32 8388608, %v4804_v36  ;;  %v1841_v26 = vand.u32 31, %v1839_v4  ;;  %v4826_v63 = vsel %vm1725_vm8, %v1809_v20, %v4725_v1  ;;  %v1050_v30 = vmul.u32 %v1043_v3, %v1034_v19 }
 0x264   : > { %vm1052_vm3 = vc.u32 %v4808_v21, %v4788_v41  ;;  %v1102_v33 = vand.u32 2139095040, %v4287_v2  ;;  %v966_v47 = vor.u32 %v965_v18, %v964_v12  ;;  %v1799_v62 = vsub.s32 4294967266, %v4817_v57 }
 0x265   : > { %v1054_v44 = vsel %vm1052_vm3, %v1053_v14, %v4789_v46  ;;  %v1842_v5 = vsub.s32 32, %v1841_v26  ;;  %v970_v9 = vor.u32 4788187, %v969_v56  ;;  %v1844_v15 = vshll.u32 %v5688_v0, %v1841_v26 }
 0x266   : > { %v1055_v16 = vadd.s32 %v1054_v44, %v1050_v30  ;;  %v1847_v6 = vshll.u32 %v5686_v61, %v1841_v26  ;;  %v1840_v1 = vshrl.u32 %v1839_v4, 5  ;;  %v1850_v8 = vshll.u32 %v5687_v49, %v1841_v26 }
 0x267   : > { %v1845_v3 = vshrl.u32 %v5686_v61, %v1842_v5  ;;  %v1848_v48 = vshrl.u32 %v5687_v49, %v1842_v5  ;;  %v1851_v36 = vshrl.u32 %v5671_v50, %v1842_v5  ;;  %v1853_v20 = vshll.u32 %v5671_v50, %v1841_v26 }
 0x268   : > { %v1056_v60 = vadd.s32 536870912, %v1055_v16  ;;  %v1854_v46 = vshrl.u32 %v5672_v7, %v1842_v5  ;;  %v973_v10 = vcvt.s32.f32 %v966_v47  ;;  %v1800_v18 = vadd.s32 127, %v1799_v62 }
 0x269   : > { %v1856_v19 = vshll.u32 %v5672_v7, %v1841_v26  ;;  %v1103_v14 = vshrl.u32 %v1102_v33, 23  ;;  %v1846_v4 = vor.u32 %v1845_v3, %v1844_v15  ;;  %v1849_v12 = vor.u32 %v1848_v48, %v1847_v6 }
 0x26a   : > { %v4842_v56 = vshrl.u32 %v1056_v60, 30  ;;  %v1857_v30 = vshrl.u32 %v5662_v38, %v1842_v5  ;;  %v971_v44 = vand.u32 2147483647, %v970_v9  ;;  %v1852_v25 = vor.u32 %v1851_v36, %v1850_v8 }
 0x26b   : > { %v1855_v53 = vor.u32 %v1854_v46, %v1853_v20  ;;  %vm1859_vm11 = vcmp.lt.s32.totalorder %v1840_v1, 1  ;;  %v1795_v39 = vsub.s32 32, %v4817_v57  ;;  %v1843_v47 = vshrl.u32 %v5688_v0, %v1842_v5 }
 0x26c   : > { %v1058_v29 = vshll.u32 %v4842_v56, 30  ;;  %vm1862_vm5 = vcmp.lt.s32.totalorder %v1840_v1, 4  ;;  %v1801_v62 = vshll.u32 %v1800_v18, 23  ;;  %v1858_v26 = vor.u32 %v1857_v30, %v1856_v19 }
 0x26d   : > { %vm1861_vm6 = vcmp.lt.s32.totalorder %v1840_v1, 3  ;;  %v1864_v33 = vsel %vm1862_vm5, %v1852_v25, 2102212464  ;;  %v5698_v15 = vand.u32 2147483647, %v4132_v55  ;;  %vm1860_vm14 = vcmp.lt.s32.totalorder %v1840_v1, 2 }
 0x26e   : > { %v4855_v9 = vsub.s32 %v1055_v16, %v1058_v29  ;;  %v1867_v3 = vsel %vm1859_vm11, %v1846_v4, %v1849_v12  ;;  %v2812_v48 = vadd.s32 4294967169, %v1103_v14  ;;  %v974_v8 = vmul.f32 %v973_v10, %v971_v44 }
 0x26f   : > { %vm4851_vm9 = vcmp.le.f32.partialorder %v5698_v15, 0.7853982  ;;  %v1796_v5 = vshll.u32 %v4748_v51, %v4817_v57  ;;  %v1868_v60 = vsel %vm1862_vm5, %v1855_v53, 920167782  ;;  %v1875_v36 = vshll.u32 %v1835_v37, 8 }
 0x270   : > { %v1061_v20 = vsub.s32 0, %v4855_v9  ;;  %v1863_v46 = vsel %vm1859_vm11, %v1843_v47, %v1846_v4  ;;  %v1865_v18 = vsel %vm1861_vm6, %v1849_v12, %v1864_v33  ;;  %v1869_v29 = vsel %vm1861_vm6, %v1852_v25, %v1868_v60 }
 0x271   : > { %v1797_v16 = vshrl.u32 %v1779_v24, %v1795_v39  ;;  %v1870_v19 = vsel %vm1860_vm14, %v1867_v3, %v1869_v29  ;;  %v1871_v14 = vsel %vm1859_vm11, %v1849_v12, %v1852_v25  ;;  %v1872_v10 = vsel %vm1862_vm5, %v1858_v26, 1326507024 }
 0x272   : > { %v1802_v30 = vor.u32 4788187, %v1801_v62  ;;  %v2809_v51 = vmin.u32 %v1061_v20, %v4855_v9  ;;  %v1873_v57 = vsel %vm1861_vm6, %v1855_v53, %v1872_v10  ;;  %v1109_v37 = vadd.s32 1, %v2812_v48 }
 0x273   : > { %v1866_v44 = vsel %vm1860_vm14, %v1863_v46, %v1865_v18  ;;  %v1874_v4 = vsel %vm1860_vm14, %v1871_v14, %v1873_v57  ;;  %v4872_v47 = vmul.u32.u64.low %v1875_v36, %v1870_v19  ;;  %v4873_v33 = vmul.u32.u64.high %v1875_v36, %v1870_v19, %v4872_v47 }
 0x274   : > { %v1063_v39 = vclz %v2809_v51  ;;  %v4876_v24 = vmul.u32.u64.low %v1875_v36, %v1874_v4  ;;  %v4877_v15 = vmul.u32.u64.high %v1875_v36, %v1874_v4, %v4876_v24  ;;  %vm1110_vm15 = vcmp.gt.s32.totalorder %v1109_v37, 0 }
 0x275   : > { %v1707_v25 = vsel %vm4647_vm12, %v4120_v42, %v4798_v28  ;;  %v5701_v53 = vsel %vm4771_vm13, 0, %v4746_v58  ;;  %v1798_v12 = vor.u32 %v1797_v16, %v1796_v5  ;;  %v1111_v62 = vsel %vm1110_vm15, %v1109_v37, 0 }
 0x276   : > { %v984_v1 = vadd.s32 3, %v5701_v53  ;;  %v975_v26 = vxor.u32 2147483648, %v974_v8  ;;  %v2810_v3 = vadd.s32 4294967294, %v1063_v39  ;;  %v1882_v48 = vmul.u32 %v1875_v36, %v1866_v44 }
 0x277   : > { %v1113_v60 = vand.u32 31, %v1111_v62  ;;  %v1803_v20 = vand.u32 2147483647, %v1802_v30  ;;  %v1812_v46 = vsel %vm4851_vm9, 0, %v4826_v63  ;;  %v1885_v18 = vadd.s32 1, %v4873_v33 }
 0x278   : > { %v5702_v59 = vand.u32 2147483647, %v4287_v2  ;;  %3392 = vcosq.f32 %v1707_v25  ;;  %vm2811_vm12 = vcmp.lt.s32.totalorder %v2810_v3, 0  ;;  %vm1884_vm1 = vc.u32 %v4877_v15, %v4872_v47 }
 0x279   : > { %v1114_v58 = vsub.s32 32, %v1113_v60  ;;  %3394 = vsinq.f32 %v1707_v25  ;;  %v1805_v5 = vcvt.s32.f32 %v1798_v12  ;;  %v4895_v36 = vsel %vm2811_vm12, 0, %v2810_v3 }
 0x27a   : > { %v1106_v28 = vand.u32 8388607, %v5702_v59  ;;  %v1886_v29 = vsel %vm1884_vm1, %v1885_v18, %v4873_v33  ;;  %v4900_v63 = vsel %vm893_vm4, %v975_v26, %v974_v8  ;;  %v4902_v16 = vand.u32 3, %v984_v1 }
 0x27b   : > { %v4904_v19 = vadd.s32 3, %v1812_v46  ;;  %v1887_v14 = vadd.s32 %v1886_v29, %v1882_v48  ;;  %v4906_v10 = vmul.f32 %v1805_v5, %v1803_v20  ;;  %v1117_v51 = vshrl.u32 %v5686_v61, %v1114_v58 }
 0x27c   : > { %5703 = vst [vmem:[#allocation39_spill] sm:$0xff] %v4902_v16  ;;  %v1107_v30 = vor.u32 8388608, %v1106_v28  ;;  %v1120_v57 = vshrl.u32 %v5687_v49, %v1114_v58  ;;  %v1071_v37 = vsub.s32 4294967266, %v4895_v36  ;;  %v1116_v4 = vshll.u32 %v5688_v0, %v1113_v60 }
 0x27d   : > { %v1888_v44 = vadd.s32 536870912, %v1887_v14  ;;  %v1123_v8 = vshrl.u32 %v5671_v50, %v1114_v58  ;;  %v1119_v33 = vshll.u32 %v5686_v61, %v1113_v60  ;;  %v1125_v39 = vshll.u32 %v5671_v50, %v1113_v60 }
 0x27e   : > { %v1126_v24 = vshrl.u32 %v5672_v7, %v1114_v58  ;;  %v1934_v25 = vand.u32 2139095040, %v4344_v40  ;;  %v1112_v1 = vshrl.u32 %v1111_v62, 5  ;;  %v1118_v12 = vor.u32 %v1117_v51, %v1116_v4 }
 0x27f   : > { %v4917_v53 = vshrl.u32 %v1888_v44, 30  ;;  %v1122_v26 = vshll.u32 %v5687_v49, %v1113_v60  ;;  %v1121_v3 = vor.u32 %v1120_v57, %v1119_v33  ;;  %v1128_v20 = vshll.u32 %v5672_v7, %v1113_v60 }
 0x280   : > { %v1127_v48 = vor.u32 %v1126_v24, %v1125_v39  ;;  %v1129_v46 = vshrl.u32 %v5662_v38, %v1114_v58  ;;  %vm997_vm4 = vcmp.lt.s32.totalorder %v4148_v22, 0  ;;  %v1051_v18 = vadd.s32 %v4788_v41, %v4808_v21 }
 0x281   : > { %v1072_v59 = vadd.s32 127, %v1071_v37  ;;  %v1890_v28 = vshll.u32 %v4917_v53, 30  ;;  %v1124_v5 = vor.u32 %v1123_v8, %v1122_v26  ;;  %v1807_v62 = vxor.u32 2147483648, %v4906_v10 }
 0x282   : > { %v1081_v29 = vsub.s32 4, %v4842_v56  ;;  %v1130_v51 = vor.u32 %v1129_v46, %v1128_v20  ;;  %v1147_v57 = vshll.u32 %v1107_v30, 8  ;;  %v4928_v44 = vpop.eup %3392  ;;  %v1067_v60 = vsub.s32 32, %v4895_v36 }
 0x283   : > { %5704 = vst [vmem:[#allocation40_spill] sm:$0xff] %v4928_v44  ;;  %v4931_v4 = vsub.s32 %v1887_v14, %v1890_v28  ;;  %vm1131_vm2 = vcmp.lt.s32.totalorder %v1112_v1, 1  ;;  %vm1134_vm7 = vcmp.lt.s32.totalorder %v1112_v1, 4  ;;  %v4933_v33 = vpop.eup %3394  ;;  %v5706_v41 = vand.u32 2147483647, %v4148_v22 }
 0x284   : > { %5705 = vst [vmem:[#allocation41_spill] sm:$0xff] %v4933_v33  ;;  %v1115_v37 = vshrl.u32 %v5688_v0, %v1114_v58  ;;  %v1139_v30 = vsel %vm1131_vm2, %v1118_v12, %v1121_v3  ;;  %v1140_v8 = vsel %vm1134_vm7, %v1127_v48, 920167782  ;;  %v1935_v39 = vshrl.u32 %v1934_v25, 23 }
 0x285   : > { %vm4937_vm10 = vcmp.le.f32.partialorder %v5706_v41, 0.7853982  ;;  %v1073_v24 = vshll.u32 %v1072_v59, 23  ;;  %v1893_v14 = vsub.s32 0, %v4931_v4  ;;  %vm1133_vm3 = vcmp.lt.s32.totalorder %v1112_v1, 3 }
 0x286   : > { %v1136_v26 = vsel %vm1134_vm7, %v1124_v5, 2102212464  ;;  %vm1132_vm11 = vcmp.lt.s32.totalorder %v1112_v1, 2  ;;  %v1141_v20 = vsel %vm1133_vm3, %v1124_v5, %v1140_v8  ;;  %v1143_v46 = vsel %vm1131_vm2, %v1121_v3, %v1124_v5 }
 0x287   : > { %v1144_v28 = vsel %vm1134_vm7, %v1130_v51, 1326507024  ;;  %v1069_v41 = vshrl.u32 %v1051_v18, %v1067_v60  ;;  %v2841_v44 = vmin.u32 %v1893_v14, %v4931_v4  ;;  %v1135_v33 = vsel %vm1131_vm2, %v1115_v37, %v1118_v12 }
 0x288   : > { %v1142_v58 = vsel %vm1132_vm11, %v1139_v30, %v1141_v20  ;;  %v1137_v42 = vsel %vm1133_vm3, %v1121_v3, %v1136_v26  ;;  %v1145_v16 = vsel %vm1133_vm3, %v1127_v48, %v1144_v28  ;;  %v1074_v32 = vor.u32 4788187, %v1073_v24 }
 0x289   : > { %v4948_v25 = vmul.u32.u64.low %v1147_v57, %v1142_v58  ;;  %v4949_v59 = vmul.u32.u64.high %v1147_v57, %v1142_v58, %v4948_v25  ;;  %v1895_v35 = vclz %v2841_v44  ;;  %v1146_v8 = vsel %vm1132_vm11, %v1143_v46, %v1145_v16 }
 0x28a   : > { %v2844_v34 = vadd.s32 4294967169, %v1935_v39  ;;  %v1068_v18 = vshll.u32 %v4855_v9, %v4895_v36  ;;  %v1082_v12 = vsel %vm997_vm4, %v1081_v29, %v4842_v56  ;;  %v1138_v48 = vsel %vm1132_vm11, %v1135_v33, %v1137_v42 }
 0x28b   : > { %v4958_v5 = vmul.u32.u64.low %v1147_v57, %v1146_v8  ;;  %v4959_v51 = vmul.u32.u64.high %v1147_v57, %v1146_v8, %v4958_v5  ;;  %v2842_v3 = vadd.s32 4294967294, %v1895_v35  ;;  %v5630_v60 = vand.u32 2147483647, %v4344_v40 }
 0x28c   : > { %v1941_v37 = vadd.s32 1, %v2844_v34  ;;  %v979_v16 = vsel %vm4771_vm13, %v4130_v54, %v4900_v63  ;;  %v1808_v9 = vsel %vm1725_vm8, %v1807_v62, %v4906_v10  ;;  %v1070_v36 = vor.u32 %v1069_v41, %v1068_v18 }
 0x28d   : > { %v1157_v56 = vadd.s32 1, %v4949_v59  ;;  %v1075_v29 = vand.u32 2147483647, %v1074_v32  ;;  %v1084_v35 = vsel %vm4937_vm10, 0, %v1082_v12  ;;  %vm1829_vm5 = vcmp.lt.s32.totalorder %v4234_v52, 0 }
 0x28e   : > { %vm2843_vm6 = vcmp.lt.s32.totalorder %v2842_v3, 0  ;;  %vm1942_vm14 = vcmp.gt.s32.totalorder %v1941_v37, 0  ;;  %v1154_v34 = vmul.u32 %v1147_v57, %v1138_v48  ;;  %vm1156_vm13 = vc.u32 %v4959_v51, %v4948_v25 }
 0x28f   : > { %v4974_v42 = vsel %vm2843_vm6, 0, %v2842_v3  ;;  %v1943_v31 = vsel %vm1942_vm14, %v1941_v37, 0  ;;  %3396 = vcosq.f32 %v979_v16  ;;  %v4979_v63 = vand.u32 3, %v4904_v19 }
 0x290   : > { %v1158_v32 = vsel %vm1156_vm13, %v1157_v56, %v4949_v59  ;;  %v1938_v10 = vand.u32 8388607, %v5630_v60  ;;  %3398 = vsinq.f32 %v979_v16  ;;  %v1077_v1 = vcvt.s32.f32 %v1070_v36 }
 0x291   : > { %v1159_v62 = vadd.s32 %v1158_v32, %v1154_v34  ;;  %v1945_v44 = vand.u32 31, %v1943_v31  ;;  %v4987_v57 = vsel %vm4851_vm9, %v4132_v55, %v1808_v9  ;;  %v4989_v33 = vadd.s32 3, %v1084_v35 }
 0x292   : > { %v1883_v19 = vadd.s32 %v4872_v47, %v4877_v15  ;;  %v1903_v30 = vsub.s32 4294967266, %v4974_v42  ;;  %v4994_v39 = vmul.f32 %v1077_v1, %v1075_v29  ;;  %v1913_v24 = vsub.s32 4, %v4917_v53 }
 0x293   : > { %v1160_v14 = vadd.s32 536870912, %v1159_v62  ;;  %v1946_v26 = vsub.s32 32, %v1945_v44  ;;  %v1939_v20 = vor.u32 8388608, %v1938_v10  ;;  %v1944_v46 = vshrl.u32 %v1943_v31, 5 }
 0x294   : > { %v1948_v28 = vshll.u32 %v5688_v0, %v1945_v44  ;;  %v1951_v6 = vshll.u32 %v5686_v61, %v1945_v44  ;;  %v1957_v15 = vshll.u32 %v5671_v50, %v1945_v44  ;;  %v1904_v59 = vadd.s32 127, %v1903_v30 }
 0x295   : > { %v4999_v41 = vshrl.u32 %v1160_v14, 30  ;;  %v1949_v58 = vshrl.u32 %v5686_v61, %v1946_v26  ;;  %v1952_v47 = vshrl.u32 %v5687_v49, %v1946_v26  ;;  %v1954_v8 = vshll.u32 %v5687_v49, %v1945_v44 }
 0x296   : > { %v1955_v18 = vshrl.u32 %v5671_v50, %v1946_v26  ;;  %v1958_v12 = vshrl.u32 %v5672_v7, %v1946_v26  ;;  %v1079_v5 = vxor.u32 2147483648, %v4994_v39  ;;  %v1914_v3 = vsel %vm1829_vm5, %v1913_v24, %v4917_v53 }
 0x297   : > { %v1162_v48 = vshll.u32 %v4999_v41, 30  ;;  %v1206_v37 = vand.u32 2139095040, %v4424_v43  ;;  %v1899_v16 = vsub.s32 32, %v4974_v42  ;;  %v1950_v9 = vor.u32 %v1949_v58, %v1948_v28 }
 0x298   : > { %v1953_v36 = vor.u32 %v1952_v47, %v1951_v6  ;;  %v1960_v56 = vshll.u32 %v5672_v7, %v1945_v44  ;;  %v5709_v29 = vand.u32 2147483647, %v4234_v52  ;;  %v1959_v31 = vor.u32 %v1958_v12, %v1957_v15 }
 0x299   : > { %v5021_v34 = vsub.s32 %v1159_v62, %v1162_v48  ;;  %v1961_v53 = vshrl.u32 %v5662_v38, %v1946_v26  ;;  %vm1963_vm9 = vcmp.lt.s32.totalorder %v1944_v46, 1  ;;  %v5024_v32 = vpop.eup %3396  ;;  %v1905_v10 = vshll.u32 %v1904_v59, 23 }
 0x29a   : > { %vm5017_vm8 = vcmp.le.f32.partialorder %v5709_v29, 0.7853982  ;;  %v1947_v1 = vshrl.u32 %v5688_v0, %v1946_v26  ;;  %v1956_v30 = vor.u32 %v1955_v18, %v1954_v8  ;;  %v1979_v24 = vshll.u32 %v1939_v20, 8  ;;  %v5027_v44 = vpop.eup %3398 }
 0x29b   : > { %v1165_v14 = vsub.s32 0, %v5021_v34  ;;  %v1962_v28 = vor.u32 %v1961_v53, %v1960_v56  ;;  %vm1965_vm15 = vcmp.lt.s32.totalorder %v1944_v46, 3  ;;  %vm1966_vm12 = vcmp.lt.s32.totalorder %v1944_v46, 4 }
 0x29c   : > { %v1900_v62 = vshll.u32 %v4931_v4, %v4974_v42  ;;  %vm1964_vm1 = vcmp.lt.s32.totalorder %v1944_v46, 2  ;;  %v1968_v6 = vsel %vm1966_vm12, %v1956_v30, 2102212464  ;;  %v1971_v58 = vsel %vm1963_vm9, %v1950_v9, %v1953_v36 }
 0x29d   : > { %v1901_v47 = vshrl.u32 %v1883_v19, %v1899_v16  ;;  %v2813_v26 = vmin.u32 %v1165_v14, %v5021_v34  ;;  %v1972_v20 = vsel %vm1966_vm12, %v1959_v31, 920167782  ;;  %v1207_v15 = vshrl.u32 %v1206_v37, 23 }
 0x29e   : > { %v1967_v59 = vsel %vm1963_vm9, %v1947_v1, %v1950_v9  ;;  %v1969_v8 = vsel %vm1965_vm15, %v1953_v36, %v1968_v6  ;;  %v1973_v18 = vsel %vm1965_vm15, %v1956_v30, %v1972_v20  ;;  %v1975_v12 = vsel %vm1963_vm9, %v1953_v36, %v1956_v30 }
 0x29f   : > { %v1906_v4 = vor.u32 4788187, %v1905_v10  ;;  %vm1101_vm2 = vcmp.lt.s32.totalorder %v4287_v2, 0  ;;  %v1167_v42 = vclz %v2813_v26  ;;  %v1974_v48 = vsel %vm1964_vm1, %v1971_v58, %v1973_v18 }
 0x2a0   : > { %v1976_v19 = vsel %vm1966_vm12, %v1962_v28, 1326507024  ;;  %v5044_v56 = vmul.u32.u64.low %v1979_v24, %v1974_v48  ;;  %v5045_v37 = vmul.u32.u64.high %v1979_v24, %v1974_v48, %v5044_v56  ;;  %v5629_v9 = vand.u32 2147483647, %v4424_v43 }
 0x2a1   : > { %v1977_v16 = vsel %vm1965_vm15, %v1959_v31, %v1976_v19  ;;  %v1902_v29 = vor.u32 %v1901_v47, %v1900_v62  ;;  %v2814_v53 = vadd.s32 4294967294, %v1167_v42  ;;  %v1970_v36 = vsel %vm1964_vm1, %v1967_v59, %v1969_v8 }
 0x2a2   : > { %v1978_v10 = vsel %vm1964_vm1, %v1975_v12, %v1977_v16  ;;  %v1916_v1 = vsel %vm5017_vm8, 0, %v1914_v3  ;;  %v5712_v30 = vand.u32 2147483647, %v4287_v2  ;;  %v2816_v6 = vadd.s32 4294967169, %v1207_v15 }
 0x2a3   : > { %v5059_v31 = vmul.u32.u64.low %v1979_v24, %v1978_v10  ;;  %v5060_v28 = vmul.u32.u64.high %v1979_v24, %v1978_v10, %v5059_v31  ;;  %v1080_v62 = vsel %vm997_vm4, %v1079_v5, %v4994_v39  ;;  %v1907_v58 = vand.u32 2147483647, %v1906_v4 }
 0x2a4   : > { %vm5055_vm7 = vcmp.le.f32.partialorder %v5712_v30, 0.7853982  ;;  %vm2815_vm3 = vcmp.lt.s32.totalorder %v2814_v53, 0  ;;  %v1185_v46 = vsub.s32 4, %v4999_v41  ;;  %v1986_v3 = vmul.u32 %v1979_v24, %v1970_v36 }
 0x2a5   : > { %v5066_v47 = vsel %vm2815_vm3, 0, %v2814_v53  ;;  %v1989_v26 = vadd.s32 1, %v5045_v37  ;;  %v1213_v20 = vadd.s32 1, %v2816_v6  ;;  %3400 = vcosq.f32 %v4987_v57 }
 0x2a6   : > { %v1909_v59 = vcvt.s32.f32 %v1902_v29  ;;  %v1920_v8 = vadd.s32 3, %v1916_v1  ;;  %v1210_v15 = vand.u32 8388607, %v5629_v9  ;;  %3402 = vsinq.f32 %v4987_v57 }
 0x2a7   : > { %v5076_v39 = vsel %vm4937_vm10, %v4148_v22, %v1080_v62  ;;  %vm1988_vm4 = vc.u32 %v5060_v28, %v5044_v56  ;;  %vm1214_vm11 = vcmp.gt.s32.totalorder %v1213_v20, 0  ;;  %v1175_v24 = vsub.s32 4294967266, %v5066_v47 }
 0x2a8   : > { %v1910_v5 = vmul.f32 %v1909_v59, %v1907_v58  ;;  %v1990_v18 = vsel %vm1988_vm4, %v1989_v26, %v5045_v37  ;;  %v1215_v12 = vsel %vm1214_vm11, %v1213_v20, 0  ;;  %v5083_v4 = vand.u32 3, %v4989_v33 }
 0x2a9   : > { %v5088_v57 = vsel %vm1101_vm2, %v1185_v46, %v4999_v41  ;;  %v1991_v21 = vadd.s32 %v1990_v18, %v1986_v3  ;;  %v1217_v42 = vand.u32 31, %v1215_v12  ;;  %3404 = vcosq.f32 %v5076_v39 }
 0x2aa   : > { %v5091_v48 = vand.u32 3, %v1920_v8  ;;  %v1155_v19 = vadd.s32 %v4948_v25, %v4959_v51  ;;  %v1211_v16 = vor.u32 8388608, %v1210_v15  ;;  %v2038_v53 = vand.u32 2139095040, %v4516_v27 }
 0x2ab   : > { %v1992_v37 = vadd.s32 536870912, %v1991_v21  ;;  %v1218_v29 = vsub.s32 32, %v1217_v42  ;;  %v1911_v36 = vxor.u32 2147483648, %v1910_v5  ;;  %v1171_v41 = vsub.s32 32, %v5066_v47 }
 0x2ac   : > { %5715 = vst [vmem:[#allocation42_spill] sm:$0xff] %v5091_v48  ;;  %v1176_v10 = vadd.s32 127, %v1175_v24  ;;  %v1220_v31 = vshll.u32 %v5688_v0, %v1217_v42  ;;  %v1223_v6 = vshll.u32 %v5686_v61, %v1217_v42  ;;  %v1229_v58 = vshll.u32 %v5671_v50, %v1217_v42 }
 0x2ad   : > { %v5101_v30 = vshrl.u32 %v1992_v37, 30  ;;  %v1221_v25 = vshrl.u32 %v5686_v61, %v1218_v29  ;;  %v1224_v51 = vshrl.u32 %v5687_v49, %v1218_v29  ;;  %v1227_v62 = vshrl.u32 %v5671_v50, %v1218_v29 }
 0x2ae   : > { %v1230_v46 = vshrl.u32 %v5672_v7, %v1218_v29  ;;  %v1216_v26 = vshrl.u32 %v1215_v12, 5  ;;  %v1226_v20 = vshll.u32 %v5687_v49, %v1217_v42  ;;  %v2039_v59 = vshrl.u32 %v2038_v53, 23 }
 0x2af   : > { %v1994_v3 = vshll.u32 %v5101_v30, 30  ;;  %v5112_v8 = vpop.eup %3400  ;;  %v1222_v15 = vor.u32 %v1221_v25, %v1220_v31  ;;  %v1225_v24 = vor.u32 %v1224_v51, %v1223_v6  ;;  %v1233_v37 = vshrl.u32 %v5662_v38, %v1218_v29 }
 0x2b0   : > { %5716 = vst [vmem:[#allocation43_spill] sm:$0xff] %v5112_v8  ;;  %v1231_v18 = vor.u32 %v1230_v46, %v1229_v58  ;;  %v5115_v9 = vpop.eup %3402  ;;  %v1912_v60 = vsel %vm1829_vm5, %v1911_v36, %v1910_v5  ;;  %v1228_v33 = vor.u32 %v1227_v62, %v1226_v20  ;;  %v1232_v12 = vshll.u32 %v5672_v7, %v1217_v42 }
 0x2b1   : > { %v5119_v1 = vsub.s32 %v1991_v21, %v1994_v3  ;;  %v1172_v53 = vshll.u32 %v5021_v34, %v5066_v47  ;;  %v1177_v48 = vshll.u32 %v1176_v10, 23  ;;  %v1251_v8 = vshll.u32 %v1211_v16, 8 }
 0x2b2   : > { %v5717_v31 = vand.u32 2147483647, %v4516_v27  ;;  %v1234_v6 = vor.u32 %v1233_v37, %v1232_v12  ;;  %vm1235_vm10 = vcmp.lt.s32.totalorder %v1216_v26, 1  ;;  %vm1238_vm6 = vcmp.lt.s32.totalorder %v1216_v26, 4 }
 0x2b3   : > { %v1997_v51 = vsub.s32 0, %v5119_v1  ;;  %v5127_v58 = vpop.eup %3404  ;;  %v1173_v5 = vshrl.u32 %v1155_v19, %v1171_v41  ;;  %v1243_v21 = vsel %vm1235_vm10, %v1222_v15, %v1225_v24  ;;  %v1244_v42 = vsel %vm1238_vm6, %v1231_v18, 920167782 }
 0x2b4   : > { %v2042_v25 = vand.u32 8388607, %v5717_v31  ;;  %v2848_v36 = vadd.s32 4294967169, %v2039_v59  ;;  %v1219_v47 = vshrl.u32 %v5688_v0, %v1218_v29  ;;  %vm1237_vm5 = vcmp.lt.s32.totalorder %v1216_v26, 3 }
 0x2b5   : > { %v2845_v34 = vmin.u32 %v1997_v51, %v5119_v1  ;;  %v1240_v16 = vsel %vm1238_vm6, %v1228_v33, 2102212464  ;;  %v1178_v10 = vor.u32 4788187, %v1177_v48  ;;  %vm1236_vm14 = vcmp.lt.s32.totalorder %v1216_v26, 2 }
 0x2b6   : > { %v1245_v62 = vsel %vm1237_vm5, %v1228_v33, %v1244_v42  ;;  %v1247_v46 = vsel %vm1235_vm10, %v1225_v24, %v1228_v33  ;;  %v1239_v19 = vsel %vm1235_vm10, %v1219_v47, %v1222_v15  ;;  %v1248_v20 = vsel %vm1238_vm6, %v1234_v6, 1326507024 }
 0x2b7   : > { %v1999_v3 = vclz %v2845_v34  ;;  %v1246_v41 = vsel %vm1236_vm14, %v1243_v21, %v1245_v62  ;;  %vm1933_vm13 = vcmp.lt.s32.totalorder %v4344_v40, 0  ;;  %v1241_v59 = vsel %vm1237_vm5, %v1225_v24, %v1240_v16 }
 0x2b8   : > { %v1249_v37 = vsel %vm1237_vm5, %v1231_v18, %v1248_v20  ;;  %v5139_v29 = vmul.u32.u64.low %v1251_v8, %v1246_v41  ;;  %v5140_v12 = vmul.u32.u64.high %v1251_v8, %v1246_v41, %v5139_v29  ;;  %v1174_v48 = vor.u32 %v1173_v5, %v1172_v53 }
 0x2b9   : > { %v2846_v31 = vadd.s32 4294967294, %v1999_v3  ;;  %v1250_v51 = vsel %vm1236_vm14, %v1247_v46, %v1249_v37  ;;  %v2045_v33 = vadd.s32 1, %v2848_v36  ;;  %v5147_v15 = vsel %vm5017_vm8, %v4234_v52, %v1912_v60 }
 0x2ba   : > { %v5149_v21 = vmul.u32.u64.low %v1251_v8, %v1250_v51  ;;  %v5150_v6 = vmul.u32.u64.high %v1251_v8, %v1250_v51, %v5149_v21  ;;  %v2043_v42 = vor.u32 8388608, %v2042_v25  ;;  %3406 = vsinq.f32 %v5076_v39 }
 0x2bb   : > { %v1179_v24 = vand.u32 2147483647, %v1178_v10  ;;  %v1242_v18 = vsel %vm1236_vm14, %v1239_v19, %v1241_v59  ;;  %vm2046_vm9 = vcmp.gt.s32.totalorder %v2045_v33, 0  ;;  %v5718_v53 = vsel %vm5055_vm7, 0, %v5088_v57 }
 0x2bc   : > { %v5158_v5 = vadd.s32 3, %v5718_v53  ;;  %vm2847_vm15 = vcmp.lt.s32.totalorder %v2846_v31, 0  ;;  %v1261_v60 = vadd.s32 1, %v5140_v12  ;;  %v2047_v35 = vsel %vm2046_vm9, %v2045_v33, 0 }
 0x2bd   : > { %3408 = vcosq.f32 %v5147_v15  ;;  %v1181_v36 = vcvt.s32.f32 %v1174_v48  ;;  %v1987_v39 = vadd.s32 %v5044_v56, %v5060_v28  ;;  %v2017_v26 = vsub.s32 4, %v5101_v30 }
 0x2be   : > { %v1258_v25 = vmul.u32 %v1251_v8, %v1242_v18  ;;  %vm1260_vm8 = vc.u32 %v5150_v6, %v5139_v29  ;;  %v2049_v34 = vand.u32 31, %v2047_v35  ;;  %v5167_v57 = vshll.u32 %v2043_v42, 8 }
 0x2bf   : > { %v1182_v47 = vmul.f32 %v1181_v36, %v1179_v24  ;;  %v5169_v16 = vsel %vm2847_vm15, 0, %v2846_v31  ;;  %v1262_v10 = vsel %vm1260_vm8, %v1261_v60, %v5140_v12  ;;  %v5719_v46 = vand.u32 2147483647, %v4344_v40 }
 0x2c0   : > { %v1263_v28 = vadd.s32 %v1262_v10, %v1258_v25  ;;  %v2050_v8 = vsub.s32 32, %v2049_v34  ;;  %v2052_v3 = vshll.u32 %v5688_v0, %v2049_v34  ;;  %v2055_v19 = vshll.u32 %v5686_v61, %v2049_v34 }
 0x2c1   : > { %vm5175_vm12 = vcmp.le.f32.partialorder %v5719_v46, 0.7853982  ;;  %v2018_v41 = vsel %vm1933_vm13, %v2017_v26, %v5101_v30  ;;  %v2048_v20 = vshrl.u32 %v2047_v35, 5  ;;  %v2061_v59 = vshll.u32 %v5671_v50, %v2049_v34 }
 0x2c2   : > { %v1310_v37 = vand.u32 2139095040, %v4618_v13  ;;  %v1264_v12 = vadd.s32 536870912, %v1263_v28  ;;  %v2053_v48 = vshrl.u32 %v5686_v61, %v2050_v8  ;;  %v2056_v31 = vshrl.u32 %v5687_v49, %v2050_v8 }
 0x2c3   : > { %v2058_v51 = vshll.u32 %v5687_v49, %v2049_v34  ;;  %v1183_v33 = vxor.u32 2147483648, %v1182_v47  ;;  %v2007_v21 = vsub.s32 4294967266, %v5169_v16  ;;  %v2059_v42 = vshrl.u32 %v5671_v50, %v2050_v8 }
 0x2c4   : > { %v2062_v24 = vshrl.u32 %v5672_v7, %v2050_v8  ;;  %v5192_v30 = vshrl.u32 %v1264_v12, 30  ;;  %v2054_v18 = vor.u32 %v2053_v48, %v2052_v3  ;;  %v2057_v53 = vor.u32 %v2056_v31, %v2055_v19  ;;  %v5195_v35 = vpop.eup %3406 }
 0x2c5   : > { %v2064_v60 = vshll.u32 %v5672_v7, %v2049_v34  ;;  %v2065_v26 = vshrl.u32 %v5662_v38, %v2050_v8  ;;  %vm2067_vm1 = vcmp.lt.s32.totalorder %v2048_v20, 1  ;;  %v1311_v25 = vshrl.u32 %v1310_v37, 23 }
 0x2c6   : > { %v2063_v36 = vor.u32 %v2062_v24, %v2061_v59  ;;  %v2003_v10 = vsub.s32 32, %v5169_v16  ;;  %v1266_v46 = vshll.u32 %v5192_v30, 30  ;;  %v2051_v62 = vshrl.u32 %v5688_v0, %v2050_v8 }
 0x2c7   : > { %v2060_v52 = vor.u32 %v2059_v42, %v2058_v51  ;;  %v5201_v12 = vpop.eup %3408  ;;  %v2008_v3 = vadd.s32 127, %v2007_v21  ;;  %v2066_v19 = vor.u32 %v2065_v26, %v2064_v60  ;;  %vm2069_vm3 = vcmp.lt.s32.totalorder %v2048_v20, 3 }
 0x2c8   : > { %5722 = vst [vmem:[#allocation44_spill] sm:$0xff] %v5201_v12  ;;  %vm2070_vm4 = vcmp.lt.s32.totalorder %v2048_v20, 4  ;;  %v5203_v34 = vsub.s32 %v1263_v28, %v1266_v46  ;;  %vm2068_vm11 = vcmp.lt.s32.totalorder %v2048_v20, 2  ;;  %v2075_v37 = vsel %vm2067_vm1, %v2054_v18, %v2057_v53 }
 0x2c9   : > { %v2072_v59 = vsel %vm2070_vm4, %v2060_v52, 2102212464  ;;  %v1184_v48 = vsel %vm1101_vm2, %v1183_v33, %v1182_v47  ;;  %v2020_v8 = vsel %vm5175_vm12, 0, %v2018_v41  ;;  %v2076_v31 = vsel %vm2070_vm4, %v2063_v36, 920167782 }
 0x2ca   : > { %v2820_v51 = vadd.s32 4294967169, %v1311_v25  ;;  %v1269_v21 = vsub.s32 0, %v5203_v34  ;;  %v2071_v42 = vsel %vm2067_vm1, %v2051_v62, %v2054_v18  ;;  %v2073_v28 = vsel %vm2069_vm3, %v2057_v53, %v2072_v59 }
 0x2cb   : > { %v2077_v24 = vsel %vm2069_vm3, %v2060_v52, %v2076_v31  ;;  %v2005_v60 = vshrl.u32 %v1987_v39, %v2003_v10  ;;  %v2079_v46 = vsel %vm2067_vm1, %v2057_v53, %v2060_v52  ;;  %v2080_v47 = vsel %vm2070_vm4, %v2066_v19, 1326507024 }
 0x2cc   : > { %v2078_v26 = vsel %vm2068_vm11, %v2075_v37, %v2077_v24  ;;  %v2004_v41 = vshll.u32 %v5119_v1, %v5169_v16  ;;  %v2009_v33 = vshll.u32 %v2008_v3, 23  ;;  %v2817_v25 = vmin.u32 %v1269_v21, %v5203_v34 }
 0x2cd   : > { %v2081_v12 = vsel %vm2069_vm3, %v2063_v36, %v2080_v47  ;;  %v2074_v62 = vsel %vm2068_vm11, %v2071_v42, %v2073_v28  ;;  %v5226_v39 = vmul.u32.u64.low %v5167_v57, %v2078_v26  ;;  %v5227_v10 = vmul.u32.u64.high %v5167_v57, %v2078_v26, %v5226_v39 }
 0x2ce   : > { %v2082_v18 = vsel %vm2068_vm11, %v2079_v46, %v2081_v12  ;;  %v5233_v52 = vsel %vm5055_vm7, %v4287_v2, %v1184_v48  ;;  %v1271_v1 = vclz %v2817_v25  ;;  %3410 = vsinq.f32 %v5147_v15 }
 0x2cf   : > { %v5236_v16 = vmul.u32.u64.low %v5167_v57, %v2082_v18  ;;  %v5237_v53 = vmul.u32.u64.high %v5167_v57, %v2082_v18, %v5236_v16  ;;  %v5241_v20 = vand.u32 3, %v5158_v5  ;;  %v5243_v36 = vor.u32 %v2005_v60, %v2004_v41 }
 0x2d0   : > { %v1317_v12 = vadd.s32 1, %v2820_v51  ;;  %v5245_v3 = vor.u32 4788187, %v2009_v33  ;;  %v5247_v19 = vadd.s32 3, %v2020_v8  ;;  %v2818_v14 = vadd.s32 4294967294, %v1271_v1 }
 0x2d1   : > { %v2090_v59 = vmul.u32 %v5167_v57, %v2074_v62  ;;  %3412 = vsinq.f32 %v5233_v52  ;;  %v2093_v37 = vadd.s32 1, %v5227_v10  ;;  %v5723_v48 = vand.u32 2147483647, %v4618_v13 }
 0x2d2   : > { %vm1318_vm2 = vcmp.gt.s32.totalorder %v1317_v12, 0  ;;  %v1259_v5 = vadd.s32 %v5139_v29, %v5150_v6  ;;  %vm2819_vm7 = vcmp.lt.s32.totalorder %v2818_v14, 0  ;;  %vm2092_vm10 = vc.u32 %v5237_v53, %v5226_v39 }
 0x2d3   : > { %v1314_v15 = vand.u32 8388607, %v5723_v48  ;;  %v1319_v8 = vsel %vm1318_vm2, %v1317_v12, 0  ;;  %v2013_v31 = vcvt.s32.f32 %v5243_v36  ;;  %v1274_v51 = vsel %vm2819_vm7, 0, %v2818_v14 }
 0x2d4   : > { %v2094_v57 = vsel %vm2092_vm10, %v2093_v37, %v5227_v10  ;;  %v1321_v21 = vand.u32 31, %v1319_v8  ;;  %v2011_v42 = vand.u32 2147483647, %v5245_v3  ;;  %v1275_v28 = vsub.s32 32, %v1274_v51 }
 0x2d5   : > { %v1279_v24 = vsub.s32 4294967266, %v1274_v51  ;;  %v2095_v60 = vadd.s32 %v2094_v57, %v2090_v59  ;;  %v1315_v46 = vor.u32 8388608, %v1314_v15  ;;  %v676_v6 = vxor.u32 2147483648, %v4542_v23 }
 0x2d6   : > { %v1322_v29 = vsub.s32 32, %v1321_v21  ;;  %v1320_v33 = vshrl.u32 %v1319_v8, 5  ;;  %v1324_v25 = vshll.u32 %v5688_v0, %v1321_v21  ;;  %v1327_v18 = vshll.u32 %v5686_v61, %v1321_v21 }
 0x2d7   : > { %v1280_v47 = vadd.s32 127, %v1279_v24  ;;  %v2096_v41 = vadd.s32 536870912, %v2095_v60  ;;  %v1277_v16 = vshrl.u32 %v1259_v5, %v1275_v28  ;;  %v1330_v12 = vshll.u32 %v5687_v49, %v1321_v21 }
 0x2d8   : > { %v1325_v62 = vshrl.u32 %v5686_v61, %v1322_v29  ;;  %v1328_v10 = vshrl.u32 %v5687_v49, %v1322_v29  ;;  %v1331_v1 = vshrl.u32 %v5671_v50, %v1322_v29  ;;  %v1334_v3 = vshrl.u32 %v5672_v7, %v1322_v29  ;;  %v5272_v14 = vpop.eup %3410 }
 0x2d9   : > { %v5268_v36 = vshrl.u32 %v2096_v41, 30  ;;  %v1281_v59 = vshll.u32 %v1280_v47, 23  ;;  %v1333_v15 = vshll.u32 %v5671_v50, %v1321_v21  ;;  %v1276_v61 = vshll.u32 %v5203_v34, %v1274_v51 }
 0x2da   : > { %v1326_v37 = vor.u32 %v1325_v62, %v1324_v25  ;;  %v1329_v48 = vor.u32 %v1328_v10, %v1327_v18  ;;  %v1332_v57 = vor.u32 %v1331_v1, %v1330_v12  ;;  %v1355_v24 = vshll.u32 %v1315_v46, 8 }
 0x2db   : > { %v2098_v8 = vshll.u32 %v5268_v36, 30  ;;  %v5277_v5 = vpop.eup %3412  ;;  %v1335_v28 = vor.u32 %v1334_v3, %v1333_v15  ;;  %v1336_v49 = vshll.u32 %v5672_v7, %v1321_v21  ;;  %v1337_v41 = vshrl.u32 %v5662_v38, %v1322_v29 }
 0x2dc   : > { %v679_v26 = vxor.u32 2147483648, %v4536_v45  ;;  %vm1205_vm6 = vcmp.lt.s32.totalorder %v4424_v43, 0  ;;  %v1278_v47 = vor.u32 %v1277_v16, %v1276_v61  ;;  %v1323_v50 = vshrl.u32 %v5688_v0, %v1322_v29 }
 0x2dd   : > { %v5283_v25 = vsub.s32 %v2095_v60, %v2098_v8  ;;  %vm1339_vm5 = vcmp.lt.s32.totalorder %v1320_v33, 1  ;;  %v1282_v34 = vor.u32 4788187, %v1281_v59  ;;  %v1338_v51 = vor.u32 %v1337_v41, %v1336_v49 }
 0x2de   : > { %vm1342_vm14 = vcmp.lt.s32.totalorder %v1320_v33, 4  ;;  %v1347_v46 = vsel %vm1339_vm5, %v1326_v37, %v1329_v48  ;;  %vm1341_vm9 = vcmp.lt.s32.totalorder %v1320_v33, 3  ;;  %vm1340_vm15 = vcmp.lt.s32.totalorder %v1320_v33, 2 }
 0x2df   : > { %v2101_v62 = vsub.s32 0, %v5283_v25  ;;  %v1344_v7 = vsel %vm1342_vm14, %v1332_v57, 2102212464  ;;  %v1348_v21 = vsel %vm1342_vm14, %v1335_v28, 920167782  ;;  %v1351_v18 = vsel %vm1339_vm5, %v1329_v48, %v1332_v57 }
 0x2e0   : > { %v1349_v38 = vsel %vm1341_vm9, %v1332_v57, %v1348_v21  ;;  %v1352_v10 = vsel %vm1342_vm14, %v1338_v51, 1326507024  ;;  %v1343_v60 = vsel %vm1339_vm5, %v1323_v50, %v1326_v37  ;;  %v1345_v16 = vsel %vm1341_vm9, %v1329_v48, %v1344_v7  ;;  %v5728_v7 = vld [vmem:[#allocation34_spill] sm:$0xff] }
 0x2e1   : > { %v2849_v1 = vmin.u32 %v2101_v62, %v5283_v25  ;;  %v1350_v0 = vsel %vm1340_vm15, %v1347_v46, %v1349_v38  ;;  %v2014_v29 = vmul.f32 %v2013_v31, %v2011_v42  ;;  %v1353_v12 = vsel %vm1341_vm9, %v1335_v28, %v1352_v10 }
 0x2e2   : > { %v5289_v3 = vmul.u32.u64.low %v1355_v24, %v1350_v0  ;;  %v5290_v59 = vmul.u32.u64.high %v1355_v24, %v1350_v0, %v5289_v3  ;;  %v1283_v15 = vand.u32 2147483647, %v1282_v34  ;;  %v1354_v8 = vsel %vm1340_vm15, %v1351_v18, %v1353_v12  ;;  %v5730_v18 = vld [vmem:[#allocation29_spill] sm:$0xff] }
 0x2e3   : > { %v2103_v61 = vclz %v2849_v1  ;;  %vm671_vm8 = vweird.f32 %v4101_v17  ;;  %vm675_vm1 = vcmp.eq.s32.totalorder %v4353_v11, 0  ;;  %v5724_v57 = vand.u32 2147483647, %v4424_v43  ;;  %v5734_v17 = vld [vmem:[#allocation37_spill] sm:$0xff] }
 0x2e4   : > { %v1346_v31 = vsel %vm1340_vm15, %v1343_v60, %v1345_v16  ;;  %v5303_v42 = vmul.u32.u64.low %v1355_v24, %v1354_v8  ;;  %v5304_v48 = vmul.u32.u64.high %v1355_v24, %v1354_v8, %v5303_v42  ;;  %vm678_vm4 = vcmp.eq.s32.totalorder %v4353_v11, 2  ;;  %v5731_v16 = vld [vmem:[#allocation21_spill] sm:$0xff] }
 0x2e5   : > { %vm5298_vm3 = vcmp.le.f32.partialorder %v5724_v57, 0.7853982  ;;  %v1285_v28 = vcvt.s32.f32 %v1278_v47  ;;  %v2850_v49 = vadd.s32 4294967294, %v2103_v61  ;;  %v677_v41 = vsel %vm675_vm1, %v4536_v45, %v676_v6  ;;  %v5732_v61 = vld [vmem:[#allocation38_spill] sm:$0xff] }
 0x2e6   : > { %v680_v50 = vsel %vm678_vm4, %v679_v26, %v4542_v23  ;;  %v2015_v34 = vxor.u32 2147483648, %v2014_v29  ;;  %v5727_v51 = vsub.s32 4, %v5192_v30  ;;  %v1365_v46 = vadd.s32 1, %v5290_v59  ;;  %v5729_v26 = vld [vmem:[#allocation33_spill] sm:$0xff] }
 0x2e7   : > { %vm674_vm11 = vcmp.lt.s32.totalorder %v4353_v11, 2  ;;  %v1286_v47 = vmul.f32 %v1285_v28, %v1283_v15  ;;  %vm2851_vm2 = vcmp.lt.s32.totalorder %v2850_v49, 0  ;;  %v1362_v62 = vmul.u32 %v1355_v24, %v1346_v31 }
 0x2e8   : > { %v5316_v33 = vsel %vm1205_vm6, %v5727_v51, %v5192_v30  ;;  %v780_v21 = vxor.u32 2147483648, %v5728_v7  ;;  %v2106_v45 = vsel %vm2851_vm2, 0, %v2850_v49  ;;  %vm1364_vm7 = vc.u32 %v5304_v48, %v5289_v3 }
 0x2e9   : > { %v681_v23 = vsel %vm674_vm11, %v677_v41, %v680_v50  ;;  %v783_v6 = vxor.u32 2147483648, %v5729_v26  ;;  %v2111_v38 = vsub.s32 4294967266, %v2106_v45  ;;  %v1366_v30 = vsel %vm1364_vm7, %v1365_v46, %v5290_v59  ;;  %v5733_v41 = vld [vmem:[#allocation31_spill] sm:$0xff] }
 0x2ea   : > { %vm779_vm10 = vcmp.eq.s32.totalorder %v5730_v18, 0  ;;  %vm782_vm5 = vcmp.eq.s32.totalorder %v5730_v18, 2  ;;  %v1367_v11 = vadd.s32 %v1366_v30, %v1362_v62  ;;  %vm778_vm14 = vcmp.lt.s32.totalorder %v5730_v18, 2  ;;  %v5736_v18 = vld [vmem:[#allocation23_spill] sm:$0xff] }
 0x2eb   : > { %v781_v24 = vsel %vm779_vm10, %v5729_v26, %v780_v21  ;;  %v784_v10 = vsel %vm782_vm5, %v783_v6, %v5728_v7  ;;  %v1287_v1 = vxor.u32 2147483648, %v1286_v47  ;;  %v2112_v60 = vadd.s32 127, %v2111_v38 }
 0x2ec   : > { %vm775_vm9 = vweird.f32 %v5731_v16  ;;  %v785_v0 = vsel %vm778_vm14, %v781_v24, %v784_v10  ;;  %v1368_v12 = vadd.s32 536870912, %v1367_v11  ;;  %v682_v59 = vsel %vm671_vm8, nan, %v681_v23 }
 0x2ed   : > { %v786_v15 = vsel %vm775_vm9, nan, %v785_v0  ;;  %v884_v8 = vxor.u32 2147483648, %v5732_v61  ;;  %3414 = vcosq.f32 %v5233_v52  ;;  %v1292_v57 = vsel %vm5298_vm3, 0, %v5316_v33 }
 0x2ee   : > { %v2107_v31 = vsub.s32 32, %v2106_v45  ;;  %v3117_v42 = vpack.c.bf16 %v786_v15, %v682_v59  ;;  %v2016_v28 = vsel %vm1933_vm13, %v2015_v34, %v2014_v29  ;;  %v5340_v49 = vshrl.u32 %v1368_v12, 30 }
 0x2ef   : > { %vm883_vm15 = vcmp.eq.s32.totalorder %v5733_v41, 0  ;;  %v887_v50 = vxor.u32 2147483648, %v5734_v17  ;;  %v2091_v51 = vadd.s32 %v5226_v39, %v5237_v53  ;;  %v2113_v46 = vshll.u32 %v2112_v60, 23  ;;  %v5735_v39 = vld [vmem:[#allocation39_spill] sm:$0xff] }
 0x2f0   : > { %3118 = vmatprep.subr.bf16.mxu1 %v3117_v42  ;;  %v885_v52 = vsel %vm883_vm15, %v5734_v17, %v884_v8  ;;  %vm886_vm8 = vcmp.eq.s32.totalorder %v5733_v41, 2  ;;  %v1288_v33 = vsel %vm1205_vm6, %v1287_v1, %v1286_v47  ;;  %v1370_v29 = vshll.u32 %v5340_v49, 30 }
 0x2f1   : > { %3120 = vmatpush3.bf16.msra.mxu1 %v3117_v42  ;;  %v888_v34 = vsel %vm886_vm8, %v887_v50, %v5732_v61  ;;  %v988_v62 = vxor.u32 2147483648, %v5027_v44  ;;  %v2109_v7 = vshrl.u32 %v2091_v51, %v2107_v31  ;;  %vm882_vm13 = vcmp.lt.s32.totalorder %v5733_v41, 2 }
 0x2f2   : > { %vm987_vm1 = vcmp.eq.s32.totalorder %v5735_v39, 0  ;;  %v991_v53 = vxor.u32 2147483648, %v5024_v32  ;;  %v5356_v21 = vsub.s32 %v1367_v11, %v1370_v29  ;;  %v889_v23 = vsel %vm882_vm13, %v885_v52, %v888_v34 }
 0x2f3   : > { %v989_v26 = vsel %vm987_vm1, %v5024_v32, %v988_v62  ;;  %vm990_vm6 = vcmp.eq.s32.totalorder %v5735_v39, 2  ;;  %v2108_v47 = vshll.u32 %v5283_v25, %v2106_v45  ;;  %v2114_v6 = vor.u32 4788187, %v2113_v46 }
 0x2f4   : > { %vm986_vm4 = vcmp.lt.s32.totalorder %v5735_v39, 2  ;;  %v992_v38 = vsel %vm990_vm6, %v991_v53, %v5027_v44  ;;  %v1373_v30 = vsub.s32 0, %v5356_v21  ;;  %vm879_vm11 = vweird.f32 %v5736_v18  ;;  %v5740_v53 = vld [vmem:[#allocation20_spill] sm:$0xff] }
 0x2f5   : > { %vm983_vm2 = vweird.f32 %v4130_v54  ;;  %v993_v11 = vsel %vm986_vm4, %v989_v26, %v992_v38  ;;  %v2110_v24 = vor.u32 %v2109_v7, %v2108_v47  ;;  %v890_v10 = vsel %vm879_vm11, nan, %v889_v23  ;;  %v5742_v26 = vld [vmem:[#allocation27_spill] sm:$0xff]  ;;  %v5743_v38 = vld [vmem:[#allocation26_spill] sm:$0xff] }
 0x2f6   : > { %v994_v1 = vsel %vm983_vm2, nan, %v993_v11  ;;  %v1092_v32 = vxor.u32 2147483648, %v5195_v35  ;;  %v1296_v60 = vadd.s32 3, %v1292_v57  ;;  %vm1309_vm7 = vcmp.lt.s32.totalorder %v4618_v13, 0 }
 0x2f7   : > { %v2821_v25 = vmin.u32 %v1373_v30, %v5356_v21  ;;  %v3121_v45 = vpack.c.bf16 %v994_v1, %v890_v10  ;;  %v3415_v16 = vpop.eup %3414  ;;  %v2019_v44 = vsel %vm5175_vm12, %v4344_v40, %v2016_v28  ;;  %v2115_v0 = vand.u32 2147483647, %v2114_v6 }
 0x2f8   : > { %vm1091_vm10 = vcmp.eq.s32.totalorder %v5083_v4, 0  ;;  %v1095_v54 = vxor.u32 2147483648, %v5127_v58  ;;  %v1291_v12 = vsel %vm5298_vm3, %v4424_v43, %v1288_v33  ;;  %vm1094_vm5 = vcmp.eq.s32.totalorder %v5083_v4, 2 }
 0x2f9   : > { %v1375_v59 = vclz %v2821_v25  ;;  %3122 = vmatprep.subr.bf16.mxu1 %v3121_v45  ;;  %v1093_v15 = vsel %vm1091_vm10, %v5127_v58, %v1092_v32  ;;  %v2117_v61 = vcvt.s32.f32 %v2110_v24  ;;  %v1393_v8 = vsub.s32 4, %v5340_v49  ;;  %v5744_v24 = vld [vmem:[#allocation36_spill] sm:$0xff]  ;;  %v5746_v25 = vld [vmem:[#allocation35_spill] sm:$0xff] }
 0x2fa   : > { %3124 = vmatpush3.bf16.msra.mxu1 %v3121_v45  ;;  %v1096_v56 = vsel %vm1094_vm5, %v1095_v54, %v5195_v35  ;;  %v1196_v57 = vxor.u32 2147483648, %v5277_v5  ;;  %vm2037_vm12 = vcmp.lt.s32.totalorder %v4516_v27, 0  ;;  %vm1090_vm14 = vcmp.lt.s32.totalorder %v5083_v4, 2 }
 0x2fb   : > { %v2822_v31 = vadd.s32 4294967294, %v1375_v59  ;;  %vm1195_vm3 = vcmp.eq.s32.totalorder %v5241_v20, 0  ;;  %v1199_v37 = vxor.u32 2147483648, %v3415_v16  ;;  %v2118_v42 = vmul.f32 %v2117_v61, %v2115_v0  ;;  %v5749_v59 = vld [vmem:[#allocation41_spill] sm:$0xff] }
 0x2fc   : > { %v1097_v58 = vsel %vm1090_vm14, %v1093_v15, %v1096_v56  ;;  %v1197_v28 = vsel %vm1195_vm3, %v3415_v16, %v1196_v57  ;;  %vm1198_vm9 = vcmp.eq.s32.totalorder %v5241_v20, 2  ;;  %v1363_v41 = vadd.s32 %v5289_v3, %v5304_v48  ;;  %v5747_v16 = vld [vmem:[#allocation22_spill] sm:$0xff] }
 0x2fd   : > { %vm2823_vm15 = vcmp.lt.s32.totalorder %v2822_v31, 0  ;;  %vm1194_vm8 = vcmp.lt.s32.totalorder %v5241_v20, 2  ;;  %v1200_v35 = vsel %vm1198_vm9, %v1199_v37, %v5277_v5  ;;  %vm1087_vm13 = vweird.f32 %v4148_v22  ;;  %v5753_v37 = vld [vmem:[#allocation32_spill] sm:$0xff] }
 0x2fe   : > { %v1378_v17 = vsel %vm2823_vm15, 0, %v2822_v31  ;;  %vm1191_vm1 = vweird.f32 %v4287_v2  ;;  %v1201_v4 = vsel %vm1194_vm8, %v1197_v28, %v1200_v35  ;;  %v1098_v46 = vsel %vm1087_vm13, nan, %v1097_v58 }
 0x2ff   : > { %v1379_v50 = vsub.s32 32, %v1378_v17  ;;  %v1383_v51 = vsub.s32 4294967266, %v1378_v17  ;;  %v1202_v52 = vsel %vm1191_vm1, nan, %v1201_v4  ;;  %3416 = vcosq.f32 %v2019_v44 }
 0x300   : > { %v2119_v33 = vxor.u32 2147483648, %v2118_v42  ;;  %v5395_v3 = vsel %vm1309_vm7, %v1393_v8, %v5340_v49  ;;  %v3125_v20 = vpack.c.bf16 %v1202_v52, %v1098_v46  ;;  %3418 = vsinq.f32 %v2019_v44 }
 0x301   : > { %v1380_v5 = vshll.u32 %v5356_v21, %v1378_v17  ;;  %v1381_v48 = vshrl.u32 %v1363_v41, %v1379_v50  ;;  %v1384_v22 = vadd.s32 127, %v1383_v51  ;;  %v5399_v2 = vand.u32 3, %v5247_v19  ;;  %v5741_v21 = vld [vmem:[#allocation28_spill] sm:$0xff] }
 0x302   : > { %3420 = vcosq.f32 %v1291_v12  ;;  %v5401_v29 = vand.u32 3, %v1296_v60  ;;  %v5737_v34 = vand.u32 2147483647, %v4618_v13  ;;  %3126 = vmatprep.subr.bf16.mxu1 %v3125_v20  ;;  %v5414_v19 = vsel %vm2037_vm12, %v2119_v33, %v2118_v42  ;;  %v5745_v60 = vld [vmem:[#allocation30_spill] sm:$0xff]  ;;  %v5754_v42 = vld [vmem:[#allocation40_spill] sm:$0xff] }
 0x303   : > { %3422 = vsinq.f32 %v1291_v12  ;;  %v1382_v49 = vor.u32 %v1381_v48, %v1380_v5  ;;  %v1385_v7 = vshll.u32 %v1384_v22, 23  ;;  %3128 = vmatpush3.bf16.msra.mxu1 %v3125_v20  ;;  %vm1503_vm4 = vweird.f32 %v5740_v53  ;;  %v5748_v12 = vld [vmem:[#allocation24_spill] sm:$0xff]  ;;  %v5755_v20 = vld [vmem:[#allocation43_spill] sm:$0xff] }
 0x304   : > { %vm5405_vm6 = vcmp.le.f32.partialorder %v5737_v34, 0.7853982  ;;  %v1508_v23 = vxor.u32 2147483648, %v5741_v21  ;;  %v1511_v47 = vxor.u32 2147483648, %v5742_v26  ;;  %vm1506_vm11 = vcmp.lt.s32.totalorder %v5743_v38, 2 }
 0x305   : > { %v1396_v39 = vsel %vm5405_vm6, 0, %v5395_v3  ;;  %v1386_v6 = vor.u32 4788187, %v1385_v7  ;;  %vm1507_vm2 = vcmp.eq.s32.totalorder %v5743_v38, 0  ;;  %vm1510_vm10 = vcmp.eq.s32.totalorder %v5743_v38, 2 }
 0x306   : > { %v1389_v30 = vcvt.s32.f32 %v1382_v49  ;;  %v1509_v18 = vsel %vm1507_vm2, %v5742_v26, %v1508_v23  ;;  %v1512_v11 = vsel %vm1510_vm10, %v1511_v47, %v5741_v21  ;;  %v1612_v10 = vxor.u32 2147483648, %v5744_v24  ;;  %v5756_v21 = vld [vmem:[#allocation42_spill] sm:$0xff]  ;;  %v5757_v23 = vld [vmem:[#allocation44_spill] sm:$0xff] }
 0x307   : > { %v1387_v1 = vand.u32 2147483647, %v1386_v6  ;;  %v1513_v32 = vsel %vm1506_vm11, %v1509_v18, %v1512_v11  ;;  %vm1611_vm5 = vcmp.eq.s32.totalorder %v5745_v60, 0  ;;  %v1615_v45 = vxor.u32 2147483648, %v5746_v25 }
 0x308   : > { %vm1607_vm14 = vweird.f32 %v5747_v16  ;;  %vm1610_vm3 = vcmp.lt.s32.totalorder %v5745_v60, 2  ;;  %v1613_v44 = vsel %vm1611_vm5, %v5746_v25, %v1612_v10  ;;  %vm1614_vm9 = vcmp.eq.s32.totalorder %v5745_v60, 2 }
 0x309   : > { %v1390_v0 = vmul.f32 %v1389_v30, %v1387_v1  ;;  %v1616_v54 = vsel %vm1614_vm9, %v1615_v45, %v5744_v24  ;;  %vm1711_vm15 = vweird.f32 %v5748_v12  ;;  %v1716_v15 = vxor.u32 2147483648, %v5749_v59  ;;  %v3417_v61 = vpop.eup %3416  ;;  %v2139_v24 = vld [vmem:[#allocation7] sm:$0xff] }
 0x30a   : > { %v5750_v8 = vand.u32 2147483647, %v4516_v27  ;;  %v1514_v57 = vsel %vm1503_vm4, nan, %v1513_v32  ;;  %v1617_v31 = vsel %vm1610_vm3, %v1613_v44, %v1616_v54  ;;  %vm1715_vm13 = vcmp.eq.s32.totalorder %v5753_v37, 0  ;;  %v3419_v28 = vpop.eup %3418  ;;  %v5758_v32 = vld [vmem:[#allocation25_spill] sm:$0xff] }
 0x30b   : > { %v1719_v58 = vxor.u32 2147483648, %v5754_v42  ;;  %v1391_v41 = vxor.u32 2147483648, %v1390_v0  ;;  %v1618_v35 = vsel %vm1607_vm14, nan, %v1617_v31  ;;  %v1717_v17 = vsel %vm1715_vm13, %v5754_v42, %v1716_v15 }
 0x30c   : > { %vm5436_vm8 = vcmp.le.f32.partialorder %v5750_v8, 0.7853982  ;;  %vm1718_vm1 = vcmp.eq.s32.totalorder %v5753_v37, 2  ;;  %v3421_v4 = vpop.eup %3420  ;;  %v5448_v50 = vpack.c.bf16 %v1618_v35, %v1514_v57  ;;  %vm1714_vm11 = vcmp.lt.s32.totalorder %v5753_v37, 2 }
 0x30d   : > { %v1720_v51 = vsel %vm1718_vm1, %v1719_v58, %v5749_v59  ;;  %v1820_v46 = vxor.u32 2147483648, %v5115_v9  ;;  %v3423_v52 = vpop.eup %3422  ;;  %v1392_v33 = vsel %vm1309_vm7, %v1391_v41, %v1390_v0  ;;  %vm1815_vm4 = vweird.f32 %v4132_v55 }
 0x30e   : > { %vm1819_vm2 = vcmp.eq.s32.totalorder %v4979_v63, 0  ;;  %v1823_v5 = vxor.u32 2147483648, %v5755_v20  ;;  %v1395_v48 = vsel %vm5405_vm6, %v4618_v13, %v1392_v33  ;;  %v1721_v22 = vsel %vm1714_vm11, %v1717_v17, %v1720_v51  ;;  %v2140_v51 = vld [vmem:[#allocation7 + $0x8] sm:$0xff] }
 0x30f   : > { %v1821_v34 = vsel %vm1819_vm2, %v5755_v20, %v1820_v46  ;;  %vm1822_vm10 = vcmp.eq.s32.totalorder %v4979_v63, 2  ;;  %3424 = vcosq.f32 %v1395_v48  ;;  %vm1818_vm5 = vcmp.lt.s32.totalorder %v4979_v63, 2  ;;  %v2141_v46 = vld [vmem:[#allocation7 + $0x10] sm:$0xff]  ;;  %v2144_v33 = vld [vmem:[#allocation7 + $0x28] sm:$0xff] }
 0x310   : > { %v1824_v49 = vsel %vm1822_vm10, %v1823_v5, %v5115_v9  ;;  %v1924_v7 = vxor.u32 2147483648, %v5272_v14  ;;  %3426 = vsinq.f32 %v1395_v48  ;;  %vm1923_vm7 = vcmp.eq.s32.totalorder %v5756_v21, 0  ;;  %v2145_v20 = vld [vmem:[#allocation7 + $0x30] sm:$0xff]  ;;  %v2147_v5 = vld [vmem:[#allocation7 + $0x40] sm:$0xff]  ;;  %v2148_v48 = vld [vmem:[#allocation7 + $0x48] sm:$0xff] }
 0x311   : > { %v1825_v53 = vsel %vm1818_vm5, %v1821_v34, %v1824_v49  ;;  %v1927_v26 = vxor.u32 2147483648, %v5757_v23  ;;  %v1722_v47 = vsel %vm1711_vm15, nan, %v1721_v22  ;;  %vm1926_vm14 = vcmp.eq.s32.totalorder %v5756_v21, 2  ;;  %v2149_v22 = vld [vmem:[#allocation7 + $0x50] sm:$0xff]  ;;  %v2150_v34 = vld [vmem:[#allocation7 + $0x58] sm:$0xff]  ;;  %v2151_v49 = vld [vmem:[#allocation7 + $0x60] sm:$0xff] }
 0x312   : > { %v1826_v6 = vsel %vm1815_vm4, nan, %v1825_v53  ;;  %v1925_v38 = vsel %vm1923_vm7, %v5757_v23, %v1924_v7  ;;  %v1400_v63 = vadd.s32 3, %v1396_v39  ;;  %v2028_v18 = vxor.u32 2147483648, %v3419_v28  ;;  %v2152_v7 = vld [vmem:[#allocation7 + $0x68] sm:$0xff]  ;;  %v2153_v53 = vld [vmem:[#allocation7 + $0x70] sm:$0xff]  ;;  %v2365_v23 = vld [vmem:[#allocation8] sm:$0xff] }
 0x313   : > { %v5478_v9 = vpack.c.bf16 %v1826_v6, %v1722_v47  ;;  %v1928_v30 = vsel %vm1926_vm14, %v1927_v26, %v5272_v14  ;;  %v2123_v55 = vsel %vm5436_vm8, %v4516_v27, %v5414_v19  ;;  %vm1922_vm3 = vcmp.lt.s32.totalorder %v5756_v21, 2  ;;  %v2154_v21 = vld [vmem:[#allocation7 + $0x78] sm:$0xff]  ;;  %3086 = vmatprep.mubr.f32.mxu0 %v2365_v23  ;;  %v2373_v26 = vld [vmem:[#allocation10] sm:$0xff]  ;;  %v2375_v47 = vld [vmem:[#allocation10 + $0x10] sm:$0xff] }
 0x314   : > { %vm2027_vm9 = vcmp.eq.s32.totalorder %v5399_v2, 0  ;;  %v2031_v11 = vxor.u32 2147483648, %v3417_v61  ;;  %v1300_v62 = vxor.u32 2147483648, %v3423_v52  ;;  %v1929_v10 = vsel %vm1922_vm3, %v1925_v38, %v1928_v30  ;;  %v2374_v38 = vld [vmem:[#allocation10 + $0x8] sm:$0xff] }
 0x315   : > { %v2029_v3 = vsel %vm2027_vm9, %v3417_v61, %v2028_v18  ;;  %vm2030_vm6 = vcmp.eq.s32.totalorder %v5399_v2, 2  ;;  %v1303_v39 = vxor.u32 2147483648, %v3421_v4  ;;  %vm2026_vm15 = vcmp.lt.s32.totalorder %v5399_v2, 2  ;;  %v2378_v30 = vld [vmem:[#allocation10 + $0x28] sm:$0xff]  ;;  %v2379_v18 = vld [vmem:[#allocation10 + $0x30] sm:$0xff] }
 0x316   : > { %v2032_v14 = vsel %vm2030_vm6, %v2031_v11, %v3419_v28  ;;  %vm2155_vm13 = vcmask 982016   ;;  %v2121_v1 = vsub.s32 4, %v5268_v36  ;;  %vm1919_vm1 = vweird.f32 %v5758_v32  ;;  %v2535_v11 = vld [vmem:[#allocation13] sm:$0x3] }
 0x317   : > { %vm2023_vm11 = vweird.f32 %v4344_v40  ;;  %v2033_v19 = vsel %vm2026_vm15, %v2029_v3, %v2032_v14  ;;  %3030 = vmatprep.mubr.msk.f32.mxu1 %vm2155_vm13, %v2139_v24  ;;  %3428 = vcosq.f32 %v2123_v55  ;;  %v1401_v60 = vand.u32 3, %v1400_v63  ;;  %v2376_v63 = vld [vmem:[#allocation10 + $0x18] sm:$0xff] }
 0x318   : > { %v1930_v25 = vsel %vm1919_vm1, nan, %v1929_v10  ;;  %v2034_v45 = vsel %vm2023_vm11, nan, %v2033_v19  ;;  %3430 = vsinq.f32 %v2123_v55  ;;  %vm1299_vm4 = vcmp.eq.s32.totalorder %v5401_v29, 0  ;;  %v2380_v55 = vld [vmem:[#allocation10 + $0x38] sm:$0xff] }
 0x319   : > { %vm1302_vm2 = vcmp.eq.s32.totalorder %v5401_v29, 2  ;;  %v3141_v2 = vpack.c.bf16 %v2034_v45, %v1930_v25  ;;  %v3425_v16 = vpop.eup %3424  ;;  %v1301_v44 = vsel %vm1299_vm4, %v3421_v4, %v1300_v62  ;;  %v2122_v40 = vsel %vm2037_vm12, %v2121_v1, %v5268_v36 }
 0x31a   : > { %v1304_v0 = vsel %vm1302_vm2, %v1303_v39, %v3423_v52  ;;  %v3427_v54 = vpop.eup %3426  ;;  %v1407_v12 = vxor.u32 2147483648, %v3425_v16  ;;  %vm1298_vm10 = vcmp.lt.s32.totalorder %v5401_v29, 2  ;;  %vm1406_vm5 = vcmp.eq.s32.totalorder %v1401_v60, 2  ;;  %v2143_v52 = vld [vmem:[#allocation7 + $0x20] sm:$0xff] }
 0x31b   : > { %v1404_v59 = vxor.u32 2147483648, %v3427_v54  ;;  %v1305_v15 = vsel %vm1298_vm10, %v1301_v44, %v1304_v0  ;;  %vm1403_vm7 = vcmp.eq.s32.totalorder %v1401_v60, 0  ;;  %vm1402_vm14 = vcmp.lt.s32.totalorder %v1401_v60, 2 }
 0x31c   : > { %v1408_v61 = vsel %vm1406_vm5, %v1407_v12, %v3427_v54  ;;  %v2124_v57 = vsel %vm5436_vm8, 0, %v2122_v40  ;;  %vm1295_vm3 = vweird.f32 %v4424_v43  ;;  %vm1399_vm9 = vweird.f32 %v4618_v13 }
 0x31d   : > { %v1405_v8 = vsel %vm1403_vm7, %v3425_v16, %v1404_v59  ;;  %v1306_v37 = vsel %vm1295_vm3, nan, %v1305_v15  ;;  %v2128_v58 = vadd.s32 3, %v2124_v57  ;;  %vm2127_vm15 = vweird.f32 %v4516_v27  ;;  %v2146_v27 = vld [vmem:[#allocation7 + $0x38] sm:$0xff] }
 0x31e   : > { %v1409_v31 = vsel %vm1402_vm14, %v1405_v8, %v1408_v61  ;;  %v3727_v6 = vmov 0  }
 0x31f   : > { %v1410_v36 = vsel %vm1399_vm9, nan, %v1409_v31  ;;  %v2129_v41 = vand.u32 3, %v2128_v58  ;;  %3370 = vset.pattern.permute.xlu0 %v3727_v6  ;;  %3371 = vset.pattern.permute.xlu1 %v3727_v6 }
 0x320   : > { %v3129_v42 = vpack.c.bf16 %v1410_v36, %v1306_v37  ;;  %2383 = vperm.xlu0 %3370, %v2373_v26   ;;  %2393 = vperm.xlu1 %3371, %v2375_v47  }
 0x321   : > { %v3429_v29 = vpop.eup %3428  ;;  %vm2131_vm12 = vcmp.eq.s32.totalorder %v2129_v41, 0  ;;  %vm2134_vm8 = vcmp.eq.s32.totalorder %v2129_v41, 2  ;;  %vm2130_vm6 = vcmp.lt.s32.totalorder %v2129_v41, 2 }
 0x322   : > { %v3431_v28 = vpop.eup %3430  ;;  %3130 = vmatprep.subr.bf16.mxu1 %v3129_v42  ;;  %v2135_v17 = vxor.u32 2147483648, %v3429_v29 }
 0x323   : > { %3132 = vmatpush3.bf16.msra.mxu1 %v3129_v42  ;;  %v2132_v35 = vxor.u32 2147483648, %v3431_v28 }
 0x324   : > { %3134 = vmatprep.subr.bf16.mxu1 %v5448_v50  ;;  %v2136_v13 = vsel %vm2134_vm8, %v2135_v17, %v3431_v28  ;;  %2388 = vperm.xlu0 %3370, %v2374_v38  }
 0x325   : > { %v2133_v43 = vsel %vm2131_vm12, %v3429_v29, %v2132_v35  ;;  %2398 = vperm.xlu1 %3371, %v2376_v63  }
 0x326   : > { %v2137_v56 = vsel %vm2130_vm6, %v2133_v43, %v2136_v13 }
 0x327   : > { %3136 = vmatpush3.bf16.msra.mxu1 %v5448_v50  ;;  %v2138_v4 = vsel %vm2127_vm15, nan, %v2137_v56  ;;  %v2142_v50 = vld [vmem:[#allocation7 + $0x18] sm:$0xff] }
 0x328   : > { %3138 = vmatprep.subr.bf16.mxu1 %v5478_v9 }
 0x329   : > { %2408 = vperm.xlu1 %3371, %v2378_v30  }
 0x32b   : > { %3140 = vmatpush3.bf16.msra.mxu1 %v5478_v9  ;;  %v2377_v9 = vld [vmem:[#allocation10 + $0x20] sm:$0xff] }
 0x32c   : > { %3142 = vmatprep.subr.bf16.mxu1 %v3141_v2  ;;  %2403 = vperm.xlu0 %3370, %v2377_v9  }
 0x32d   : > { %2418 = vperm.xlu1 %3371, %v2380_v55  }
 0x32f   : > { %3144 = vmatpush3.bf16.msra.mxu1 %v3141_v2 }
 0x330   : > { %3028 = vmatprep.subr.mxu1 %v2138_v4  ;;  %2413 = vperm.xlu0 %3370, %v2379_v18  }
 0x333   : > { %3029 = vmatpush3.msra.mxu1 %v2138_v4 }
 0x334   : > { %3031 = vmatmul.mubr.msk.f32.vlgmr.msra.gmra.mrb[14].mxu1 %vm2155_vm13, %v2140_v51  ;;  %2538 = vperm.xlu0 %3370, %v2535_v11  }
 0x335   : > { %3033 = vmatprep.mubr.msk.f32.mxu1 %vm2155_vm13, %v2141_v46 }
 0x338   : > { %3034 = vmatmul.mubr.msk.f32.gmra.mrb[16].mxu1 %vm2155_vm13, %v2142_v50  ;;  %v2366_v50 = vld [vmem:[#allocation8 + $0x8] sm:$0xff] }
 0x339   : > { %3036 = vmatprep.mubr.msk.f32.mxu1 %vm2155_vm13, %v2143_v52  ;;  %v2367_v52 = vld [vmem:[#allocation8 + $0x10] sm:$0xff] }
 0x33c   : > { %3037 = vmatmul.mubr.msk.f32.gmra.mrb[18].mxu1 %vm2155_vm13, %v2144_v33  ;;  %v2368_v33 = vld [vmem:[#allocation8 + $0x18] sm:$0xff] }
 0x33d   : > { %3039 = vmatprep.mubr.msk.f32.mxu1 %vm2155_vm13, %v2145_v20  ;;  %v2369_v20 = vld [vmem:[#allocation8 + $0x20] sm:$0xff] }
 0x340   : > { %3040 = vmatmul.mubr.msk.f32.gmra.mrb[20].mxu1 %vm2155_vm13, %v2146_v27  ;;  %v2370_v27 = vld [vmem:[#allocation8 + $0x28] sm:$0xff] }
 0x341   : > { %3042 = vmatprep.mubr.msk.f32.mxu1 %vm2155_vm13, %v2147_v5  ;;  %v2371_v5 = vld [vmem:[#allocation8 + $0x30] sm:$0xff] }
 0x344   : > { %3043 = vmatmul.mubr.msk.f32.gmra.mrb[22].mxu1 %vm2155_vm13, %v2148_v48  ;;  %v2372_v48 = vld [vmem:[#allocation8 + $0x38] sm:$0xff] }
 0x345   : > { %3045 = vmatprep.mubr.msk.f32.mxu1 %vm2155_vm13, %v2149_v22  ;;  %v5759_v22 = vmov 0.0  }
 0x348   : > { %3046 = vmatmul.mubr.msk.f32.gmra.mrb[24].mxu1 %vm2155_vm13, %v2150_v34  ;;  %v3728_v34 = vmov 0.0|0.0  }
 0x349   : > { %3048 = vmatprep.mubr.msk.f32.mxu1 %vm2155_vm13, %v2151_v49 }
 0x34c   : > { %3049 = vmatmul.mubr.msk.f32.gmra.mrb[26].mxu1 %vm2155_vm13, %v2152_v7 }
 0x34d   : > { %3051 = vmatprep.mubr.msk.f32.mxu1 %vm2155_vm13, %v2153_v53 }
 0x350   : > { %3052 = vmatmul.mubr.msk.f32.gmra.mrb[28].mxu1 %vm2155_vm13, %v2154_v21 }
 0x39f   : > { %v2384_v49 = vpop.permute.xlu0 %2383  ;;  %v2394_v7 = vpop.permute.xlu1 %2393 }
 0x3a3   : > { %v2389_v53 = vpop.permute.xlu0 %2388 }
 0x3a4   : > { %v2399_v21 = vpop.permute.xlu1 %2398 }
 0x3a8   : > { %v2409_v55 = vpop.permute.xlu1 %2408 }
 0x407   : > { %v3032_v24 = vpop.f32.mrb[14].mxu1 }
 0x408   : > { %v2350_v62 = vmax.f32 %v3032_v24, 0.0  ;;  %v2270_v10 = vpop.f32.mrb[15].mxu1 }
 0x409   : > { %v2349_v3 = vmax.f32 %v2270_v10, 0.0 }
 0x40b   : > { %v3145_v39 = vpack.c.bf16 %v2350_v62, %v2349_v3  ;;  %v3035_v14 = vpop.f32.mrb[16].mxu1  ;;  %v2404_v62 = vpop.permute.xlu0 %2403 }
 0x40c   : > { %v2352_v1 = vmax.f32 %v3035_v14, 0.0  ;;  %v2280_v32 = vpop.f32.mrb[17].mxu1 }
 0x40d   : > { %v2351_v19 = vmax.f32 %v2280_v32, 0.0  ;;  %3146 = vmatprep.subr.bf16.mxu0 %v3145_v39 }
 0x40e   : > { %3148 = vmatpush3.bf16.msra.mxu0 %v3145_v39 }
 0x40f   : > { %v3149_v60 = vpack.c.bf16 %v2352_v1, %v2351_v19  ;;  %v3038_v25 = vpop.f32.mrb[18].mxu1 }
 0x410   : > { %v2354_v45 = vmax.f32 %v3038_v25, 0.0  ;;  %v2290_v2 = vpop.f32.mrb[19].mxu1  ;;  %v2419_v25 = vpop.permute.xlu1 %2418 }
 0x411   : > { %v2353_v16 = vmax.f32 %v2290_v2, 0.0  ;;  %3150 = vmatprep.subr.bf16.mxu0 %v3149_v60 }
 0x412   : > { %3152 = vmatpush3.bf16.msra.mxu0 %v3149_v60 }
 0x413   : > { %v3153_v44 = vpack.c.bf16 %v2354_v45, %v2353_v16  ;;  %v3041_v0 = vpop.f32.mrb[20].mxu1  ;;  %v2414_v16 = vpop.permute.xlu0 %2413 }
 0x414   : > { %v2356_v54 = vmax.f32 %v3041_v0, 0.0  ;;  %v2300_v40 = vpop.f32.mrb[21].mxu1 }
 0x415   : > { %v2355_v12 = vmax.f32 %v2300_v40, 0.0  ;;  %3154 = vmatprep.subr.bf16.mxu0 %v3153_v44 }
 0x416   : > { %3156 = vmatpush3.bf16.msra.mxu0 %v3153_v44 }
 0x417   : > { %v3157_v59 = vpack.c.bf16 %v2356_v54, %v2355_v12  ;;  %v3044_v15 = vpop.f32.mrb[22].mxu1 }
 0x418   : > { %v2358_v61 = vmax.f32 %v3044_v15, 0.0  ;;  %v2310_v8 = vpop.f32.mrb[23].mxu1 }
 0x419   : > { %v2357_v57 = vmax.f32 %v2310_v8, 0.0  ;;  %3158 = vmatprep.subr.bf16.mxu0 %v3157_v59  ;;  %v2539_v8 = vpop.permute.xlu0 %2538 }
 0x41a   : > { %3160 = vmatpush3.bf16.msra.mxu0 %v3157_v59 }
 0x41b   : > { %v3161_v31 = vpack.c.bf16 %v2358_v61, %v2357_v57  ;;  %v3047_v37 = vpop.f32.mrb[24].mxu1  ;;  %v2534_v61 = vld [vmem:[#allocation11] sm:$0x3] }
 0x41c   : > { %v2360_v36 = vmax.f32 %v3047_v37, 0.0  ;;  %v2320_v42 = vpop.f32.mrb[25].mxu1 }
 0x41d   : > { %v2359_v58 = vmax.f32 %v2320_v42, 0.0  ;;  %3162 = vmatprep.subr.bf16.mxu0 %v3161_v31 }
 0x41e   : > { %3164 = vmatpush3.bf16.msra.mxu0 %v3161_v31 }
 0x41f   : > { %v3165_v29 = vpack.c.bf16 %v2360_v36, %v2359_v58  ;;  %v3050_v28 = vpop.f32.mrb[26].mxu1 }
 0x420   : > { %v2362_v41 = vmax.f32 %v3050_v28, 0.0  ;;  %v2330_v35 = vpop.f32.mrb[27].mxu1 }
 0x421   : > { %v2361_v17 = vmax.f32 %v2330_v35, 0.0  ;;  %3166 = vmatprep.subr.bf16.mxu0 %v3165_v29 }
 0x422   : > { %3168 = vmatpush3.bf16.msra.mxu0 %v3165_v29 }
 0x423   : > { %v3169_v43 = vpack.c.bf16 %v2362_v41, %v2361_v17  ;;  %v3053_v13 = vpop.f32.mrb[28].mxu1 }
 0x424   : > { %v2364_v56 = vmax.f32 %v3053_v13, 0.0  ;;  %v2340_v4 = vpop.f32.mrb[29].mxu1 }
 0x425   : > { %v2363_v51 = vmax.f32 %v2340_v4, 0.0  ;;  %3170 = vmatprep.subr.bf16.mxu0 %v3169_v43 }
 0x426   : > { %3172 = vmatpush3.bf16.msra.mxu0 %v3169_v43 }
 0x427   : > { %v3173_v46 = vpack.c.bf16 %v2364_v56, %v2363_v51 }
 0x429   : > { %3174 = vmatprep.subr.bf16.mxu0 %v3173_v46 }
 0x42a   : > { %3176 = vmatpush3.bf16.msra.mxu0 %v3173_v46 }
 0x42b   : > { %3177 = vmatprep.subr.bf16.mxu0 %v3728_v34 }
 0x42d   : > { %3087 = vmatmul.mubr.f32.vlgmr.msra.gmra.mrb[16].mxu0 %v2366_v50 }
 0x42e   : > { %3089 = vmatprep.mubr.f32.mxu0 %v2367_v52 }
 0x431   : > { %3090 = vmatmul.mubr.f32.gmra.mrb[18].mxu0 %v2368_v33 }
 0x432   : > { %3092 = vmatprep.mubr.f32.mxu0 %v2369_v20 }
 0x435   : > { %3093 = vmatmul.mubr.f32.gmra.mrb[20].mxu0 %v2370_v27 }
 0x436   : > { %3095 = vmatprep.mubr.f32.mxu0 %v2371_v5 }
 0x439   : > { %3096 = vmatmul.mubr.f32.gmra.mrb[22].mxu0 %v2372_v48 }
 0x43a   : > { %3114 = vmatprep.mubr.msk.f32.mxu0 %vm3720_vm0, %v5759_v22  ;;  %vm2541_vm0 = vcmask 523264  }
 0x500   : > { %v3088_v23 = vpop.f32.mrb[16].mxu0 }
 0x501   : > { %v2493_v26 = vadd.f32 %v3088_v23, %v2389_v53  ;;  %v2487_v47 = vpop.f32.mrb[17].mxu0 }
 0x502   : > { %v2488_v6 = vadd.f32 %v2487_v47, %v2384_v49 }
 0x503   : > { %v2527_v38 = vmax.f32 %v2493_v26, 0.0 }
 0x504   : > { %v2526_v63 = vmax.f32 %v2488_v6, 0.0  ;;  %v3091_v9 = vpop.f32.mrb[18].mxu0 }
 0x505   : > { %v2503_v30 = vadd.f32 %v3091_v9, %v2399_v21  ;;  %v2497_v18 = vpop.f32.mrb[19].mxu0 }
 0x506   : > { %v3178_v11 = vpack.c.bf16 %v2527_v38, %v2526_v63  ;;  %v2498_v24 = vadd.f32 %v2497_v18, %v2394_v7 }
 0x507   : > { %v2529_v10 = vmax.f32 %v2503_v30, 0.0 }
 0x508   : > { %v2528_v3 = vmax.f32 %v2498_v24, 0.0  ;;  %v3094_v39 = vpop.f32.mrb[20].mxu0  ;;  %3179 = vmatpush3.bf16.msra.mxu0 %v3178_v11 }
 0x509   : > { %v2513_v14 = vadd.f32 %v3094_v39, %v2409_v55  ;;  %v2507_v1 = vpop.f32.mrb[21].mxu0  ;;  %3180 = vmatprep.subr.bf16.mxu0 %v3728_v34 }
 0x50a   : > { %v3181_v32 = vpack.c.bf16 %v2529_v10, %v2528_v3  ;;  %v2508_v19 = vadd.f32 %v2507_v1, %v2404_v62 }
 0x50b   : > { %v2531_v60 = vmax.f32 %v2513_v14, 0.0 }
 0x50c   : > { %v2530_v45 = vmax.f32 %v2508_v19, 0.0  ;;  %v3097_v2 = vpop.f32.mrb[22].mxu0  ;;  %3182 = vmatpush3.bf16.msra.mxu0 %v3181_v32 }
 0x50d   : > { %v2523_v44 = vadd.f32 %v3097_v2, %v2419_v25  ;;  %v2517_v0 = vpop.f32.mrb[23].mxu0  ;;  %3183 = vmatprep.subr.bf16.mxu0 %v3728_v34 }
 0x50e   : > { %v3184_v54 = vpack.c.bf16 %v2531_v60, %v2530_v45  ;;  %v2518_v40 = vadd.f32 %v2517_v0, %v2414_v16 }
 0x50f   : > { %v2533_v12 = vmax.f32 %v2523_v44, 0.0 }
 0x510   : > { %v2532_v59 = vmax.f32 %v2518_v40, 0.0  ;;  %3185 = vmatpush3.bf16.msra.mxu0 %v3184_v54 }
 0x511   : > { %3186 = vmatprep.subr.bf16.mxu0 %v3728_v34 }
 0x512   : > { %v3187_v15 = vpack.c.bf16 %v2533_v12, %v2532_v59 }
 0x514   : > { %3188 = vmatpush3.bf16.msra.mxu0 %v3187_v15 }
 0x517   : > { %3115 = vmatmul.mubr.msk.f32.vlgmr.msra.gmra.mrb[24].mxu0 %vm2541_vm0, %v2534_v61 }
 0x5ea   : > { %v2611_v57 = vpop.f32.mrb[24].mxu0 }
 0x5eb   : > { %v2612_v31 = vadd.f32 %v2611_v57, %v2539_v8  ;;  %v3116_v37 = vpop.f32.mrb[25].mxu0 }
 0x5ed   : > { %2615 = vst [vmem:[%s376_s23] sm:$0x3] %v2612_v31 }
 0x5ee   : > { %3643 = shalt.err (!%p3640_p3)
}
 0x5ef   : > { %s3644_s9 = scalar_lea.hbm %s5530_s12, 32  ;;  %s3648_s8 = scalar_lea.hbm %s5581_s7, 64 }
 0x5f0   : > { %p3645_p4 = scmp.ne.s32.totalorder %s5530_s12, %s3644_s9  ;;  %p3649_p8 = scmp.lt.u32.totalorder %s5530_s12, %s5581_s7 }
 0x5f1   : > { %p3650_p5 = scmp.lt.u32.totalorder %s3648_s8, %s3644_s9  ;;  %p3652_p6 = scmp.lt.u32.totalorder %s3644_s9, %s5530_s12 }
 0x5f2   : > { %p3646_p10 = pnand %p3645_p4, %p5760_p9 }
 0x5f3   : > { %p3651_p7 = por %p3650_p5, %p3649_p8 }
 0x5f4   : > { %p3647_p11 = pneg %p3646_p10 }
 0x5f5   : > { %p3653_p12 = por %p3652_p6, %p3651_p7 }
 0x5f7   : > { %p3654_p1 = pnand %p3653_p12, %p3647_p11 }
 0x5f9   : > { %3657 = shalt.err (!%p3654_p1)
}
 0x5fa   : > { %3277 = dma.vmem_to_hbm [thread:$0]  (%p5760_p9), %s5532_s14, 32, %s5530_s12, %s2617_s28  }
 0x5fb PF: > { %s2642_s19 = sand.u32 1, %s3696_s24   ;;  %p5761_p13 = scmp.ne.s32.totalorder %s5642_s16, 0 }
 0x5fc   : > { %p5762_p0 = scmp.ge.s32.totalorder %s3708_s27, 2  ;;  %s2643_s21 = scalar_lea.sflag [#allocation4], %s2642_s19 }
 0x5fe   : > { %p3303_p2 = pnand %p5762_p0, %p5761_p13 }
 0x600   : > { %3691 = dma.done.wait (!%p3303_p2), %s2643_s21, 32  }
 0x601   : > { %3693 = vsyncadd (!%p3303_p2), %s2643_s21, 4294967264  ;;  %p23_p3 = scmp.ge.s32.totalorder %s3958_s11, 4   ;;  %s5763_s24 = smov %s3700_s25 }
 0x602   : > { %s5764_s25 = smov %s3704_s26  ;;  %s5765_s26 = smov %s3969_s13 }
 0x603   : > { %s5766_s27 = smov %s3958_s11  ;;  %25 = sbr.rel (!%p23_p3) target bundleno = 8 (0x8), region = 117 }
 0x60a   :  { %2648 = vsyncpa [#allocation3], 1 }
 0x60b   :  { %2650 = vsyncpa [#allocation3 + $0x1], 1 }
 0x60c   :  { %2651 = vsyncpa [#allocation6], 1 }
 0x60d   :  { %2652 = vsyncpa [#allocation9], 1 }
 0x60e   :  { %2653 = vsyncpa [#allocation12], 1 }
 0x60f   :  { %2654 = vsyncpa [#allocation4], 1 }
 0x610   :  { %2656 = vsyncpa [#allocation4 + $0x1], 1 }

</bundles_post_ra>
